<compile_context>
chip_gen: v5e
topology: v5e:2x2
jax: 0.10.0
libtpu: 0.0.40
codegen_flags: <defaults>
</compile_context>

<pallas_src>
import jax
import jax.numpy as jnp
from jax.experimental import pallas as pl
from jax.experimental.pallas import tpu as pltpu


def _round_up(v, m):
    return ((v + m - 1) // m) * m


def _vspec():
    return pl.BlockSpec(memory_space=pltpu.MemorySpace.VMEM)


# ----------------------------------------------------------------------------
# Fused forward kernel builder.
# ----------------------------------------------------------------------------
def _build_fused_kernel(plan, *, num_heads, out_pad):
    """Returns a kernel computing the whole MeshSegbis forward pass in VMEM."""
    H = num_heads
    n_enc = len(plan["enc"])
    n_conv = len(plan["convs"])
    n_dec = len(plan["dec"])

    def kernel(x_ref, adj_ref, small_ref, wpack_ref, o_ref):
        # -------- packed parameters (2 slabs -> 2 DMAs for all params) ----------
        sp = small_ref[...]                                   # [R, 128] f32

        def vec(row, c):                                      # (1, c) packed row slice
            return sp[row:row + 1, :c]

        def weight(idx, cin, cout):                           # (cin, cout) packed weight
            return wpack_ref[idx][:cin, :cout]

        # -------- graph quantities, computed once for all conv layers -----------
        adj = adj_ref[...]                                    # bf16 [N, N]
        n = adj.shape[0]
        # degree via MXU (exact f32 accumulation); avoids an f32 [N,N] copy.
        ones8 = jnp.ones((n, 8), jnp.bfloat16)
        deg = jnp.dot(adj, ones8, preferred_element_type=jnp.float32)[:, :1]   # [N,1]
        inv_deg = pl.reciprocal(jnp.maximum(deg, 1.0), approx=True)            # [N,1]

        # head -> lane-block expansion matrices, built once per distinct Cout.
        expand_cache = {}

        def get_expand(cout):
            if cout not in expand_cache:
                k_idx = jax.lax.broadcasted_iota(jnp.int32, (H, H * cout), 1)
                h_lo = jax.lax.broadcasted_iota(jnp.int32, (H, H * cout), 0) * cout
                expand_cache[cout] = (
                    (k_idx >= h_lo) & (k_idx < h_lo + cout)).astype(jnp.float32)
            return expand_cache[cout]

        for lp in plan["convs"]:
            get_expand(lp["cout"])

        # ---------------- input-encoder MLP: Linear+ReLU ... Linear --------------
        h = x_ref[...]
        for i, lp in enumerate(plan["enc"]):
            w = weight(lp["w"], lp["cin"], lp["cout"])
            h = jnp.dot(h, w, preferred_element_type=jnp.float32) + vec(lp["b"], lp["cout"])
            if i < n_enc - 1:
                h = jnp.maximum(h, 0.0)

        # ---------------- GNN: stacked FeaStConv (+ ReLU + BatchNorm) ------------
        for li, lp in enumerate(plan["convs"]):
            cout = lp["cout"]

            # fused (linear | u) matmul: z = [y | q],  y: [N, H*Cout], q: [N, H]
            wc = weight(lp["w"], lp["cin"], H * cout + H)
            z = jnp.dot(h, wc, preferred_element_type=jnp.float32)
            y = z[:, : H * cout]
            q = z[:, H * cout: H * cout + H]
            qc = q + vec(lp["c"], H)

            # separable head-softmax factors
            a = jnp.exp(qc - jnp.max(qc, axis=1, keepdims=True))          # [N, H]
            b = jnp.exp(jnp.min(q, axis=1, keepdims=True) - q)            # [N, H]

            # softmax denominator for every (i, j): D = a @ b^T   (MXU)
            d = jax.lax.dot_general(a, b, (((1,), (1,)), ((), ())),
                                    preferred_element_type=jnp.float32)   # [N, N] f32

            # masked pairwise weights kept in bf16 (1/deg folded out of this N^2 op)
            r = pl.reciprocal(jnp.maximum(d, 1e-20), approx=True)         # clamp: no inf
            w_pair = adj * r.astype(jnp.bfloat16)                         # bf16 [N, N]

            # expand b over each head's Cout block (tiny 0/1 MXU matmul, no shuffles)
            b_full = jnp.dot(b, get_expand(cout),
                             preferred_element_type=jnp.float32)          # [N, H*Cout]

            # single lane-dense bf16 aggregation matmul over all heads at once
            yb = (y * b_full).astype(jnp.bfloat16)                        # [N, H*Cout]
            zagg = jnp.dot(w_pair, yb,
                           preferred_element_type=jnp.float32)            # [N, H*Cout]

            # head-weighted reduction with the target-side factor a (1/deg applied here)
            a_w = a * inv_deg                                             # [N, H]
            out = a_w[:, 0:1] * zagg[:, :cout]
            for hh in range(1, H):
                out = out + a_w[:, hh:hh + 1] * zagg[:, hh * cout:(hh + 1) * cout]
            out = out + vec(lp["b"], cout)

            if li < n_conv - 1:
                # fused ReLU + BatchNorm1d (training-mode batch stats, eps=1e-5)
                out = jnp.maximum(out, 0.0)
                bp = plan["bns"][li]
                nrows = out.shape[0]
                mean = jnp.sum(out, axis=0, keepdims=True) / nrows
                cent = out - mean
                var = jnp.sum(cent * cent, axis=0, keepdims=True) / nrows
                out = (cent * jax.lax.rsqrt(var + 1e-5) * vec(bp["g"], cout)
                       + vec(bp["b"], cout))
            h = out

        # ---------------- final-projection MLP (last layer lane-dense) -----------
        for i, lp in enumerate(plan["dec"]):
            last = i == n_dec - 1
            cw = out_pad if last else lp["cout"]          # final weight/bias zero-padded
            w = weight(lp["w"], lp["cin"], cw)
            h = jnp.dot(h, w, preferred_element_type=jnp.float32) + vec(lp["b"], cw)
            if not last:
                h = jnp.maximum(h, 0.0)

        o_ref[...] = h.astype(o_ref.dtype)                # dense 128-lane store

    return kernel


# ----------------------------------------------------------------------------
# Wrapper: pack params into two slabs, build the fused kernel, single pallas_call.
# ----------------------------------------------------------------------------
def mesh_segbis_forward(x, adj, params, *, num_heads):
    n = x.shape[0]
    num_classes = params["decoder"][-1][0].shape[1]

    weights, vectors = [], []
    plan = {"enc": [], "convs": [], "bns": [], "dec": []}

    def add_w(w):
        weights.append(w)
        return len(weights) - 1

    def add_v(v):
        vectors.append(jnp.reshape(v, (-1,)))
        return len(vectors) - 1

    for w, b in params["encoder"]:
        plan["enc"].append(dict(w=add_w(w), b=add_v(b), cin=w.shape[0], cout=w.shape[1]))
    for cp in params["convs"]:
        wc = cp["wcomb"]
        plan["convs"].append(dict(w=add_w(wc), c=add_v(cp["c"]), b=add_v(cp["bias"]),
                                  cin=wc.shape[0], cout=cp["bias"].shape[-1]))
    for g, bt in params["bns"]:
        plan["bns"].append(dict(g=add_v(g), b=add_v(bt)))
    for w, b in params["decoder"]:
        plan["dec"].append(dict(w=add_w(w), b=add_v(b), cin=w.shape[0], cout=w.shape[1]))

    # pack all weight matrices into one zero-padded [n_w, MAX_IN, MAX_OUT] slab
    max_in = _round_up(max(w.shape[0] for w in weights), 8)
    max_out = _round_up(max(w.shape[1] for w in weights), 128)
    wpack = jnp.stack([
        jnp.pad(w, ((0, max_in - w.shape[0]), (0, max_out - w.shape[1])))
        for w in weights]).astype(jnp.float32)

    # pack all small (1,C) vectors into one zero-padded [R, VW] slab
    vec_w = _round_up(max(int(v.shape[0]) for v in vectors), 128)
    small = jnp.stack([jnp.pad(v, (0, vec_w - int(v.shape[0]))) for v in vectors])
    small = jnp.pad(small, ((0, _round_up(small.shape[0], 8) - small.shape[0]), (0, 0)))
    small = small.astype(jnp.float32)

    out_pad = _round_up(num_classes, 128)

    kernel = _build_fused_kernel(plan, num_heads=num_heads, out_pad=out_pad)

    out = pl.pallas_call(
        kernel,
        out_shape=jax.ShapeDtypeStruct((n, out_pad), jnp.float32),
        in_specs=[_vspec(), _vspec(), _vspec(), _vspec()],
        out_specs=_vspec(),
        # 48 MiB: above the 16/32 MiB scoped defaults, below v7x's 64 MiB physical.
        compiler_params=pltpu.CompilerParams(vmem_limit_bytes=48 * 1024 * 1024),
    )(x, adj.astype(jnp.bfloat16), small, wpack)

    return out[:, :num_classes]


# ----------------------------------------------------------------------------
# Parameter construction (deterministic, mimicking the PyTorch init).
# ----------------------------------------------------------------------------
def init_linear(key, fan_in, fan_out):
    kw, kb = jax.random.split(key)
    bound = 1.0 / jnp.sqrt(jnp.float32(fan_in))
    w = jax.random.uniform(kw, (fan_in, fan_out), jnp.float32, -bound, bound)
    b = jax.random.uniform(kb, (1, fan_out), jnp.float32, -bound, bound)
    return w, b


def init_feast(key, cin, cout, num_heads):
    k1, k2, k3, k4 = jax.random.split(key, 4)
    wlin = jax.random.uniform(k1, (cin, num_heads * cout), jnp.float32, 0.0, 1.0)
    wu = jax.random.uniform(k2, (cin, num_heads), jnp.float32, 0.0, 1.0)
    return dict(
        wcomb=jnp.concatenate([wlin, wu], axis=1),    # fused [Cin, H*Cout + H]
        c=0.1 * jax.random.normal(k3, (1, num_heads), jnp.float32),
        bias=0.1 * jax.random.normal(k4, (1, cout), jnp.float32),
    )


def build_params(key, in_features, encoder_channels, conv_channels,
                 decoder_channels, num_classes, num_heads):
    params = {"encoder": [], "convs": [], "bns": [], "decoder": []}

    enc_chs = [in_features] + list(encoder_channels)
    for cin, cout in zip(enc_chs[:-1], enc_chs[1:]):
        key, k = jax.random.split(key)
        params["encoder"].append(init_linear(k, cin, cout))

    gnn_chs = [encoder_channels[-1]] + list(conv_channels)
    for cin, cout in zip(gnn_chs[:-1], gnn_chs[1:]):
        key, k = jax.random.split(key)
        params["convs"].append(init_feast(k, cin, cout, num_heads))
    for ch in conv_channels[:-1]:
        params["bns"].append((jnp.ones((1, ch), jnp.float32),
                              jnp.zeros((1, ch), jnp.float32)))

    dec_chs = [conv_channels[-1]] + list(decoder_channels) + [num_classes]
    for cin, cout in zip(dec_chs[:-1], dec_chs[1:]):
        key, k = jax.random.split(key)
        params["decoder"].append(init_linear(k, cin, cout))
    return params


if __name__ == "__main__":
    N = 64                       # number of mesh vertices
    IN_FEATURES = 16
    ENCODER_CHANNELS = [32, 32]  # encoder_features == 32
    CONV_CHANNELS = [32, 32, 32]
    DECODER_CHANNELS = [32]
    NUM_CLASSES = 8
    NUM_HEADS = 4

    root = jax.random.PRNGKey(0)
    kx, kadj, kparams = jax.random.split(root, 3)

    # node features
    x = jax.random.normal(kx, (N, IN_FEATURES), jnp.float32)

    # random symmetric graph + self-loops -> dense adjacency mask
    probs = jax.random.uniform(kadj, (N, N))
    adj = (probs < 0.1).astype(jnp.float32)
    adj = jnp.maximum(adj, adj.T)
    adj = jnp.maximum(adj, jnp.eye(N, dtype=jnp.float32))

    params = build_params(kparams, IN_FEATURES, ENCODER_CHANNELS,
                          CONV_CHANNELS, DECODER_CHANNELS, NUM_CLASSES,
                          NUM_HEADS)

    out = mesh_segbis_forward(x, adj, params, num_heads=NUM_HEADS)
    out = jax.block_until_ready(out)

    assert out.shape == (N, NUM_CLASSES)
    assert bool(jnp.all(jnp.isfinite(out)))
    print("KERNEL_OK")
</pallas_src>

<mosaic_0001>
module attributes {stable_mosaic.version = 11 : i64} {
  func.func @kernel(%arg0: memref<64x16xf32, #tpu.memory_space<vmem>>, %arg1: memref<64x64xbf16, #tpu.memory_space<vmem>>, %arg2: memref<16x128xf32, #tpu.memory_space<vmem>>, %arg3: memref<7x32x256xf32, #tpu.memory_space<vmem>>, %arg4: memref<64x128xf32, #tpu.memory_space<vmem>>) attributes {dimension_semantics = [], scalar_prefetch = 0 : i64, scratch_operands = 0 : i64, tpu.core_type = #tpu.core_type<tc>} {
    %c0 = arith.constant 0 : index
    %c0_0 = arith.constant 0 : index
    %0 = vector.load %arg2[%c0, %c0_0] : memref<16x128xf32, #tpu.memory_space<vmem>>, vector<16x128xf32>
    %c0_1 = arith.constant 0 : index
    %c0_2 = arith.constant 0 : index
    %1 = vector.load %arg1[%c0_1, %c0_2] : memref<64x64xbf16, #tpu.memory_space<vmem>>, vector<64x64xbf16>
    %cst = arith.constant 1.000000e+00 : bf16
    %2 = vector.broadcast %cst : bf16 to vector<64x8xbf16>
    %cst_3 = arith.constant dense<0.000000e+00> : vector<64x8xf32>
    %3 = tpu.matmul %1, %2, %cst_3 {dimension_numbers = #tpu.dot_dimension_numbers<[1], [0], [0], [1], [0, 0, 1, 1], [], []>} : vector<64x64xbf16>, vector<64x8xbf16>, vector<64x8xf32> -> vector<64x8xf32>
    %4 = vector.extract_strided_slice %3 {offsets = [0, 0], sizes = [64, 1], strides = [1, 1]} : vector<64x8xf32> to vector<64x1xf32>
    %cst_4 = arith.constant 1.000000e+00 : f32
    %5 = vector.broadcast %cst_4 : f32 to vector<64x1xf32>
    %6 = arith.maximumf %4, %5 : vector<64x1xf32>
    %7 = tpu.reciprocal %6 {approx = true} : vector<64x1xf32> -> vector<64x1xf32>
    %8 = tpu.iota {dimensions = array<i32: 1>} : vector<4x128xi32>
    %9 = tpu.iota {dimensions = array<i32: 0>} : vector<4x128xi32>
    %c32_i32 = arith.constant 32 : i32
    %10 = vector.broadcast %c32_i32 : i32 to vector<4x128xi32>
    %11 = arith.muli %9, %10 : vector<4x128xi32>
    %12 = arith.cmpi sge, %8, %11 : vector<4x128xi32>
    %c32_i32_5 = arith.constant 32 : i32
    %13 = vector.broadcast %c32_i32_5 : i32 to vector<4x128xi32>
    %14 = arith.addi %11, %13 : vector<4x128xi32>
    %15 = arith.cmpi slt, %8, %14 : vector<4x128xi32>
    %16 = arith.andi %12, %15 : vector<4x128xi1>
    %17 = arith.extui %16 : vector<4x128xi1> to vector<4x128xi32>
    %18 = arith.sitofp %17 : vector<4x128xi32> to vector<4x128xf32>
    %c0_6 = arith.constant 0 : index
    %c0_7 = arith.constant 0 : index
    %19 = vector.load %arg0[%c0_6, %c0_7] : memref<64x16xf32, #tpu.memory_space<vmem>>, vector<64x16xf32>
    %c0_8 = arith.constant 0 : index
    %c0_9 = arith.constant 0 : index
    %c0_10 = arith.constant 0 : index
    %20 = vector.load %arg3[%c0_8, %c0_9, %c0_10] : memref<7x32x256xf32, #tpu.memory_space<vmem>>, vector<1x32x256xf32>
    %21 = vector.shape_cast %20 : vector<1x32x256xf32> to vector<32x256xf32>
    %22 = vector.extract_strided_slice %21 {offsets = [0, 0], sizes = [16, 32], strides = [1, 1]} : vector<32x256xf32> to vector<16x32xf32>
    %cst_11 = arith.constant dense<0.000000e+00> : vector<64x32xf32>
    %23 = tpu.matmul %19, %22, %cst_11 {dimension_numbers = #tpu.dot_dimension_numbers<[1], [0], [0], [1], [0, 0, 1, 1], [], []>} : vector<64x16xf32>, vector<16x32xf32>, vector<64x32xf32> -> vector<64x32xf32>
    %24 = vector.extract_strided_slice %0 {offsets = [0, 0], sizes = [1, 32], strides = [1, 1]} : vector<16x128xf32> to vector<1x32xf32>
    %25 = vector.broadcast %24 : vector<1x32xf32> to vector<64x32xf32>
    %26 = arith.addf %23, %25 : vector<64x32xf32>
    %cst_12 = arith.constant 0.000000e+00 : f32
    %27 = vector.broadcast %cst_12 : f32 to vector<64x32xf32>
    %28 = arith.maximumf %26, %27 : vector<64x32xf32>
    %c1 = arith.constant 1 : index
    %c0_13 = arith.constant 0 : index
    %c0_14 = arith.constant 0 : index
    %29 = vector.load %arg3[%c1, %c0_13, %c0_14] : memref<7x32x256xf32, #tpu.memory_space<vmem>>, vector<1x32x256xf32>
    %30 = vector.shape_cast %29 : vector<1x32x256xf32> to vector<32x256xf32>
    %31 = vector.extract_strided_slice %30 {offsets = [0, 0], sizes = [32, 32], strides = [1, 1]} : vector<32x256xf32> to vector<32x32xf32>
    %cst_15 = arith.constant dense<0.000000e+00> : vector<64x32xf32>
    %32 = tpu.matmul %28, %31, %cst_15 {dimension_numbers = #tpu.dot_dimension_numbers<[1], [0], [0], [1], [0, 0, 1, 1], [], []>} : vector<64x32xf32>, vector<32x32xf32>, vector<64x32xf32> -> vector<64x32xf32>
    %33 = vector.extract_strided_slice %0 {offsets = [1, 0], sizes = [1, 32], strides = [1, 1]} : vector<16x128xf32> to vector<1x32xf32>
    %34 = vector.broadcast %33 : vector<1x32xf32> to vector<64x32xf32>
    %35 = arith.addf %32, %34 : vector<64x32xf32>
    %c2 = arith.constant 2 : index
    %c0_16 = arith.constant 0 : index
    %c0_17 = arith.constant 0 : index
    %36 = vector.load %arg3[%c2, %c0_16, %c0_17] : memref<7x32x256xf32, #tpu.memory_space<vmem>>, vector<1x32x256xf32>
    %37 = vector.shape_cast %36 : vector<1x32x256xf32> to vector<32x256xf32>
    %38 = vector.extract_strided_slice %37 {offsets = [0, 0], sizes = [32, 132], strides = [1, 1]} : vector<32x256xf32> to vector<32x132xf32>
    %cst_18 = arith.constant dense<0.000000e+00> : vector<64x132xf32>
    %39 = tpu.matmul %35, %38, %cst_18 {dimension_numbers = #tpu.dot_dimension_numbers<[1], [0], [0], [1], [0, 0, 1, 1], [], []>} : vector<64x32xf32>, vector<32x132xf32>, vector<64x132xf32> -> vector<64x132xf32>
    %40 = vector.extract_strided_slice %39 {offsets = [0, 0], sizes = [64, 128], strides = [1, 1]} : vector<64x132xf32> to vector<64x128xf32>
    %41 = vector.extract_strided_slice %39 {offsets = [0, 128], sizes = [64, 4], strides = [1, 1]} : vector<64x132xf32> to vector<64x4xf32>
    %42 = vector.extract_strided_slice %0 {offsets = [2, 0], sizes = [1, 4], strides = [1, 1]} : vector<16x128xf32> to vector<1x4xf32>
    %43 = vector.broadcast %42 : vector<1x4xf32> to vector<64x4xf32>
    %44 = arith.addf %41, %43 : vector<64x4xf32>
    %cst_19 = arith.constant dense<0xFF800000> : vector<64xf32>
    %45 = vector.multi_reduction <maximumf>, %44, %cst_19 [1] : vector<64x4xf32> to vector<64xf32>
    %46 = vector.shape_cast %45 : vector<64xf32> to vector<64x1xf32>
    %47 = vector.broadcast %46 : vector<64x1xf32> to vector<64x4xf32>
    %48 = arith.subf %44, %47 : vector<64x4xf32>
    %49 = math.exp %48 : vector<64x4xf32>
    %cst_20 = arith.constant dense<0x7F800000> : vector<64xf32>
    %50 = vector.multi_reduction <minimumf>, %41, %cst_20 [1] : vector<64x4xf32> to vector<64xf32>
    %51 = vector.shape_cast %50 : vector<64xf32> to vector<64x1xf32>
    %52 = vector.broadcast %51 : vector<64x1xf32> to vector<64x4xf32>
    %53 = arith.subf %52, %41 : vector<64x4xf32>
    %54 = math.exp %53 : vector<64x4xf32>
    %cst_21 = arith.constant dense<0.000000e+00> : vector<64x64xf32>
    %55 = tpu.matmul %49, %54, %cst_21 {dimension_numbers = #tpu.dot_dimension_numbers<[1], [1], [0], [0], [0, 0, 1, 0], [], []>} : vector<64x4xf32>, vector<64x4xf32>, vector<64x64xf32> -> vector<64x64xf32>
    %cst_22 = arith.constant 9.99999968E-21 : f32
    %56 = vector.broadcast %cst_22 : f32 to vector<64x64xf32>
    %57 = arith.maximumf %55, %56 : vector<64x64xf32>
    %58 = tpu.reciprocal %57 {approx = true} : vector<64x64xf32> -> vector<64x64xf32>
    %59 = arith.truncf %58 : vector<64x64xf32> to vector<64x64xbf16>
    %60 = arith.mulf %1, %59 : vector<64x64xbf16>
    %cst_23 = arith.constant dense<0.000000e+00> : vector<64x128xf32>
    %61 = tpu.matmul %54, %18, %cst_23 {dimension_numbers = #tpu.dot_dimension_numbers<[1], [0], [0], [1], [0, 0, 1, 1], [], []>} : vector<64x4xf32>, vector<4x128xf32>, vector<64x128xf32> -> vector<64x128xf32>
    %62 = arith.mulf %40, %61 : vector<64x128xf32>
    %63 = arith.truncf %62 : vector<64x128xf32> to vector<64x128xbf16>
    %cst_24 = arith.constant dense<0.000000e+00> : vector<64x128xf32>
    %64 = tpu.matmul %60, %63, %cst_24 {dimension_numbers = #tpu.dot_dimension_numbers<[1], [0], [0], [1], [0, 0, 1, 1], [], []>} : vector<64x64xbf16>, vector<64x128xbf16>, vector<64x128xf32> -> vector<64x128xf32>
    %65 = vector.broadcast %7 : vector<64x1xf32> to vector<64x4xf32>
    %66 = arith.mulf %49, %65 : vector<64x4xf32>
    %67 = vector.extract_strided_slice %66 {offsets = [0, 0], sizes = [64, 1], strides = [1, 1]} : vector<64x4xf32> to vector<64x1xf32>
    %68 = vector.extract_strided_slice %64 {offsets = [0, 0], sizes = [64, 32], strides = [1, 1]} : vector<64x128xf32> to vector<64x32xf32>
    %69 = vector.broadcast %67 : vector<64x1xf32> to vector<64x32xf32>
    %70 = arith.mulf %69, %68 : vector<64x32xf32>
    %71 = vector.extract_strided_slice %66 {offsets = [0, 1], sizes = [64, 1], strides = [1, 1]} : vector<64x4xf32> to vector<64x1xf32>
    %72 = vector.extract_strided_slice %64 {offsets = [0, 32], sizes = [64, 32], strides = [1, 1]} : vector<64x128xf32> to vector<64x32xf32>
    %73 = vector.broadcast %71 : vector<64x1xf32> to vector<64x32xf32>
    %74 = arith.mulf %73, %72 : vector<64x32xf32>
    %75 = arith.addf %70, %74 : vector<64x32xf32>
    %76 = vector.extract_strided_slice %66 {offsets = [0, 2], sizes = [64, 1], strides = [1, 1]} : vector<64x4xf32> to vector<64x1xf32>
    %77 = vector.extract_strided_slice %64 {offsets = [0, 64], sizes = [64, 32], strides = [1, 1]} : vector<64x128xf32> to vector<64x32xf32>
    %78 = vector.broadcast %76 : vector<64x1xf32> to vector<64x32xf32>
    %79 = arith.mulf %78, %77 : vector<64x32xf32>
    %80 = arith.addf %75, %79 : vector<64x32xf32>
    %81 = vector.extract_strided_slice %66 {offsets = [0, 3], sizes = [64, 1], strides = [1, 1]} : vector<64x4xf32> to vector<64x1xf32>
    %82 = vector.extract_strided_slice %64 {offsets = [0, 96], sizes = [64, 32], strides = [1, 1]} : vector<64x128xf32> to vector<64x32xf32>
    %83 = vector.broadcast %81 : vector<64x1xf32> to vector<64x32xf32>
    %84 = arith.mulf %83, %82 : vector<64x32xf32>
    %85 = arith.addf %80, %84 : vector<64x32xf32>
    %86 = vector.extract_strided_slice %0 {offsets = [3, 0], sizes = [1, 32], strides = [1, 1]} : vector<16x128xf32> to vector<1x32xf32>
    %87 = vector.broadcast %86 : vector<1x32xf32> to vector<64x32xf32>
    %88 = arith.addf %85, %87 : vector<64x32xf32>
    %cst_25 = arith.constant 0.000000e+00 : f32
    %89 = vector.broadcast %cst_25 : f32 to vector<64x32xf32>
    %90 = arith.maximumf %88, %89 : vector<64x32xf32>
    %cst_26 = arith.constant dense<0.000000e+00> : vector<32xf32>
    %91 = vector.multi_reduction <add>, %90, %cst_26 [0] : vector<64x32xf32> to vector<32xf32>
    %92 = vector.shape_cast %91 : vector<32xf32> to vector<1x32xf32>
    %cst_27 = arith.constant 6.400000e+01 : f32
    %93 = vector.broadcast %cst_27 : f32 to vector<1x32xf32>
    %94 = arith.divf %92, %93 : vector<1x32xf32>
    %95 = vector.broadcast %94 : vector<1x32xf32> to vector<64x32xf32>
    %96 = arith.subf %90, %95 : vector<64x32xf32>
    %97 = arith.mulf %96, %96 : vector<64x32xf32>
    %cst_28 = arith.constant dense<0.000000e+00> : vector<32xf32>
    %98 = vector.multi_reduction <add>, %97, %cst_28 [0] : vector<64x32xf32> to vector<32xf32>
    %99 = vector.shape_cast %98 : vector<32xf32> to vector<1x32xf32>
    %cst_29 = arith.constant 6.400000e+01 : f32
    %100 = vector.broadcast %cst_29 : f32 to vector<1x32xf32>
    %101 = arith.divf %99, %100 : vector<1x32xf32>
    %cst_30 = arith.constant 9.99999974E-6 : f32
    %102 = vector.broadcast %cst_30 : f32 to vector<1x32xf32>
    %103 = arith.addf %101, %102 : vector<1x32xf32>
    %104 = math.rsqrt %103 : vector<1x32xf32>
    %105 = vector.broadcast %104 : vector<1x32xf32> to vector<64x32xf32>
    %106 = arith.mulf %96, %105 : vector<64x32xf32>
    %107 = vector.extract_strided_slice %0 {offsets = [8, 0], sizes = [1, 32], strides = [1, 1]} : vector<16x128xf32> to vector<1x32xf32>
    %108 = vector.broadcast %107 : vector<1x32xf32> to vector<64x32xf32>
    %109 = arith.mulf %106, %108 : vector<64x32xf32>
    %110 = vector.extract_strided_slice %0 {offsets = [9, 0], sizes = [1, 32], strides = [1, 1]} : vector<16x128xf32> to vector<1x32xf32>
    %111 = vector.broadcast %110 : vector<1x32xf32> to vector<64x32xf32>
    %112 = arith.addf %109, %111 : vector<64x32xf32>
    %c3 = arith.constant 3 : index
    %c0_31 = arith.constant 0 : index
    %c0_32 = arith.constant 0 : index
    %113 = vector.load %arg3[%c3, %c0_31, %c0_32] : memref<7x32x256xf32, #tpu.memory_space<vmem>>, vector<1x32x256xf32>
    %114 = vector.shape_cast %113 : vector<1x32x256xf32> to vector<32x256xf32>
    %115 = vector.extract_strided_slice %114 {offsets = [0, 0], sizes = [32, 132], strides = [1, 1]} : vector<32x256xf32> to vector<32x132xf32>
    %cst_33 = arith.constant dense<0.000000e+00> : vector<64x132xf32>
    %116 = tpu.matmul %112, %115, %cst_33 {dimension_numbers = #tpu.dot_dimension_numbers<[1], [0], [0], [1], [0, 0, 1, 1], [], []>} : vector<64x32xf32>, vector<32x132xf32>, vector<64x132xf32> -> vector<64x132xf32>
    %117 = vector.extract_strided_slice %116 {offsets = [0, 0], sizes = [64, 128], strides = [1, 1]} : vector<64x132xf32> to vector<64x128xf32>
    %118 = vector.extract_strided_slice %116 {offsets = [0, 128], sizes = [64, 4], strides = [1, 1]} : vector<64x132xf32> to vector<64x4xf32>
    %119 = vector.extract_strided_slice %0 {offsets = [4, 0], sizes = [1, 4], strides = [1, 1]} : vector<16x128xf32> to vector<1x4xf32>
    %120 = vector.broadcast %119 : vector<1x4xf32> to vector<64x4xf32>
    %121 = arith.addf %118, %120 : vector<64x4xf32>
    %cst_34 = arith.constant dense<0xFF800000> : vector<64xf32>
    %122 = vector.multi_reduction <maximumf>, %121, %cst_34 [1] : vector<64x4xf32> to vector<64xf32>
    %123 = vector.shape_cast %122 : vector<64xf32> to vector<64x1xf32>
    %124 = vector.broadcast %123 : vector<64x1xf32> to vector<64x4xf32>
    %125 = arith.subf %121, %124 : vector<64x4xf32>
    %126 = math.exp %125 : vector<64x4xf32>
    %cst_35 = arith.constant dense<0x7F800000> : vector<64xf32>
    %127 = vector.multi_reduction <minimumf>, %118, %cst_35 [1] : vector<64x4xf32> to vector<64xf32>
    %128 = vector.shape_cast %127 : vector<64xf32> to vector<64x1xf32>
    %129 = vector.broadcast %128 : vector<64x1xf32> to vector<64x4xf32>
    %130 = arith.subf %129, %118 : vector<64x4xf32>
    %131 = math.exp %130 : vector<64x4xf32>
    %cst_36 = arith.constant dense<0.000000e+00> : vector<64x64xf32>
    %132 = tpu.matmul %126, %131, %cst_36 {dimension_numbers = #tpu.dot_dimension_numbers<[1], [1], [0], [0], [0, 0, 1, 0], [], []>} : vector<64x4xf32>, vector<64x4xf32>, vector<64x64xf32> -> vector<64x64xf32>
    %cst_37 = arith.constant 9.99999968E-21 : f32
    %133 = vector.broadcast %cst_37 : f32 to vector<64x64xf32>
    %134 = arith.maximumf %132, %133 : vector<64x64xf32>
    %135 = tpu.reciprocal %134 {approx = true} : vector<64x64xf32> -> vector<64x64xf32>
    %136 = arith.truncf %135 : vector<64x64xf32> to vector<64x64xbf16>
    %137 = arith.mulf %1, %136 : vector<64x64xbf16>
    %cst_38 = arith.constant dense<0.000000e+00> : vector<64x128xf32>
    %138 = tpu.matmul %131, %18, %cst_38 {dimension_numbers = #tpu.dot_dimension_numbers<[1], [0], [0], [1], [0, 0, 1, 1], [], []>} : vector<64x4xf32>, vector<4x128xf32>, vector<64x128xf32> -> vector<64x128xf32>
    %139 = arith.mulf %117, %138 : vector<64x128xf32>
    %140 = arith.truncf %139 : vector<64x128xf32> to vector<64x128xbf16>
    %cst_39 = arith.constant dense<0.000000e+00> : vector<64x128xf32>
    %141 = tpu.matmul %137, %140, %cst_39 {dimension_numbers = #tpu.dot_dimension_numbers<[1], [0], [0], [1], [0, 0, 1, 1], [], []>} : vector<64x64xbf16>, vector<64x128xbf16>, vector<64x128xf32> -> vector<64x128xf32>
    %142 = vector.broadcast %7 : vector<64x1xf32> to vector<64x4xf32>
    %143 = arith.mulf %126, %142 : vector<64x4xf32>
    %144 = vector.extract_strided_slice %143 {offsets = [0, 0], sizes = [64, 1], strides = [1, 1]} : vector<64x4xf32> to vector<64x1xf32>
    %145 = vector.extract_strided_slice %141 {offsets = [0, 0], sizes = [64, 32], strides = [1, 1]} : vector<64x128xf32> to vector<64x32xf32>
    %146 = vector.broadcast %144 : vector<64x1xf32> to vector<64x32xf32>
    %147 = arith.mulf %146, %145 : vector<64x32xf32>
    %148 = vector.extract_strided_slice %143 {offsets = [0, 1], sizes = [64, 1], strides = [1, 1]} : vector<64x4xf32> to vector<64x1xf32>
    %149 = vector.extract_strided_slice %141 {offsets = [0, 32], sizes = [64, 32], strides = [1, 1]} : vector<64x128xf32> to vector<64x32xf32>
    %150 = vector.broadcast %148 : vector<64x1xf32> to vector<64x32xf32>
    %151 = arith.mulf %150, %149 : vector<64x32xf32>
    %152 = arith.addf %147, %151 : vector<64x32xf32>
    %153 = vector.extract_strided_slice %143 {offsets = [0, 2], sizes = [64, 1], strides = [1, 1]} : vector<64x4xf32> to vector<64x1xf32>
    %154 = vector.extract_strided_slice %141 {offsets = [0, 64], sizes = [64, 32], strides = [1, 1]} : vector<64x128xf32> to vector<64x32xf32>
    %155 = vector.broadcast %153 : vector<64x1xf32> to vector<64x32xf32>
    %156 = arith.mulf %155, %154 : vector<64x32xf32>
    %157 = arith.addf %152, %156 : vector<64x32xf32>
    %158 = vector.extract_strided_slice %143 {offsets = [0, 3], sizes = [64, 1], strides = [1, 1]} : vector<64x4xf32> to vector<64x1xf32>
    %159 = vector.extract_strided_slice %141 {offsets = [0, 96], sizes = [64, 32], strides = [1, 1]} : vector<64x128xf32> to vector<64x32xf32>
    %160 = vector.broadcast %158 : vector<64x1xf32> to vector<64x32xf32>
    %161 = arith.mulf %160, %159 : vector<64x32xf32>
    %162 = arith.addf %157, %161 : vector<64x32xf32>
    %163 = vector.extract_strided_slice %0 {offsets = [5, 0], sizes = [1, 32], strides = [1, 1]} : vector<16x128xf32> to vector<1x32xf32>
    %164 = vector.broadcast %163 : vector<1x32xf32> to vector<64x32xf32>
    %165 = arith.addf %162, %164 : vector<64x32xf32>
    %cst_40 = arith.constant 0.000000e+00 : f32
    %166 = vector.broadcast %cst_40 : f32 to vector<64x32xf32>
    %167 = arith.maximumf %165, %166 : vector<64x32xf32>
    %cst_41 = arith.constant dense<0.000000e+00> : vector<32xf32>
    %168 = vector.multi_reduction <add>, %167, %cst_41 [0] : vector<64x32xf32> to vector<32xf32>
    %169 = vector.shape_cast %168 : vector<32xf32> to vector<1x32xf32>
    %cst_42 = arith.constant 6.400000e+01 : f32
    %170 = vector.broadcast %cst_42 : f32 to vector<1x32xf32>
    %171 = arith.divf %169, %170 : vector<1x32xf32>
    %172 = vector.broadcast %171 : vector<1x32xf32> to vector<64x32xf32>
    %173 = arith.subf %167, %172 : vector<64x32xf32>
    %174 = arith.mulf %173, %173 : vector<64x32xf32>
    %cst_43 = arith.constant dense<0.000000e+00> : vector<32xf32>
    %175 = vector.multi_reduction <add>, %174, %cst_43 [0] : vector<64x32xf32> to vector<32xf32>
    %176 = vector.shape_cast %175 : vector<32xf32> to vector<1x32xf32>
    %cst_44 = arith.constant 6.400000e+01 : f32
    %177 = vector.broadcast %cst_44 : f32 to vector<1x32xf32>
    %178 = arith.divf %176, %177 : vector<1x32xf32>
    %cst_45 = arith.constant 9.99999974E-6 : f32
    %179 = vector.broadcast %cst_45 : f32 to vector<1x32xf32>
    %180 = arith.addf %178, %179 : vector<1x32xf32>
    %181 = math.rsqrt %180 : vector<1x32xf32>
    %182 = vector.broadcast %181 : vector<1x32xf32> to vector<64x32xf32>
    %183 = arith.mulf %173, %182 : vector<64x32xf32>
    %184 = vector.extract_strided_slice %0 {offsets = [10, 0], sizes = [1, 32], strides = [1, 1]} : vector<16x128xf32> to vector<1x32xf32>
    %185 = vector.broadcast %184 : vector<1x32xf32> to vector<64x32xf32>
    %186 = arith.mulf %183, %185 : vector<64x32xf32>
    %187 = vector.extract_strided_slice %0 {offsets = [11, 0], sizes = [1, 32], strides = [1, 1]} : vector<16x128xf32> to vector<1x32xf32>
    %188 = vector.broadcast %187 : vector<1x32xf32> to vector<64x32xf32>
    %189 = arith.addf %186, %188 : vector<64x32xf32>
    %c4 = arith.constant 4 : index
    %c0_46 = arith.constant 0 : index
    %c0_47 = arith.constant 0 : index
    %190 = vector.load %arg3[%c4, %c0_46, %c0_47] : memref<7x32x256xf32, #tpu.memory_space<vmem>>, vector<1x32x256xf32>
    %191 = vector.shape_cast %190 : vector<1x32x256xf32> to vector<32x256xf32>
    %192 = vector.extract_strided_slice %191 {offsets = [0, 0], sizes = [32, 132], strides = [1, 1]} : vector<32x256xf32> to vector<32x132xf32>
    %cst_48 = arith.constant dense<0.000000e+00> : vector<64x132xf32>
    %193 = tpu.matmul %189, %192, %cst_48 {dimension_numbers = #tpu.dot_dimension_numbers<[1], [0], [0], [1], [0, 0, 1, 1], [], []>} : vector<64x32xf32>, vector<32x132xf32>, vector<64x132xf32> -> vector<64x132xf32>
    %194 = vector.extract_strided_slice %193 {offsets = [0, 0], sizes = [64, 128], strides = [1, 1]} : vector<64x132xf32> to vector<64x128xf32>
    %195 = vector.extract_strided_slice %193 {offsets = [0, 128], sizes = [64, 4], strides = [1, 1]} : vector<64x132xf32> to vector<64x4xf32>
    %196 = vector.extract_strided_slice %0 {offsets = [6, 0], sizes = [1, 4], strides = [1, 1]} : vector<16x128xf32> to vector<1x4xf32>
    %197 = vector.broadcast %196 : vector<1x4xf32> to vector<64x4xf32>
    %198 = arith.addf %195, %197 : vector<64x4xf32>
    %cst_49 = arith.constant dense<0xFF800000> : vector<64xf32>
    %199 = vector.multi_reduction <maximumf>, %198, %cst_49 [1] : vector<64x4xf32> to vector<64xf32>
    %200 = vector.shape_cast %199 : vector<64xf32> to vector<64x1xf32>
    %201 = vector.broadcast %200 : vector<64x1xf32> to vector<64x4xf32>
    %202 = arith.subf %198, %201 : vector<64x4xf32>
    %203 = math.exp %202 : vector<64x4xf32>
    %cst_50 = arith.constant dense<0x7F800000> : vector<64xf32>
    %204 = vector.multi_reduction <minimumf>, %195, %cst_50 [1] : vector<64x4xf32> to vector<64xf32>
    %205 = vector.shape_cast %204 : vector<64xf32> to vector<64x1xf32>
    %206 = vector.broadcast %205 : vector<64x1xf32> to vector<64x4xf32>
    %207 = arith.subf %206, %195 : vector<64x4xf32>
    %208 = math.exp %207 : vector<64x4xf32>
    %cst_51 = arith.constant dense<0.000000e+00> : vector<64x64xf32>
    %209 = tpu.matmul %203, %208, %cst_51 {dimension_numbers = #tpu.dot_dimension_numbers<[1], [1], [0], [0], [0, 0, 1, 0], [], []>} : vector<64x4xf32>, vector<64x4xf32>, vector<64x64xf32> -> vector<64x64xf32>
    %cst_52 = arith.constant 9.99999968E-21 : f32
    %210 = vector.broadcast %cst_52 : f32 to vector<64x64xf32>
    %211 = arith.maximumf %209, %210 : vector<64x64xf32>
    %212 = tpu.reciprocal %211 {approx = true} : vector<64x64xf32> -> vector<64x64xf32>
    %213 = arith.truncf %212 : vector<64x64xf32> to vector<64x64xbf16>
    %214 = arith.mulf %1, %213 : vector<64x64xbf16>
    %cst_53 = arith.constant dense<0.000000e+00> : vector<64x128xf32>
    %215 = tpu.matmul %208, %18, %cst_53 {dimension_numbers = #tpu.dot_dimension_numbers<[1], [0], [0], [1], [0, 0, 1, 1], [], []>} : vector<64x4xf32>, vector<4x128xf32>, vector<64x128xf32> -> vector<64x128xf32>
    %216 = arith.mulf %194, %215 : vector<64x128xf32>
    %217 = arith.truncf %216 : vector<64x128xf32> to vector<64x128xbf16>
    %cst_54 = arith.constant dense<0.000000e+00> : vector<64x128xf32>
    %218 = tpu.matmul %214, %217, %cst_54 {dimension_numbers = #tpu.dot_dimension_numbers<[1], [0], [0], [1], [0, 0, 1, 1], [], []>} : vector<64x64xbf16>, vector<64x128xbf16>, vector<64x128xf32> -> vector<64x128xf32>
    %219 = vector.broadcast %7 : vector<64x1xf32> to vector<64x4xf32>
    %220 = arith.mulf %203, %219 : vector<64x4xf32>
    %221 = vector.extract_strided_slice %220 {offsets = [0, 0], sizes = [64, 1], strides = [1, 1]} : vector<64x4xf32> to vector<64x1xf32>
    %222 = vector.extract_strided_slice %218 {offsets = [0, 0], sizes = [64, 32], strides = [1, 1]} : vector<64x128xf32> to vector<64x32xf32>
    %223 = vector.broadcast %221 : vector<64x1xf32> to vector<64x32xf32>
    %224 = arith.mulf %223, %222 : vector<64x32xf32>
    %225 = vector.extract_strided_slice %220 {offsets = [0, 1], sizes = [64, 1], strides = [1, 1]} : vector<64x4xf32> to vector<64x1xf32>
    %226 = vector.extract_strided_slice %218 {offsets = [0, 32], sizes = [64, 32], strides = [1, 1]} : vector<64x128xf32> to vector<64x32xf32>
    %227 = vector.broadcast %225 : vector<64x1xf32> to vector<64x32xf32>
    %228 = arith.mulf %227, %226 : vector<64x32xf32>
    %229 = arith.addf %224, %228 : vector<64x32xf32>
    %230 = vector.extract_strided_slice %220 {offsets = [0, 2], sizes = [64, 1], strides = [1, 1]} : vector<64x4xf32> to vector<64x1xf32>
    %231 = vector.extract_strided_slice %218 {offsets = [0, 64], sizes = [64, 32], strides = [1, 1]} : vector<64x128xf32> to vector<64x32xf32>
    %232 = vector.broadcast %230 : vector<64x1xf32> to vector<64x32xf32>
    %233 = arith.mulf %232, %231 : vector<64x32xf32>
    %234 = arith.addf %229, %233 : vector<64x32xf32>
    %235 = vector.extract_strided_slice %220 {offsets = [0, 3], sizes = [64, 1], strides = [1, 1]} : vector<64x4xf32> to vector<64x1xf32>
    %236 = vector.extract_strided_slice %218 {offsets = [0, 96], sizes = [64, 32], strides = [1, 1]} : vector<64x128xf32> to vector<64x32xf32>
    %237 = vector.broadcast %235 : vector<64x1xf32> to vector<64x32xf32>
    %238 = arith.mulf %237, %236 : vector<64x32xf32>
    %239 = arith.addf %234, %238 : vector<64x32xf32>
    %240 = vector.extract_strided_slice %0 {offsets = [7, 0], sizes = [1, 32], strides = [1, 1]} : vector<16x128xf32> to vector<1x32xf32>
    %241 = vector.broadcast %240 : vector<1x32xf32> to vector<64x32xf32>
    %242 = arith.addf %239, %241 : vector<64x32xf32>
    %c5 = arith.constant 5 : index
    %c0_55 = arith.constant 0 : index
    %c0_56 = arith.constant 0 : index
    %243 = vector.load %arg3[%c5, %c0_55, %c0_56] : memref<7x32x256xf32, #tpu.memory_space<vmem>>, vector<1x32x256xf32>
    %244 = vector.shape_cast %243 : vector<1x32x256xf32> to vector<32x256xf32>
    %245 = vector.extract_strided_slice %244 {offsets = [0, 0], sizes = [32, 32], strides = [1, 1]} : vector<32x256xf32> to vector<32x32xf32>
    %cst_57 = arith.constant dense<0.000000e+00> : vector<64x32xf32>
    %246 = tpu.matmul %242, %245, %cst_57 {dimension_numbers = #tpu.dot_dimension_numbers<[1], [0], [0], [1], [0, 0, 1, 1], [], []>} : vector<64x32xf32>, vector<32x32xf32>, vector<64x32xf32> -> vector<64x32xf32>
    %247 = vector.extract_strided_slice %0 {offsets = [12, 0], sizes = [1, 32], strides = [1, 1]} : vector<16x128xf32> to vector<1x32xf32>
    %248 = vector.broadcast %247 : vector<1x32xf32> to vector<64x32xf32>
    %249 = arith.addf %246, %248 : vector<64x32xf32>
    %cst_58 = arith.constant 0.000000e+00 : f32
    %250 = vector.broadcast %cst_58 : f32 to vector<64x32xf32>
    %251 = arith.maximumf %249, %250 : vector<64x32xf32>
    %c6 = arith.constant 6 : index
    %c0_59 = arith.constant 0 : index
    %c0_60 = arith.constant 0 : index
    %252 = vector.load %arg3[%c6, %c0_59, %c0_60] : memref<7x32x256xf32, #tpu.memory_space<vmem>>, vector<1x32x256xf32>
    %253 = vector.shape_cast %252 : vector<1x32x256xf32> to vector<32x256xf32>
    %254 = vector.extract_strided_slice %253 {offsets = [0, 0], sizes = [32, 128], strides = [1, 1]} : vector<32x256xf32> to vector<32x128xf32>
    %cst_61 = arith.constant dense<0.000000e+00> : vector<64x128xf32>
    %255 = tpu.matmul %251, %254, %cst_61 {dimension_numbers = #tpu.dot_dimension_numbers<[1], [0], [0], [1], [0, 0, 1, 1], [], []>} : vector<64x32xf32>, vector<32x128xf32>, vector<64x128xf32> -> vector<64x128xf32>
    %256 = vector.extract_strided_slice %0 {offsets = [13, 0], sizes = [1, 128], strides = [1, 1]} : vector<16x128xf32> to vector<1x128xf32>
    %257 = vector.broadcast %256 : vector<1x128xf32> to vector<64x128xf32>
    %258 = arith.addf %255, %257 : vector<64x128xf32>
    %c0_62 = arith.constant 0 : index
    %c0_63 = arith.constant 0 : index
    %259 = vector.load %arg4[%c0_62, %c0_63] : memref<64x128xf32, #tpu.memory_space<vmem>>, vector<64x128xf32>
    tpu.vector_store %arg4[%c0_62, %c0_63], %258 {strides = array<i32>} : memref<64x128xf32, #tpu.memory_space<vmem>>, vector<64x128xf32>,
    return
  }
}

</mosaic_0001>

<bundles_post_ra>
// kernel: tpu_custom_call.1
= control target key start
LH: loop header
LB: loop body
LE: loop exit
PB: predicated region body
PF: predicated region fallthrough
CT: control target
= control target key end

     0   :  { %9 = vsyncpa [#allocation3], 0  ;;  %s4694_s0 = inlined_call_operand.vmem [shape: f32[64,16], index: 0, kind: input, shape index: {}]   ;;  %s4695_s1 = inlined_call_operand.vmem [shape: bf16[64,64], index: 1, kind: input, shape index: {}]   ;;  %s4696_s2 = inlined_call_operand.vmem [shape: f32[16,128], index: 2, kind: input, shape index: {}]   ;;  %s4697_s3 = inlined_call_operand.hbm [shape: f32[7,32,256], index: 3, kind: input, shape index: {}]   ;;  %s4698_s4 = inlined_call_operand.hbm [shape: f32[64,128], index: 4, kind: output, shape index: {}]  }
   0x1   :  { %10 = vsyncpa [#allocation4], 0  ;;  %s21_s17 = sshll.u32 %s4697_s3, 4  ;;  %s3513_s18 = smov [#allocation2]   ;;  %s22_s17 = int_to_ptr.hbm [resolvable:$true] %s21_s17 }
   0x2   :  { %s23_s19 = sshll.u32 %s3513_s18, 4  ;;  %s3514_s20 = smov 256   ;;  %s24_s19 = int_to_ptr.vmem [resolvable:$true] %s23_s19 }
   0x3   :  { %s3515_s21 = smov 16  }
   0x4   :  { %29 = dma.hbm_to_vmem [thread:$0]  %s22_s17, 7168, %s24_s19, [#allocation3], %s3514_s20, %s3514_s20, %s3515_s21  }
   0x5   :  { %3509 = dma.done.wait [#allocation3], 7168  }
   0x6   :  { %3510 = vsyncadd [#allocation3], 4294960128  ;;  %v144_v0 = vld [vmem:[#allocation2 + $0x10] sm:$0xff]  ;;  %v143_v1 = vld [vmem:[#allocation2] sm:$0xff]  ;;  %vm146_vm0 = vcmask 130048   ;;  %vm226_vm1 = vcmask 261120  }
   0x7   :  { %185 = vmatpush.msra.mxu1 %v144_v0  ;;  %v135_v2 = vld [vmem:[%s4694_s0] sm:$0xff]  ;;  %v136_v3 = vld [vmem:[%s4694_s0 + $0x8] sm:$0xff]  ;;  %v137_v4 = vld [vmem:[%s4694_s0 + $0x10] sm:$0xff]  ;;  %v3516_v53 = vmov 1065369472   ;;  %vm66_vm2 = vcmask 523264  }
   0x8   :  { %v138_v5 = vld [vmem:[%s4694_s0 + $0x18] sm:$0xff]  ;;  %v224_v6 = vld [vmem:[#allocation2 + $0x70] sm:$0xff]  ;;  %v139_v7 = vld [vmem:[%s4694_s0 + $0x20] sm:$0xff]  ;;  %83 = vmatpush.bf16.msra.mxu0 %v3516_v53  ;;  %vm416_vm3 = vcmask 31744   ;;  %vm654_vm7 = vcmask 1043456   ;;  %s3523_s27 = smov 96  }
   0x9   :  { %186 = vmatpush.msra.mxu1 %v143_v1  ;;  %263 = vmatpush.msra.mxu2 %v224_v6  ;;  %v140_v8 = vld [vmem:[%s4694_s0 + $0x28] sm:$0xff]  ;;  %v141_v9 = vld [vmem:[%s4694_s0 + $0x30] sm:$0xff]  ;;  %v142_v10 = vld [vmem:[%s4694_s0 + $0x38] sm:$0xff]  ;;  %s3524_s28 = smov 32   ;;  %s2982_s17 = sshll.u32 %s4698_s4, 4  ;;  %s2983_s17 = int_to_ptr.hbm [resolvable:$true] %s2982_s17 }
   0xa   :  { %3016 = vmatmul.msk.f32.vlgmr.msra.gmra.mxu1 %vm146_vm0, %v135_v2  ;;  %v223_v11 = vld [vmem:[#allocation2 + $0x60] sm:$0xff]  ;;  %v222_v12 = vld [vmem:[#allocation2 + $0x50] sm:$0xff]  ;;  %v300_v28 = vld [vmem:[#allocation2 + $0xb8] sm:$0xff]  ;;  %s3527_s18 = smov 128   ;;  %s3528_s19 = smov 8  }
   0xb   :  { %264 = vmatpush.msra.mxu2 %v223_v11  ;;  %v221_v13 = vld [vmem:[#allocation2 + $0x40] sm:$0xff]  ;;  %v299_v29 = vld [vmem:[#allocation2 + $0xb0] sm:$0xff]  ;;  %378 = vmatpush.msrb.mxu1 %v300_v28  ;;  %v298_v31 = vld [vmem:[#allocation2 + $0xa8] sm:$0xff] }
   0xc   :  { %v3592_v14 = vld [vmem:[%s4696_s2] sm:$0xff]  ;;  %337 = vmatpush.msra.mxu3 %v299_v29  ;;  %v295_v44 = vld [vmem:[#allocation2 + $0x90] sm:$0xff]  ;;  %v296_v45 = vld [vmem:[#allocation2 + $0x98] sm:$0xff]  ;;  %84 = vmatpush.bf16.msra.mxu0 %v3516_v53 }
   0xd   :  { %265 = vmatpush.msra.mxu2 %v222_v12  ;;  %v145_v15 = vperm.slane %v3592_v14, 0  ;;  %v297_v30 = vld [vmem:[#allocation2 + $0xa0] sm:$0xff]  ;;  %379 = vmatpush.msrb.mxu1 %v298_v31  ;;  %v294_v47 = vld [vmem:[#allocation2 + $0x88] sm:$0xff]  ;;  %v225_v48 = vperm.slane %v3592_v14, 1 }
   0xe   :  { %338 = vmatpush.msra.mxu3 %v297_v30  ;;  %v293_v46 = vld [vmem:[#allocation2 + $0x80] sm:$0xff]  ;;  %v3184_v63 = vld [vmem:[%s4695_s1 + $0x8] sm:$0xff] }
   0xf   :  { %266 = vmatpush.msra.mxu2 %v221_v13  ;;  %380 = vmatpush.msrb.mxu1 %v296_v45  ;;  %v3183_v58 = vld [vmem:[%s4695_s1] sm:$0xff] }
  0x10   :  { %339 = vmatpush.msra.mxu3 %v295_v44  ;;  %85 = vmatpush.bf16.msra.mxu0 %v3516_v53 }
  0x11   :  { %381 = vmatpush.msrb.mxu1 %v294_v47  ;;  %v124_v47 = vlaneseq }
  0x12   :  { %3017 = vmatmul.msk.f32.gmra.mxu1 %vm146_vm0, %v136_v3  ;;  %340 = vmatpush.msra.mxu3 %v293_v46 }
  0x14   :  { %86 = vmatpush.bf16.msra.mxu0 %v3516_v53 }
  0x17   :  { %3011 = vmatmul.msk.bf16.vlgmr.msra.gmra.mxu0 %vm66_vm2, %v3183_v58 }
  0x1a   :  { %3018 = vmatmul.msk.f32.gmra.mxu1 %vm146_vm0, %v137_v4  ;;  %v3185_v4 = vld [vmem:[%s4695_s1 + $0x10] sm:$0xff] }
  0x22   :  { %3019 = vmatmul.msk.f32.gmra.mxu1 %vm146_vm0, %v138_v5  ;;  %v3186_v5 = vld [vmem:[%s4695_s1 + $0x18] sm:$0xff] }
  0x27   :  { %3012 = vmatmul.msk.bf16.gmra.mxu0 %vm66_vm2, %v3184_v63 }
  0x2a   :  { %3020 = vmatmul.msk.f32.gmra.mxu1 %vm146_vm0, %v139_v7 }
  0x32   :  { %3021 = vmatmul.msk.f32.gmra.mxu1 %vm146_vm0, %v140_v8 }
  0x37   :  { %3013 = vmatmul.msk.bf16.gmra.mxu0 %vm66_vm2, %v3185_v4 }
  0x3a   :  { %3022 = vmatmul.msk.f32.gmra.mxu1 %vm146_vm0, %v141_v9 }
  0x42   :  { %3023 = vmatmul.msk.f32.gmra.mxu1 %vm146_vm0, %v142_v10 }
  0x47   :  { %3014 = vmatmul.msk.bf16.gmra.mxu0 %vm66_vm2, %v3186_v5 }
  0x87   :  { %v188_v16 = vpop.f32.mrf.mxu1 }
  0x88   :  { %v189_v17 = vadd.f32 %v188_v16, %v145_v15 }
  0x8a   :  { %v212_v18 = vmax.f32 %v189_v17, 0.0  ;;  %v407_v17 = vperm.slane %v3592_v14, 2 }
  0x8c   :  { %3024 = vmatmul.msk.f32.vlgmr.msra.gmra.mxu2 %vm226_vm1, %v212_v18 }
  0x8f   :  { %v191_v19 = vpop.f32.mrf.mxu1 }
  0x90   :  { %v192_v20 = vadd.f32 %v191_v19, %v145_v15 }
  0x92   :  { %v213_v21 = vmax.f32 %v192_v20, 0.0 }
  0x94   :  { %3025 = vmatmul.msk.f32.gmra.mxu2 %vm226_vm1, %v213_v21  ;;  %v88_v20 = vpop.f32.mrf.mxu0 }
  0x95   :  { %v108_v53 = vmax.f32 %v88_v20, 1.0 }
  0x97   :  { %v194_v22 = vpop.f32.mrf.mxu1 }
  0x98   :  { %v195_v23 = vadd.f32 %v194_v22, %v145_v15 }
  0x9a   :  { %v214_v24 = vmax.f32 %v195_v23, 0.0  ;;  %v3517_v23 = vmov 0  }
  0x9b   :  { %3205 = vset.pattern.permute.xlu0 %v3517_v23  ;;  %3203 = vset.pattern.permute.xlu1 %v3517_v23 }
  0x9c   :  { %3026 = vmatmul.msk.f32.gmra.mxu2 %vm226_vm1, %v214_v24  ;;  %3204 = vset.pattern.permute.xlu2 %v3517_v23  ;;  %v90_v28 = vpop.f32.mrf.mxu0 }
  0x9f   :  { %v197_v25 = vpop.f32.mrf.mxu1 }
  0xa0   :  { %v198_v26 = vadd.f32 %v197_v25, %v145_v15 }
  0xa2   :  { %v215_v27 = vmax.f32 %v198_v26, 0.0 }
  0xa4   :  { %3027 = vmatmul.msk.f32.gmra.mxu2 %vm226_vm1, %v215_v27 }
  0xa7   :  { %v200_v32 = vpop.f32.mrf.mxu1 }
  0xa8   :  { %v201_v33 = vadd.f32 %v200_v32, %v145_v15 }
  0xaa   :  { %v216_v34 = vmax.f32 %v201_v33, 0.0 }
  0xac   :  { %3028 = vmatmul.msk.f32.gmra.mxu2 %vm226_vm1, %v216_v34  ;;  %v93_v34 = vpop.f32.mrf.mxu0 }
  0xaf   :  { %v203_v35 = vpop.f32.mrf.mxu1 }
  0xb0   :  { %v204_v36 = vadd.f32 %v203_v35, %v145_v15 }
  0xb2   :  { %v217_v37 = vmax.f32 %v204_v36, 0.0 }
  0xb4   :  { %3029 = vmatmul.msk.f32.gmra.mxu2 %vm226_vm1, %v217_v37 }
  0xb7   :  { %v206_v38 = vpop.f32.mrf.mxu1 }
  0xb8   :  { %v207_v39 = vadd.f32 %v206_v38, %v145_v15  ;;  %v110_v38 = vmax.f32 %v93_v34, 1.0 }
  0xba   :  { %v218_v40 = vmax.f32 %v207_v39, 0.0  ;;  %3290 = vrcp.f32 %v110_v38 }
  0xbc   :  { %3030 = vmatmul.msk.f32.gmra.mxu2 %vm226_vm1, %v218_v40  ;;  %v95_v40 = vpop.f32.mrf.mxu0 }
  0xbf   :  { %v209_v41 = vpop.f32.mrf.mxu1 }
  0xc0   :  { %v210_v42 = vadd.f32 %v209_v41, %v145_v15  ;;  %v3291_v45 = vpop.eup %3290 }
  0xc2   :  { %v219_v43 = vmax.f32 %v210_v42, 0.0 }
  0xc4   :  { %3031 = vmatmul.msk.f32.gmra.mxu2 %vm226_vm1, %v219_v43  ;;  %v98_v46 = vpop.f32.mrf.mxu0 }
 0x10f   :  { %v268_v49 = vpop.f32.mrf.mxu2 }
 0x110   :  { %v269_v50 = vadd.f32 %v268_v49, %v225_v48 }
 0x112   :  { %3032 = vmatmul.msk.f32.vlgmr.msra.gmra.mxu3 %vm226_vm1, %v269_v50  ;;  %3040 = vmatmul.msk.f32.vlgmr.msrb.gmra.mxu1 %vm226_vm1, %v269_v50  ;;  %v125_v50 = vand.u32 127, %v124_v47 }
 0x117   :  { %v271_v51 = vpop.f32.mrf.mxu2 }
 0x118   :  { %v272_v52 = vadd.f32 %v271_v51, %v225_v48 }
 0x11a   :  { %3033 = vmatmul.msk.f32.gmra.mxu3 %vm226_vm1, %v272_v52  ;;  %3041 = vmatmul.msk.f32.gmra.mxu1 %vm226_vm1, %v272_v52  ;;  %v109_v52 = vmax.f32 %v90_v28, 1.0 }
 0x11c   :  { %3292 = vrcp.f32 %v109_v52 }
 0x11d   :  { %3294 = vrcp.f32 %v108_v53 }
 0x11f   :  { %v274_v54 = vpop.f32.mrf.mxu2 }
 0x120   :  { %v275_v55 = vadd.f32 %v274_v54, %v225_v48  ;;  %v100_v54 = vpop.f32.mrf.mxu0 }
 0x122   :  { %3034 = vmatmul.msk.f32.gmra.mxu3 %vm226_vm1, %v275_v55  ;;  %3042 = vmatmul.msk.f32.gmra.mxu1 %vm226_vm1, %v275_v55  ;;  %v3518_v55 = vmov 0.0   ;;  %v3293_v58 = vpop.eup %3292 }
 0x127   :  { %v277_v56 = vpop.f32.mrf.mxu2 }
 0x128   :  { %v278_v57 = vadd.f32 %v277_v56, %v225_v48 }
 0x12a   :  { %3035 = vmatmul.msk.f32.gmra.mxu3 %vm226_vm1, %v278_v57  ;;  %3043 = vmatmul.msk.f32.gmra.mxu1 %vm226_vm1, %v278_v57  ;;  %v111_v57 = vmax.f32 %v95_v40, 1.0 }
 0x12c   :  { %3296 = vrcp.f32 %v111_v57 }
 0x12f   :  { %v280_v59 = vpop.f32.mrf.mxu2 }
 0x130   :  { %v281_v60 = vadd.f32 %v280_v59, %v225_v48  ;;  %v112_v59 = vmax.f32 %v98_v46, 1.0 }
 0x132   :  { %3036 = vmatmul.msk.f32.gmra.mxu3 %vm226_vm1, %v281_v60  ;;  %3044 = vmatmul.msk.f32.gmra.mxu1 %vm226_vm1, %v281_v60  ;;  %v3295_v60 = vpop.eup %3294  ;;  %3298 = vrcp.f32 %v112_v59 }
 0x133   :  { %v3297_v63 = vpop.eup %3296 }
 0x137   :  { %v283_v61 = vpop.f32.mrf.mxu2 }
 0x138   :  { %v284_v62 = vadd.f32 %v283_v61, %v225_v48  ;;  %v103_v61 = vpop.f32.mrf.mxu0 }
 0x13a   :  { %3037 = vmatmul.msk.f32.gmra.mxu3 %vm226_vm1, %v284_v62  ;;  %3045 = vmatmul.msk.f32.gmra.mxu1 %vm226_vm1, %v284_v62  ;;  %v113_v62 = vmax.f32 %v100_v54, 1.0 }
 0x13c   :  { %3300 = vrcp.f32 %v113_v62 }
 0x13f   :  { %v286_v0 = vpop.f32.mrf.mxu2 }
 0x140   :  { %v287_v1 = vadd.f32 %v286_v0, %v225_v48  ;;  %v114_v0 = vmax.f32 %v103_v61, 1.0 }
 0x142   :  { %3038 = vmatmul.msk.f32.gmra.mxu3 %vm226_vm1, %v287_v1  ;;  %3046 = vmatmul.msk.f32.gmra.mxu1 %vm226_vm1, %v287_v1  ;;  %v3299_v1 = vpop.eup %3298  ;;  %3302 = vrcp.f32 %v114_v0 }
 0x147   :  { %v289_v2 = vpop.f32.mrf.mxu2 }
 0x148   :  { %v290_v3 = vadd.f32 %v289_v2, %v225_v48  ;;  %v127_v48 = vshrl.u32 %v124_v47, 7  ;;  %v105_v2 = vpop.f32.mrf.mxu0 }
 0x149   :  { %v115_v4 = vmax.f32 %v105_v2, 1.0 }
 0x14a   :  { %3039 = vmatmul.msk.f32.gmra.mxu3 %vm226_vm1, %v290_v3  ;;  %3047 = vmatmul.msk.f32.gmra.mxu1 %vm226_vm1, %v290_v3  ;;  %v128_v49 = vmul.u32 32, %v127_v48 }
 0x14b   :  { %3304 = vrcp.f32 %v115_v4 }
 0x14c   :  { %v130_v51 = vadd.s32 32, %v128_v49  ;;  %vm129_vm4 = vcmp.ge.s32.totalorder %v125_v50, %v128_v49 }
 0x14e   :  { %vm131_vm5 = vcmp.lt.s32.totalorder %v125_v50, %v130_v51 }
 0x14f   :  { %vm132_vm6 = vmand %vm129_vm4, %vm131_vm5 }
 0x150   :  { %v3712_v56 = vsel %vm132_vm6, 1.0, %v3518_v55 }
 0x151   :  { %3064 = vmatpush.msk.msrb.mxu3 %vm654_vm7, %v3712_v56 }
 0x18f   :  { %v3636_v6 = vpop.f32.mrf.mxu1 }
 0x190   :  { %v465_v7 = vsel %vm416_vm3, %v3636_v6, inf  ;;  %v3681_v29 = vadd.f32 %v407_v17, %v3636_v6 }
 0x191   :  { %466 = vmin.xlane.f32.xlu0 %v465_v7  ;;  %v3301_v7 = vpop.eup %3300 }
 0x192   :  { %v417_v31 = vsel %vm416_vm3, %v3681_v29, -inf }
 0x195   :  { %v3743_v57 = vpop.f32.mrf.mxu3 }
 0x197   :  { %v3640_v8 = vpop.f32.mrf.mxu1 }
 0x198   :  { %v468_v9 = vsel %vm416_vm3, %v3640_v8, inf  ;;  %v3658_v18 = vadd.f32 %v407_v17, %v3640_v8 }
 0x199   :  { %469 = vmin.xlane.f32.xlu0 %v468_v9 }
 0x19a   :  { %v420_v21 = vsel %vm416_vm3, %v3658_v18, -inf }
 0x19f   :  { %v3644_v10 = vpop.f32.mrf.mxu1 }
 0x1a0   :  { %v471_v11 = vsel %vm416_vm3, %v3644_v10, inf  ;;  %v3696_v36 = vadd.f32 %v407_v17, %v3644_v10 }
 0x1a1   :  { %472 = vmin.xlane.f32.xlu1 %v471_v11  ;;  %v3303_v11 = vpop.eup %3302 }
 0x1a2   :  { %v423_v39 = vsel %vm416_vm3, %v3696_v36, -inf  ;;  %v3305_v20 = vpop.eup %3304 }
 0x1a7   :  { %v3648_v12 = vpop.f32.mrf.mxu1 }
 0x1a8   :  { %v474_v26 = vsel %vm416_vm3, %v3648_v12, inf  ;;  %v3693_v35 = vadd.f32 %v407_v17, %v3648_v12 }
 0x1aa   :  { %v426_v37 = vsel %vm416_vm3, %v3693_v35, -inf }
 0x1af   :  { %v3650_v13 = vpop.f32.mrf.mxu1 }
 0x1b0   :  { %v3669_v14 = vadd.f32 %v407_v17, %v3650_v13  ;;  %v477_v33 = vsel %vm416_vm3, %v3650_v13, inf }
 0x1b2   :  { %v429_v25 = vsel %vm416_vm3, %v3669_v14, -inf }
 0x1b7   :  { %v3652_v15 = vpop.f32.mrf.mxu1 }
 0x1b8   :  { %v480_v16 = vsel %vm416_vm3, %v3652_v15, inf  ;;  %v3706_v42 = vadd.f32 %v407_v17, %v3652_v15 }
 0x1b9   :  { %481 = vmin.xlane.f32.xlu0 %v480_v16 }
 0x1ba   :  { %v432_v44 = vsel %vm416_vm3, %v3706_v42, -inf }
 0x1bf   :  { %v3660_v19 = vpop.f32.mrf.mxu1 }
 0x1c0   :  { %v483_v22 = vsel %vm416_vm3, %v3660_v19, inf  ;;  %v3703_v41 = vadd.f32 %v407_v17, %v3660_v19 }
 0x1c1   :  { %421 = vmax.xlane.f32.xlu0 %v420_v21  ;;  %484 = vmin.xlane.f32.xlu2 %v483_v22 }
 0x1c2   :  { %v435_v43 = vsel %vm416_vm3, %v3703_v41, -inf }
 0x1c7   :  { %v3672_v24 = vpop.f32.mrf.mxu1 }
 0x1c8   :  { %v486_v27 = vsel %vm416_vm3, %v3672_v24, inf  ;;  %v3684_v30 = vadd.f32 %v407_v17, %v3672_v24 }
 0x1c9   :  { %430 = vmax.xlane.f32.xlu0 %v429_v25  ;;  %475 = vmin.xlane.f32.xlu2 %v474_v26 }
 0x1ca   :  { %487 = vmin.xlane.f32.xlu1 %v486_v27  ;;  %v438_v32 = vsel %vm416_vm3, %v3684_v30, -inf }
 0x1d1   :  { %418 = vmax.xlane.f32.xlu2 %v417_v31  ;;  %439 = vmax.xlane.f32.xlu0 %v438_v32 }
 0x1d2   :  { %478 = vmin.xlane.f32.xlu1 %v477_v33 }
 0x1d9   :  { %427 = vmax.xlane.f32.xlu2 %v426_v37 }
 0x1da   :  { %424 = vmax.xlane.f32.xlu1 %v423_v39 }
 0x1e1   :  { %436 = vmax.xlane.f32.xlu2 %v435_v43 }
 0x1e2   :  { %433 = vmax.xlane.f32.xlu1 %v432_v44 }
 0x1e5   :  { %764 = vperm.xlu0 %3205, %v3291_v45  }
 0x1f9   :  { %759 = vperm.xlu2 %3204, %v3293_v58  }
 0x1fb   :  { %754 = vperm.xlu1 %3203, %v3295_v60  }
 0x201   :  { %769 = vperm.xlu2 %3204, %v3297_v63   ;;  %v3752_v63 = vpop.f32.mrf.mxu3 }
 0x203   :  { %774 = vperm.xlu1 %3203, %v3299_v1  }
 0x204   :  { %v467_v3 = vpop.xlane.xlu0 %466 }
 0x205   :  { %v489_v5 = vsub.f32 %v467_v3, %v3636_v6 }
 0x207   :  { %v497_v9 = vmul.f32 1.442695, %v489_v5 }
 0x209   :  { %3306 = vpow2.f32 %v497_v9  ;;  %779 = vperm.xlu2 %3204, %v3301_v7  }
 0x20b   :  { %784 = vperm.xlu1 %3203, %v3303_v11  }
 0x20c   :  { %v470_v16 = vpop.xlane.xlu0 %469 }
 0x20d   :  { %v490_v17 = vsub.f32 %v470_v16, %v3640_v8 }
 0x20f   :  { %v3718_v21 = vpop.eup %3306  ;;  %v499_v22 = vmul.f32 1.442695, %v490_v17  ;;  %v3521_v17 = vmov 2  }
 0x210   :  { %3065 = vmatmul.msk.f32.vlgmr.msrb.gmra.mxu3 %vm416_vm3, %v3718_v21 }
 0x211   :  { %3308 = vpow2.f32 %v499_v22  ;;  %789 = vperm.xlu2 %3204, %v3305_v20  }
 0x214   :  { %v473_v6 = vpop.xlane.xlu1 %472 }
 0x215   :  { %v491_v25 = vsub.f32 %v473_v6, %v3644_v10 }
 0x217   :  { %v3309_v26 = vpop.eup %3308  ;;  %v501_v27 = vmul.f32 1.442695, %v491_v25 }
 0x218   :  { %3066 = vmatmul.msk.f32.gmra.mxu3 %vm416_vm3, %v3309_v26 }
 0x219   :  { %3310 = vpow2.f32 %v501_v27 }
 0x21f   :  { %v3311_v28 = vpop.eup %3310 }
 0x220   :  { %3067 = vmatmul.msk.f32.gmra.mxu3 %vm416_vm3, %v3311_v28 }
 0x22c   :  { %v482_v39 = vpop.xlane.xlu0 %481 }
 0x22d   :  { %v494_v40 = vsub.f32 %v482_v39, %v3652_v15  ;;  %v3519_v15 = vmov 3  }
 0x22e   :  { %3208 = vset.pattern.permute.xlu2 %v3519_v15 }
 0x22f   :  { %v507_v46 = vmul.f32 1.442695, %v494_v40 }
 0x234   :  { %v485_v8 = vpop.xlane.xlu2 %484  ;;  %v422_v54 = vpop.xlane.xlu0 %421 }
 0x235   :  { %v495_v37 = vsub.f32 %v485_v8, %v3660_v19  ;;  %v442_v58 = vsub.f32 %v3658_v18, %v422_v54 }
 0x237   :  { %v509_v43 = vmul.f32 1.442695, %v495_v37  ;;  %v451_v60 = vmul.f32 1.442695, %v442_v58 }
 0x23c   :  { %v476_v31 = vpop.xlane.xlu2 %475  ;;  %v431_v18 = vpop.xlane.xlu0 %430 }
 0x23d   :  { %v492_v32 = vsub.f32 %v476_v31, %v3648_v12  ;;  %v488_v33 = vpop.xlane.xlu1 %487 }
 0x23e   :  { %v496_v34 = vsub.f32 %v488_v33, %v3672_v24  ;;  %v3520_v24 = vmov 1  }
 0x23f   :  { %v503_v38 = vmul.f32 1.442695, %v492_v32  ;;  %3206 = vset.pattern.permute.xlu1 %v3520_v24 }
 0x240   :  { %v511_v10 = vmul.f32 1.442695, %v496_v34 }
 0x241   :  { %3312 = vpow2.f32 %v503_v38 }
 0x242   :  { %3314 = vpow2.f32 %v511_v10 }
 0x243   :  { %3316 = vpow2.f32 %v509_v43 }
 0x244   :  { %v419_v50 = vpop.xlane.xlu2 %418  ;;  %v440_v9 = vpop.xlane.xlu0 %439 }
 0x245   :  { %v479_v44 = vpop.xlane.xlu1 %478  ;;  %v441_v51 = vsub.f32 %v3681_v29, %v419_v50  ;;  %v448_v33 = vsub.f32 %v3684_v30, %v440_v9 }
 0x246   :  { %v493_v45 = vsub.f32 %v479_v44, %v3650_v13 }
 0x247   :  { %v3313_v47 = vpop.eup %3312  ;;  %v449_v53 = vmul.f32 1.442695, %v441_v51  ;;  %v463_v37 = vmul.f32 1.442695, %v448_v33 }
 0x248   :  { %v505_v12 = vmul.f32 1.442695, %v493_v45  ;;  %v3315_v48 = vpop.eup %3314  ;;  %3068 = vmatmul.msk.f32.gmra.mxu3 %vm416_vm3, %v3313_v47 }
 0x249   :  { %3048 = vmatpush.xpose.msk.msrb.mxu2 %vm416_vm3, %v3315_v48  ;;  %v3317_v19 = vpop.eup %3316 }
 0x24a   :  { %3318 = vpow2.f32 %v505_v12 }
 0x24b   :  { %3320 = vpow2.f32 %v507_v46 }
 0x24c   :  { %v428_v55 = vpop.xlane.xlu2 %427  ;;  %3322 = vpow2.f32 %v449_v53 }
 0x24d   :  { %3049 = vmatpush.xpose.msk.msrb.mxu2 %vm416_vm3, %v3317_v19  ;;  %v425_v52 = vpop.xlane.xlu1 %424  ;;  %3324 = vpow2.f32 %v451_v60  ;;  %v444_v4 = vsub.f32 %v3693_v35, %v428_v55  ;;  %v445_v35 = vsub.f32 %v3669_v14, %v431_v18 }
 0x24e   :  { %v443_v61 = vsub.f32 %v3696_v36, %v425_v52  ;;  %v3761_v36 = vpop.f32.mrf.mxu3 }
 0x24f   :  { %v455_v7 = vmul.f32 1.442695, %v444_v4  ;;  %v457_v20 = vmul.f32 1.442695, %v445_v35 }
 0x250   :  { %v3319_v13 = vpop.eup %3318  ;;  %v453_v1 = vmul.f32 1.442695, %v443_v61 }
 0x251   :  { %v3321_v49 = vpop.eup %3320  ;;  %3069 = vmatmul.msk.f32.gmra.mxu3 %vm416_vm3, %v3319_v13 }
 0x252   :  { %3050 = vmatpush.xpose.msk.msrb.mxu2 %vm416_vm3, %v3321_v49  ;;  %v3323_v29 = vpop.eup %3322  ;;  %3326 = vpow2.f32 %v453_v1 }
 0x253   :  { %v3325_v3 = vpop.eup %3324  ;;  %3328 = vpow2.f32 %v455_v7 }
 0x254   :  { %v437_v62 = vpop.xlane.xlu2 %436  ;;  %3330 = vpow2.f32 %v457_v20  ;;  %v38_v20 = vld [vmem:[%s4695_s1] sm:$0xff]  }
 0x255   :  { %v434_v59 = vpop.xlane.xlu1 %433  ;;  %v447_v8 = vsub.f32 %v3703_v41, %v437_v62 }
 0x256   :  { %3051 = vmatpush.xpose.msk.msrb.mxu2 %vm416_vm3, %v3319_v13  ;;  %v3771_v6 = vpop.f32.mrf.mxu3  ;;  %v446_v25 = vsub.f32 %v3706_v42, %v434_v59 }
 0x257   :  { %v461_v42 = vmul.f32 1.442695, %v447_v8 }
 0x258   :  { %v3327_v11 = vpop.eup %3326  ;;  %v459_v14 = vmul.f32 1.442695, %v446_v25 }
 0x259   :  { %3070 = vmatmul.msk.f32.gmra.mxu3 %vm416_vm3, %v3321_v49  ;;  %v3329_v22 = vpop.eup %3328 }
 0x25a   :  { %3052 = vmatpush.xpose.msk.msrb.mxu2 %vm416_vm3, %v3313_v47  ;;  %v3331_v27 = vpop.eup %3330  ;;  %3332 = vpow2.f32 %v459_v14  ;;  %v3836_v14 = vunpack.c.l.bf16 %v38_v20 }
 0x25b   :  { %3334 = vpow2.f32 %v461_v42 }
 0x25c   :  { %v3759_v5 = vpop.permute.xlu2 %759  ;;  %3336 = vpow2.f32 %v463_v37  ;;  %v40_v37 = vld [vmem:[%s4695_s1 + $0x8] sm:$0xff]  }
 0x25d   :  { %v793_v16 = vmul.f32 %v3325_v3, %v3759_v5 }
 0x25e   :  { %3053 = vmatpush.xpose.msk.msrb.mxu2 %vm416_vm3, %v3311_v28  ;;  %v3780_v28 = vpop.f32.mrf.mxu3 }
 0x260   :  { %v3333_v31 = vpop.eup %3332 }
 0x261   :  { %3071 = vmatmul.msk.f32.gmra.mxu3 %vm416_vm3, %v3317_v19  ;;  %v3335_v38 = vpop.eup %3334 }
 0x262   :  { %3054 = vmatpush.xpose.msk.msrb.mxu2 %vm416_vm3, %v3309_v26  ;;  %v3337_v44 = vpop.eup %3336 }
 0x264   :  { %v3786_v32 = vpop.permute.xlu2 %769 }
 0x265   :  { %v795_v34 = vmul.f32 %v3329_v22, %v3786_v32 }
 0x266   :  { %3055 = vmatpush.xpose.msk.msrb.mxu2 %vm416_vm3, %v3718_v21  ;;  %v3769_v21 = vpop.permute.xlu0 %764  ;;  %v3790_v41 = vpop.f32.mrf.mxu3 }
 0x267   :  { %v794_v26 = vmul.f32 %v3327_v11, %v3769_v21 }
 0x269   :  { %3056 = vmatmul.msk.f32.vlgmr.msrb.gmra.mxu2 %vm416_vm3, %v3323_v29  ;;  %3072 = vmatmul.msk.f32.gmra.mxu3 %vm416_vm3, %v3315_v48 }
 0x26c   :  { %v3797_v30 = vpop.permute.xlu2 %779 }
 0x26d   :  { %v3754_v0 = vpop.permute.xlu1 %754  ;;  %v797_v40 = vmul.f32 %v3333_v31, %v3797_v30 }
 0x26e   :  { %v792_v2 = vmul.f32 %v3323_v29, %v3754_v0  ;;  %v360_v10 = vpop.f32.mrf.mxu3 }
 0x270   :  { %1009 = vperm.xlu2 %3208, %v792_v2   ;;  %849 = vperm.xlu1 %3206, %v792_v2  }
 0x271   :  { %3057 = vmatmul.msk.f32.gmra.mxu2 %vm416_vm3, %v3325_v3  ;;  %802 = vperm.xlu0 %3205, %v792_v2  }
 0x274   :  { %v3809_v46 = vpop.permute.xlu2 %789 }
 0x275   :  { %v3799_v39 = vpop.permute.xlu1 %774  ;;  %v799_v47 = vmul.f32 %v3337_v44, %v3809_v46 }
 0x276   :  { %v796_v43 = vmul.f32 %v3331_v27, %v3799_v39  ;;  %v363_v45 = vpop.f32.mrf.mxu3 }
 0x278   :  { %3210 = vset.pattern.permute.xlu2 %v3521_v17  ;;  %3207 = vset.pattern.permute.xlu1 %v3521_v17 }
 0x279   :  { %3058 = vmatmul.msk.f32.gmra.mxu2 %vm416_vm3, %v3327_v11  ;;  %3209 = vset.pattern.permute.xlu0 %v3520_v24 }
 0x27a   :  { %933 = vperm.xlu2 %3210, %v793_v16   ;;  %929 = vperm.xlu1 %3207, %v792_v2  }
 0x27b   :  { %853 = vperm.xlu0 %3209, %v793_v16  }
 0x27d   :  { %v3815_v48 = vpop.permute.xlu1 %784 }
 0x27e   :  { %v798_v19 = vmul.f32 %v3335_v38, %v3815_v48 }
 0x281   :  { %3059 = vmatmul.msk.f32.gmra.mxu2 %vm416_vm3, %v3329_v22 }
 0x282   :  { %3212 = vset.pattern.permute.xlu2 %v3517_v23  ;;  %3211 = vset.pattern.permute.xlu1 %v3519_v15 }
 0x283   :  { %3214 = vset.pattern.permute.xlu0 %v3521_v17  ;;  %807 = vperm.xlu2 %3212, %v793_v16  }
 0x284   :  { %1013 = vperm.xlu1 %3211, %v793_v16   ;;  %937 = vperm.xlu0 %3214, %v794_v26  }
 0x289   :  { %3060 = vmatmul.msk.f32.gmra.mxu2 %vm416_vm3, %v3331_v27 }
 0x28b   :  { %3213 = vset.pattern.permute.xlu2 %v3520_v24 }
 0x28c   :  { %3216 = vset.pattern.permute.xlu1 %v3517_v23  ;;  %3215 = vset.pattern.permute.xlu0 %v3519_v15 }
 0x28d   :  { %812 = vperm.xlu1 %3216, %v794_v26   ;;  %1017 = vperm.xlu0 %3215, %v794_v26  }
 0x28e   :  { %857 = vperm.xlu2 %3213, %v794_v26  }
 0x291   :  { %3061 = vmatmul.msk.f32.gmra.mxu2 %vm416_vm3, %v3333_v31 }
 0x293   :  { %v675_v12 = vpop.f32.mrf.mxu3 }
 0x294   :  { %v699_v16 = vmul.f32 %v675_v12, %v3743_v57 }
 0x295   :  { %3217 = vset.pattern.permute.xlu1 %v3520_v24  ;;  %3220 = vset.pattern.permute.xlu0 %v3517_v23 }
 0x296   :  { %3219 = vset.pattern.permute.xlu2 %v3519_v15  ;;  %861 = vperm.xlu1 %3217, %v795_v34  }
 0x297   :  { %817 = vperm.xlu0 %3220, %v795_v34   ;;  %1021 = vperm.xlu2 %3219, %v795_v34  }
 0x299   :  { %3062 = vmatmul.msk.f32.gmra.mxu2 %vm416_vm3, %v3335_v38 }
 0x29b   :  { %v678_v13 = vpop.f32.mrf.mxu3 }
 0x29c   :  { %v700_v9 = vmul.f32 %v678_v13, %v3752_v63 }
 0x29e   :  { %3218 = vset.pattern.permute.xlu1 %v3521_v17 }
 0x29f   :  { %3225 = vset.pattern.permute.xlu0 %v3521_v17  ;;  %3221 = vset.pattern.permute.xlu2 %v3520_v24 }
 0x2a0   :  { %941 = vperm.xlu1 %3218, %v795_v34   ;;  %949 = vperm.xlu0 %3225, %v797_v40  }
 0x2a1   :  { %865 = vperm.xlu2 %3221, %v796_v43   ;;  %3063 = vmatmul.msk.f32.gmra.mxu2 %vm416_vm3, %v3337_v44 }
 0x2a3   :  { %v681_v49 = vpop.f32.mrf.mxu3 }
 0x2a4   :  { %v701_v4 = vmul.f32 %v681_v49, %v3761_v36 }
 0x2a8   :  { %945 = vperm.xlu1 %3218, %v796_v43   ;;  %3227 = vset.pattern.permute.xlu0 %v3517_v23 }
 0x2a9   :  { %3222 = vset.pattern.permute.xlu2 %v3519_v15  ;;  %827 = vperm.xlu0 %3227, %v797_v40  }
 0x2aa   :  { %1025 = vperm.xlu2 %3222, %v796_v43  }
 0x2b0   :  { %3226 = vset.pattern.permute.xlu1 %v3519_v15 }
 0x2b1   :  { %1029 = vperm.xlu1 %3226, %v797_v40   ;;  %3232 = vset.pattern.permute.xlu0 %v3521_v17 }
 0x2b2   :  { %3223 = vset.pattern.permute.xlu2 %v3517_v23  ;;  %957 = vperm.xlu0 %3232, %v799_v47  }
 0x2b3   :  { %822 = vperm.xlu2 %3223, %v796_v43   ;;  %v3848_v43 = vunpack.c.l.bf16 %v40_v37 }
 0x2b9   :  { %3228 = vset.pattern.permute.xlu1 %v3520_v24 }
 0x2ba   :  { %873 = vperm.xlu1 %3228, %v798_v19   ;;  %3235 = vset.pattern.permute.xlu0 %v3520_v24 }
 0x2bb   :  { %3224 = vset.pattern.permute.xlu2 %v3520_v24 }
 0x2bc   :  { %869 = vperm.xlu2 %3224, %v797_v40  }
 0x2c2   :  { %877 = vperm.xlu1 %3228, %v799_v47  }
 0x2c4   :  { %3229 = vset.pattern.permute.xlu2 %v3521_v17 }
 0x2c5   :  { %953 = vperm.xlu2 %3229, %v798_v19  }
 0x2ca   :  { %3233 = vset.pattern.permute.xlu1 %v3519_v15 }
 0x2cb   :  { %1037 = vperm.xlu1 %3233, %v799_v47   ;;  %v684_v50 = vpop.f32.mrf.mxu3 }
 0x2cc   :  { %v702_v18 = vmul.f32 %v684_v50, %v3771_v6  ;;  %v707_v6 = vpack.c.bf16 %v700_v9, %v699_v16  ;;  %v44_v16 = vld [vmem:[%s4695_s1 + $0x18] sm:$0xff]  }
 0x2cd   :  { %3230 = vset.pattern.permute.xlu2 %v3519_v15 }
 0x2ce   :  { %1033 = vperm.xlu2 %3230, %v798_v19   ;;  %v708_v11 = vpack.c.bf16 %v702_v18, %v701_v4 }
 0x2d3   :  { %3234 = vset.pattern.permute.xlu1 %v3517_v23 }
 0x2d4   :  { %837 = vperm.xlu1 %3234, %v799_v47   ;;  %v687_v51 = vpop.f32.mrf.mxu3  ;;  %v3850_v47 = vunpack.c.h.bf16 %v40_v37 }
 0x2d5   :  { %v703_v62 = vmul.f32 %v687_v51, %v3780_v28  ;;  %v3838_v28 = vunpack.c.h.bf16 %v38_v20  ;;  %v3868_v20 = vunpack.c.l.bf16 %v44_v16 }
 0x2d6   :  { %3231 = vset.pattern.permute.xlu2 %v3517_v23 }
 0x2d7   :  { %832 = vperm.xlu2 %3231, %v798_v19  }
 0x2dc   :  { %v690_v52 = vpop.f32.mrf.mxu3  ;;  %3236 = vset.pattern.permute.xlu1 %v3521_v17 }
 0x2dd   :  { %v704_v29 = vmul.f32 %v690_v52, %v3790_v41 }
 0x2df   :  { %v709_v2 = vpack.c.bf16 %v704_v29, %v703_v62 }
 0x2e3   :  { %v3877_v37 = vpop.permute.xlu0 %802 }
 0x2e4   :  { %v693_v53 = vpop.f32.mrf.mxu3 }
 0x2e5   :  { %v705_v59 = vmul.f32 %v693_v53, %v360_v10 }
 0x2ec   :  { %v578_v54 = vpop.f32.mrf.mxu2  ;;  %v696_v58 = vpop.f32.mrf.mxu3 }
 0x2ed   :  { %v602_v55 = vmax.f32 %v578_v54, 1e-20  ;;  %v706_v60 = vmul.f32 %v696_v58, %v363_v45  ;;  %v42_v54 = vld [vmem:[%s4695_s1 + $0x10] sm:$0xff]   ;;  %s3522_s1 = smov 64  }
 0x2ee   :  { %v3860_v62 = vunpack.c.h.bf16 %v42_v54 }
 0x2ef   :  { %v710_v61 = vpack.c.bf16 %v706_v60, %v705_v59  ;;  %3338 = vrcp.f32 %v602_v55  ;;  %v3858_v60 = vunpack.c.l.bf16 %v42_v54 }
 0x2f1   :  { %727 = vmatpush.bf16.msrb.mxu0 %v710_v61 }
 0x2f4   :  { %v581_v1 = vpop.f32.mrf.mxu2 }
 0x2f5   :  { %v603_v3 = vmax.f32 %v581_v1, 1e-20  ;;  %728 = vmatpush.bf16.msrb.mxu0 %v709_v2  ;;  %v3339_v7 = vpop.eup %3338 }
 0x2f6   :  { %v618_v35 = vpack.c.bf16 %v3339_v7, %v3339_v7 }
 0x2f7   :  { %3340 = vrcp.f32 %v603_v3 }
 0x2f8   :  { %v634_v36 = vunpack.c.l.bf16 %v618_v35 }
 0x2f9   :  { %729 = vmatpush.bf16.msrb.mxu0 %v708_v11 }
 0x2fa   :  { %v642_v63 = vmul.f32 %v634_v36, %v3836_v14 }
 0x2fc   :  { %v584_v22 = vpop.f32.mrf.mxu2 }
 0x2fd   :  { %v3341_v25 = vpop.eup %3340  ;;  %v604_v26 = vmax.f32 %v584_v22, 1e-20  ;;  %730 = vmatpush.bf16.msrb.mxu0 %v707_v6 }
 0x2fe   :  { %v619_v27 = vpack.c.bf16 %v3341_v25, %v3341_v25  ;;  %v3870_v25 = vunpack.c.h.bf16 %v44_v16 }
 0x2ff   :  { %3342 = vrcp.f32 %v604_v26 }
 0x300   :  { %v635_v57 = vunpack.c.l.bf16 %v619_v27 }
 0x301   :  { %3109 = vmatpush.msk.msra.mxu0 %vm654_vm7, %v3712_v56 }
 0x302   :  { %v643_v8 = vmul.f32 %v635_v57, %v3838_v28 }
 0x304   :  { %v587_v42 = vpop.f32.mrf.mxu2  ;;  %v650_v31 = vpack.c.bf16 %v643_v8, %v642_v63  ;;  %v1010_v63 = vpop.permute.xlu2 %1009 }
 0x305   :  { %v605_v33 = vmax.f32 %v587_v42, 1e-20  ;;  %v3343_v41 = vpop.eup %3342  ;;  %v850_v8 = vpop.permute.xlu1 %849 }
 0x306   :  { %3073 = vmatmul.msk.bf16.vlgmr.msrb.gmra.mxu0 %vm66_vm2, %v650_v31  ;;  %v620_v34 = vpack.c.bf16 %v3343_v41, %v3343_v41 }
 0x307   :  { %3344 = vrcp.f32 %v605_v33 }
 0x308   :  { %v636_v44 = vunpack.c.l.bf16 %v620_v34 }
 0x30a   :  { %v644_v19 = vmul.f32 %v636_v44, %v3848_v43 }
 0x30c   :  { %v590_v38 = vpop.f32.mrf.mxu2  ;;  %v934_v42 = vpop.permute.xlu2 %933 }
 0x30d   :  { %v3345_v10 = vpop.eup %3344  ;;  %v606_v40 = vmax.f32 %v590_v38, 1e-20  ;;  %v930_v31 = vpop.permute.xlu1 %929 }
 0x30e   :  { %v621_v45 = vpack.c.bf16 %v3345_v10, %v3345_v10 }
 0x30f   :  { %3346 = vrcp.f32 %v606_v40  ;;  %v854_v40 = vpop.permute.xlu0 %853 }
 0x310   :  { %v637_v12 = vunpack.c.l.bf16 %v621_v45 }
 0x312   :  { %v645_v13 = vmul.f32 %v637_v12, %v3850_v47 }
 0x314   :  { %v593_v49 = vpop.f32.mrf.mxu2  ;;  %v651_v50 = vpack.c.bf16 %v645_v13, %v644_v19  ;;  %v3875_v33 = vpop.permute.xlu2 %807 }
 0x315   :  { %v607_v51 = vmax.f32 %v593_v49, 1e-20  ;;  %v3347_v52 = vpop.eup %3346  ;;  %v1014_v41 = vpop.permute.xlu1 %1013 }
 0x316   :  { %3074 = vmatmul.msk.bf16.gmra.mxu0 %vm66_vm2, %v651_v50  ;;  %v622_v53 = vpack.c.bf16 %v3347_v52, %v3347_v52 }
 0x317   :  { %3348 = vrcp.f32 %v607_v51 }
 0x318   :  { %v638_v29 = vunpack.c.l.bf16 %v622_v53  ;;  %v938_v53 = vpop.permute.xlu0 %937 }
 0x31a   :  { %v646_v1 = vmul.f32 %v638_v29, %v3858_v60 }
 0x31c   :  { %v596_v55 = vpop.f32.mrf.mxu2  ;;  %v858_v34 = vpop.permute.xlu2 %857 }
 0x31d   :  { %v3349_v58 = vpop.eup %3348  ;;  %v608_v59 = vmax.f32 %v596_v55, 1e-20  ;;  %v3879_v38 = vpop.permute.xlu1 %812 }
 0x31e   :  { %v623_v61 = vpack.c.bf16 %v3349_v58, %v3349_v58 }
 0x31f   :  { %3350 = vrcp.f32 %v608_v59 }
 0x320   :  { %v639_v18 = vunpack.c.l.bf16 %v623_v61 }
 0x322   :  { %v647_v2 = vmul.f32 %v639_v18, %v3860_v62  ;;  %v1018_v18 = vpop.permute.xlu0 %1017 }
 0x324   :  { %v599_v3 = vpop.f32.mrf.mxu2  ;;  %v652_v4 = vpack.c.bf16 %v647_v2, %v646_v1  ;;  %v1022_v10 = vpop.permute.xlu2 %1021 }
 0x325   :  { %v609_v7 = vmax.f32 %v599_v3, 1e-20  ;;  %v3351_v9 = vpop.eup %3350  ;;  %v862_v19 = vpop.permute.xlu1 %861 }
 0x326   :  { %3075 = vmatmul.msk.bf16.gmra.mxu0 %vm66_vm2, %v652_v4  ;;  %v624_v11 = vpack.c.bf16 %v3351_v9, %v3351_v9 }
 0x327   :  { %3352 = vrcp.f32 %v609_v7 }
 0x328   :  { %v640_v22 = vunpack.c.l.bf16 %v624_v11 }
 0x32a   :  { %v648_v36 = vmul.f32 %v640_v22, %v3868_v20  ;;  %v3913_v11 = vpop.permute.xlu0 %817 }
 0x32c   :  { %v866_v13 = vpop.permute.xlu2 %865 }
 0x32d   :  { %v3353_v35 = vpop.eup %3352  ;;  %v942_v54 = vpop.permute.xlu1 %941 }
 0x32e   :  { %v625_v6 = vpack.c.bf16 %v3353_v35, %v3353_v35 }
 0x330   :  { %v641_v26 = vunpack.c.l.bf16 %v625_v6 }
 0x332   :  { %v649_v27 = vmul.f32 %v641_v26, %v3870_v25 }
 0x334   :  { %v653_v57 = vpack.c.bf16 %v649_v27, %v648_v36  ;;  %v1026_v55 = vpop.permute.xlu2 %1025  ;;  %v950_v27 = vpop.permute.xlu0 %949 }
 0x335   :  { %v946_v2 = vpop.permute.xlu1 %945 }
 0x336   :  { %3076 = vmatmul.msk.bf16.gmra.mxu0 %vm66_vm2, %v653_v57 }
 0x33c   :  { %v3908_v9 = vpop.permute.xlu2 %822 }
 0x33d   :  { %v1030_v26 = vpop.permute.xlu1 %1029 }
 0x344   :  { %v870_v36 = vpop.permute.xlu2 %869 }
 0x383   :  { %v3881_v44 = vpop.f32.mrf.mxu0 }
 0x384   :  { %v960_v45 = vmul.f32 %v930_v31, %v3881_v44  ;;  %v880_v12 = vmul.f32 %v850_v8, %v3881_v44  ;;  %v1040_v50 = vmul.f32 %v1010_v63, %v3881_v44  ;;  %v954_v31 = vpop.permute.xlu2 %953 }
 0x386   :  { %976 = vrot.lane.b32.xlu1 %v960_v45, %s3522_s1  ;;  %896 = vrot.lane.b32.xlu2 %v880_v12, %s3523_s27  ;;  %v828_v45 = vpop.permute.xlu0 %827 }
 0x38b   :  { %v3887_v49 = vpop.f32.mrf.mxu0 }
 0x38c   :  { %v961_v51 = vmul.f32 %v934_v42, %v3887_v49  ;;  %v881_v52 = vmul.f32 %v854_v40, %v3887_v49  ;;  %v1041_v61 = vmul.f32 %v1014_v41, %v3887_v49  ;;  %v874_v42 = vpop.permute.xlu1 %873 }
 0x38e   :  { %1056 = vrot.lane.b32.xlu2 %v1040_v50, %s3524_s28  ;;  %978 = vrot.lane.b32.xlu0 %v961_v51, %s3522_s1 }
 0x38f   :  { %898 = vrot.lane.b32.xlu1 %v881_v52, %s3523_s27 }
 0x393   :  { %v3895_v58 = vpop.f32.mrf.mxu0 }
 0x394   :  { %v962_v59 = vmul.f32 %v938_v53, %v3895_v58  ;;  %v882_v29 = vmul.f32 %v858_v34, %v3895_v58  ;;  %v1042_v3 = vmul.f32 %v1018_v18, %v3895_v58  ;;  %v878_v12 = vpop.permute.xlu1 %877  ;;  %v958_v53 = vpop.permute.xlu0 %957 }
 0x396   :  { %980 = vrot.lane.b32.xlu0 %v962_v59, %s3522_s1  ;;  %900 = vrot.lane.b32.xlu2 %v882_v29, %s3523_s27 }
 0x397   :  { %1058 = vrot.lane.b32.xlu1 %v1041_v61, %s3524_s28 }
 0x39b   :  { %v3903_v1 = vpop.f32.mrf.mxu0 }
 0x39c   :  { %v1043_v4 = vmul.f32 %v1022_v10, %v3903_v1  ;;  %v883_v7 = vmul.f32 %v862_v19, %v3903_v1  ;;  %v963_v6 = vmul.f32 %v942_v54, %v3903_v1  ;;  %v1034_v19 = vpop.permute.xlu2 %1033  ;;  %v1038_v54 = vpop.permute.xlu1 %1037 }
 0x39e   :  { %1060 = vrot.lane.b32.xlu0 %v1042_v3, %s3524_s28  ;;  %1062 = vrot.lane.b32.xlu2 %v1043_v4, %s3524_s28 }
 0x39f   :  { %902 = vrot.lane.b32.xlu1 %v883_v7, %s3523_s27 }
 0x3a3   :  { %v3915_v16 = vpop.f32.mrf.mxu0 }
 0x3a4   :  { %v964_v35 = vmul.f32 %v946_v2, %v3915_v16  ;;  %v884_v22 = vmul.f32 %v866_v13, %v3915_v16  ;;  %v1044_v8 = vmul.f32 %v1026_v55, %v3915_v16  ;;  %v833_v29 = vpop.permute.xlu2 %832  ;;  %v3949_v18 = vpop.permute.xlu1 %837 }
 0x3a6   :  { %984 = vrot.lane.b32.xlu0 %v964_v35, %s3522_s1  ;;  %904 = vrot.lane.b32.xlu2 %v884_v22, %s3523_s27 }
 0x3a7   :  { %982 = vrot.lane.b32.xlu1 %v963_v6, %s3522_s1 }
 0x3ab   :  { %v3923_v57 = vpop.f32.mrf.mxu0 }
 0x3ac   :  { %v965_v63 = vmul.f32 %v950_v27, %v3923_v57  ;;  %v885_v40 = vmul.f32 %v870_v36, %v3923_v57  ;;  %v1045_v52 = vmul.f32 %v1030_v26, %v3923_v57 }
 0x3ae   :  { %986 = vrot.lane.b32.xlu2 %v965_v63, %s3522_s1 }
 0x3af   :  { %1064 = vrot.lane.b32.xlu1 %v1044_v8, %s3524_s28 }
 0x3b3   :  { %v3929_v41 = vpop.f32.mrf.mxu0 }
 0x3b4   :  { %v966_v34 = vmul.f32 %v954_v31, %v3929_v41  ;;  %v886_v10 = vmul.f32 %v874_v42, %v3929_v41  ;;  %v1046_v50 = vmul.f32 %v1034_v19, %v3929_v41  ;;  %v841_v42 = vmul.f32 %v3875_v33, %v3887_v49 }
 0x3b5   :  { %v842_v19 = vmul.f32 %v3879_v38, %v3895_v58  ;;  %v844_v33 = vmul.f32 %v3908_v9, %v3915_v16  ;;  %v846_v16 = vmul.f32 %v833_v29, %v3929_v41 }
 0x3b6   :  { %988 = vrot.lane.b32.xlu2 %v966_v34, %s3522_s1  ;;  %908 = vrot.lane.b32.xlu0 %v886_v10, %s3523_s27  ;;  %v840_v34 = vmul.f32 %v3877_v37, %v3881_v44  ;;  %v3964_v44 = vld [vmem:[%s4696_s2] sm:$0xff] }
 0x3b7   :  { %906 = vrot.lane.b32.xlu1 %v885_v40, %s3523_s27  ;;  %v1088_v38 = vperm.slane %v3964_v44, 3 }
 0x3bb   :  { %v3937_v13 = vpop.f32.mrf.mxu0 }
 0x3bc   :  { %v887_v51 = vmul.f32 %v878_v12, %v3937_v13  ;;  %v967_v55 = vmul.f32 %v958_v53, %v3937_v13  ;;  %v1047_v59 = vmul.f32 %v1038_v54, %v3937_v13 }
 0x3be   :  { %1068 = vrot.lane.b32.xlu2 %v1046_v50, %s3524_s28  ;;  %910 = vrot.lane.b32.xlu0 %v887_v51, %s3523_s27  ;;  %v843_v50 = vmul.f32 %v3913_v11, %v3903_v1 }
 0x3bf   :  { %1066 = vrot.lane.b32.xlu1 %v1045_v52, %s3524_s28 }
 0x3c6   :  { %990 = vrot.lane.b32.xlu0 %v967_v55, %s3522_s1 }
 0x3c7   :  { %1070 = vrot.lane.b32.xlu1 %v1047_v59, %s3524_s28 }
 0x3e0   :  { %v897_v61 = vpop.permute.xlu2 %896 }
 0x3e1   :  { %v920_v12 = vadd.f32 %v897_v61, %v840_v34 }
 0x3e8   :  { %v1057_v2 = vpop.permute.xlu2 %1056 }
 0x3f0   :  { %v901_v4 = vpop.permute.xlu2 %900 }
 0x3f1   :  { %v922_v52 = vadd.f32 %v901_v4, %v842_v19 }
 0x3f8   :  { %v977_v3 = vpop.permute.xlu1 %976  ;;  %v1063_v6 = vpop.permute.xlu2 %1062 }
 0x3f9   :  { %v1000_v53 = vadd.f32 %v977_v3, %v920_v12 }
 0x3fb   :  { %v1080_v58 = vadd.f32 %v1057_v2, %v1000_v53 }
 0x400   :  { %v979_v35 = vpop.permute.xlu0 %978  ;;  %v905_v27 = vpop.permute.xlu2 %904 }
 0x401   :  { %v899_v7 = vpop.permute.xlu1 %898  ;;  %v924_v1 = vadd.f32 %v905_v27, %v844_v33 }
 0x402   :  { %v921_v10 = vadd.f32 %v899_v7, %v841_v42 }
 0x404   :  { %v1001_v54 = vadd.f32 %v979_v35, %v921_v10 }
 0x408   :  { %v981_v26 = vpop.permute.xlu0 %980  ;;  %v987_v31 = vpop.permute.xlu2 %986 }
 0x409   :  { %v1059_v22 = vpop.permute.xlu1 %1058  ;;  %v1002_v59 = vadd.f32 %v981_v26, %v922_v52  ;;  %v3971_v26 = vadd.f32 %v1088_v38, %v1080_v58 }
 0x40a   :  { %v1081_v49 = vadd.f32 %v1059_v22, %v1001_v54  ;;  %v845_v22 = vmul.f32 %v828_v45, %v3923_v57 }
 0x40b   :  { %v1097_v34 = vmax.f32 %v3971_v26, 0.0 }
 0x40c   :  { %v3967_v4 = vadd.f32 %v1088_v38, %v1081_v49  ;;  %v3525_v49 = vmov 64.0  }
 0x40d   :  { %3354 = vrcp.f32 %v3525_v49 }
 0x40e   :  { %v1098_v27 = vmax.f32 %v3967_v4, 0.0 }
 0x410   :  { %v1061_v63 = vpop.permute.xlu0 %1060  ;;  %v989_v61 = vpop.permute.xlu2 %988  ;;  %v1106_v57 = vsel %vm226_vm1, %v1098_v27, 0.0 }
 0x411   :  { %v903_v36 = vpop.permute.xlu1 %902  ;;  %v1082_v11 = vadd.f32 %v1061_v63, %v1002_v59 }
 0x412   :  { %v923_v55 = vadd.f32 %v903_v36, %v843_v50 }
 0x413   :  { %v3973_v36 = vadd.f32 %v1088_v38, %v1082_v11 }
 0x418   :  { %v985_v40 = vpop.permute.xlu0 %984  ;;  %v1069_v19 = vpop.permute.xlu2 %1068 }
 0x419   :  { %v983_v8 = vpop.permute.xlu1 %982  ;;  %v1004_v35 = vadd.f32 %v985_v40, %v924_v1 }
 0x41a   :  { %v1003_v37 = vadd.f32 %v983_v8, %v923_v55 }
 0x41c   :  { %v1083_v7 = vadd.f32 %v1063_v6, %v1003_v37  ;;  %v1099_v6 = vmax.f32 %v3973_v36, 0.0 }
 0x41e   :  { %v1092_v63 = vadd.f32 %v1088_v38, %v1083_v7  ;;  %v1108_v52 = vsel %vm226_vm1, %v1099_v6, 0.0 }
 0x420   :  { %v1100_v45 = vmax.f32 %v1092_v63, 0.0 }
 0x421   :  { %v1065_v51 = vpop.permute.xlu1 %1064 }
 0x422   :  { %v1084_v8 = vadd.f32 %v1065_v51, %v1004_v35  ;;  %v1105_v51 = vsel %vm226_vm1, %v1097_v34, 0.0  ;;  %v1110_v59 = vsel %vm226_vm1, %v1100_v45, 0.0 }
 0x423   :  { %v1107_v55 = vadd.f32 %v1106_v57, %v1105_v51 }
 0x424   :  { %v1093_v10 = vadd.f32 %v1088_v38, %v1084_v8 }
 0x425   :  { %v1109_v37 = vadd.f32 %v1108_v52, %v1107_v55 }
 0x426   :  { %v1101_v53 = vmax.f32 %v1093_v10, 0.0 }
 0x428   :  { %v909_v3 = vpop.permute.xlu0 %908  ;;  %v1112_v1 = vsel %vm226_vm1, %v1101_v53, 0.0 }
 0x429   :  { %v907_v9 = vpop.permute.xlu1 %906  ;;  %v926_v42 = vadd.f32 %v909_v3, %v846_v16  ;;  %v1111_v3 = vadd.f32 %v1110_v59, %v1109_v37 }
 0x42a   :  { %v925_v2 = vadd.f32 %v907_v9, %v845_v22  ;;  %v3355_v9 = vpop.eup %3354 }
 0x42b   :  { %v1006_v40 = vadd.f32 %v989_v61, %v926_v42  ;;  %v1113_v16 = vadd.f32 %v1112_v1, %v1111_v3  ;;  %v1127_v42 = vmul.f32 64.0, %v3355_v9  ;;  %vm1131_vm8 = vweird.f32 %v3355_v9 }
 0x42c   :  { %v1005_v12 = vadd.f32 %v987_v31, %v925_v2  ;;  %v847_v31 = vmul.f32 %v3949_v18, %v3937_v13 }
 0x42d   :  { %v1086_v54 = vadd.f32 %v1069_v19, %v1006_v40  ;;  %v1128_v10 = vsub.f32 1.0, %v1127_v42 }
 0x42f   :  { %v1095_v11 = vadd.f32 %v1088_v38, %v1086_v54  ;;  %v1129_v57 = vmul.f32 %v3355_v9, %v1128_v10 }
 0x430   :  { %v911_v41 = vpop.permute.xlu0 %910 }
 0x431   :  { %v1067_v29 = vpop.permute.xlu1 %1066  ;;  %v927_v61 = vadd.f32 %v911_v41, %v847_v31  ;;  %v1103_v26 = vmax.f32 %v1095_v11, 0.0 }
 0x432   :  { %v1085_v50 = vadd.f32 %v1067_v29, %v1005_v12 }
 0x433   :  { %v1116_v13 = vsel %vm226_vm1, %v1103_v26, 0.0 }
 0x434   :  { %v1094_v33 = vadd.f32 %v1088_v38, %v1085_v50  ;;  %v1130_v50 = vadd.f32 %v3355_v9, %v1129_v57  ;;  %v1216_v57 = vld [vmem:[#allocation2 + $0xf0] sm:$0xff] }
 0x435   :  { %1254 = vmatpush.msra.mxu1 %v1216_v57 }
 0x436   :  { %v1102_v58 = vmax.f32 %v1094_v33, 0.0  ;;  %v3988_v54 = vsel %vm1131_vm8, %v3355_v9, %v1130_v50  ;;  %v1215_v50 = vld [vmem:[#allocation2 + $0xe8] sm:$0xff] }
 0x438   :  { %v991_v4 = vpop.permute.xlu0 %990  ;;  %v1114_v7 = vsel %vm226_vm1, %v1102_v58, 0.0 }
 0x439   :  { %v1007_v35 = vadd.f32 %v991_v4, %v927_v61  ;;  %v1071_v22 = vpop.permute.xlu1 %1070  ;;  %v1115_v8 = vadd.f32 %v1114_v7, %v1113_v16 }
 0x43b   :  { %v1087_v36 = vadd.f32 %v1071_v22, %v1007_v35  ;;  %v1117_v63 = vadd.f32 %v1116_v13, %v1115_v8 }
 0x43d   :  { %v1096_v2 = vadd.f32 %v1088_v38, %v1087_v36 }
 0x43f   :  { %v1104_v18 = vmax.f32 %v1096_v2, 0.0 }
 0x441   :  { %v1118_v40 = vsel %vm226_vm1, %v1104_v18, 0.0 }
 0x442   :  { %v1119_v12 = vadd.f32 %v1118_v40, %v1117_v63 }
 0x444   :  { %v1120_v41 = vrot.slane %v1119_v12, 4 }
 0x446   :  { %v1121_v29 = vadd.f32 %v1120_v41, %v1119_v12  ;;  %v1217_v41 = vld [vmem:[#allocation2 + $0xf8] sm:$0xff] }
 0x447   :  { %1295 = vmatpush.msra.mxu2 %v1217_v41 }
 0x448   :  { %v1122_v19 = vrot.slane %v1121_v29, 2 }
 0x449   :  { %1296 = vmatpush.msra.mxu2 %v1215_v50 }
 0x44a   :  { %v1123_v51 = vadd.f32 %v1122_v19, %v1121_v29  ;;  %v1214_v29 = vld [vmem:[#allocation2 + $0xe0] sm:$0xff] }
 0x44b   :  { %1255 = vmatpush.msra.mxu1 %v1214_v29 }
 0x44c   :  { %v1124_v52 = vrot.slane %v1123_v51, 1 }
 0x44e   :  { %v1125_v55 = vadd.f32 %v1124_v52, %v1123_v51  ;;  %v1212_v51 = vld [vmem:[#allocation2 + $0xd0] sm:$0xff]  ;;  %v1213_v52 = vld [vmem:[#allocation2 + $0xd8] sm:$0xff] }
 0x44f   :  { %1256 = vmatpush.msra.mxu1 %v1212_v51  ;;  %1297 = vmatpush.msra.mxu2 %v1213_v52 }
 0x450   :  { %v1133_v38 = vmul.f32 %v3988_v54, %v1125_v55 }
 0x452   :  { %v3991_v33 = vsub.f32 %v1097_v34, %v1133_v38  ;;  %v3993_v49 = vsub.f32 %v1098_v27, %v1133_v38  ;;  %v3995_v59 = vsub.f32 %v1099_v6, %v1133_v38  ;;  %v3997_v31 = vsub.f32 %v1100_v45, %v1133_v38 }
 0x453   :  { %v3999_v37 = vsub.f32 %v1101_v53, %v1133_v38  ;;  %v4007_v3 = vsub.f32 %v1102_v58, %v1133_v38  ;;  %v4013_v53 = vsub.f32 %v1103_v26, %v1133_v38  ;;  %v4018_v9 = vsub.f32 %v1104_v18, %v1133_v38  ;;  %v1210_v38 = vld [vmem:[#allocation2 + $0xc0] sm:$0xff] }
 0x454   :  { %v1142_v1 = vmul.f32 %v3991_v33, %v3991_v33  ;;  %v1143_v11 = vmul.f32 %v3993_v49, %v3993_v49  ;;  %v1144_v61 = vmul.f32 %v3995_v59, %v3995_v59  ;;  %v1145_v27 = vmul.f32 %v3997_v31, %v3997_v31  ;;  %1257 = vmatpush.msra.mxu1 %v1210_v38 }
 0x455   :  { %v1146_v4 = vmul.f32 %v3999_v37, %v3999_v37  ;;  %v1147_v58 = vmul.f32 %v4007_v3, %v4007_v3  ;;  %v1148_v36 = vmul.f32 %v4013_v53, %v4013_v53  ;;  %v1149_v42 = vmul.f32 %v4018_v9, %v4018_v9 }
 0x456   :  { %v1150_v34 = vsel %vm226_vm1, %v1142_v1, 0.0  ;;  %v1151_v6 = vsel %vm226_vm1, %v1143_v11, 0.0  ;;  %v1153_v7 = vsel %vm226_vm1, %v1144_v61, 0.0  ;;  %v1155_v16 = vsel %vm226_vm1, %v1145_v27, 0.0  ;;  %v1211_v1 = vld [vmem:[#allocation2 + $0xc8] sm:$0xff] }
 0x457   :  { %v1152_v45 = vadd.f32 %v1151_v6, %v1150_v34  ;;  %v1157_v26 = vsel %vm226_vm1, %v1146_v4, 0.0  ;;  %v1159_v2 = vsel %vm226_vm1, %v1147_v58, 0.0  ;;  %v1161_v18 = vsel %vm226_vm1, %v1148_v36, 0.0  ;;  %1298 = vmatpush.msra.mxu2 %v1211_v1 }
 0x458   :  { %v1163_v10 = vsel %vm226_vm1, %v1149_v42, 0.0 }
 0x459   :  { %v1154_v35 = vadd.f32 %v1153_v7, %v1152_v45 }
 0x45b   :  { %v1156_v22 = vadd.f32 %v1155_v16, %v1154_v35  ;;  %v37_v16 = vld [vmem:[%s4696_s2 + $0x8] sm:$0xff] }
 0x45c   :  { %v1191_v36 = vperm.slane %v37_v16, 0  ;;  %v1200_v42 = vperm.slane %v37_v16, 1 }
 0x45d   :  { %v1158_v8 = vadd.f32 %v1157_v26, %v1156_v22 }
 0x45f   :  { %v1160_v13 = vadd.f32 %v1159_v2, %v1158_v8 }
 0x461   :  { %v1162_v63 = vadd.f32 %v1161_v18, %v1160_v13 }
 0x463   :  { %v1164_v40 = vadd.f32 %v1163_v10, %v1162_v63 }
 0x465   :  { %v1165_v12 = vrot.slane %v1164_v40, 4 }
 0x467   :  { %v1166_v19 = vadd.f32 %v1165_v12, %v1164_v40 }
 0x469   :  { %v1167_v55 = vrot.slane %v1166_v19, 2 }
 0x46b   :  { %v1168_v11 = vadd.f32 %v1167_v55, %v1166_v19 }
 0x46d   :  { %v1169_v61 = vrot.slane %v1168_v11, 1 }
 0x46f   :  { %v1170_v27 = vadd.f32 %v1169_v61, %v1168_v11 }
 0x471   :  { %v1171_v34 = vmul.f32 %v1170_v27, %v3988_v54 }
 0x473   :  { %v1172_v6 = vadd.f32 1e-05, %v1171_v34 }
 0x475   :  { %3356 = vrsqrt.f32 %v1172_v6  ;;  %vm1179_vm10 = vweird.f32 %v1172_v6 }
 0x47b   :  { %v3357_v45 = vpop.eup %3356 }
 0x47c   :  { %v1174_v4 = vmul.f32 %v3357_v45, %v1172_v6  ;;  %vm1180_vm9 = vweird.f32 %v3357_v45 }
 0x47d   :  { %vm1181_vm11 = vmor %vm1179_vm10, %vm1180_vm9 }
 0x47e   :  { %v1175_v7 = vmul.f32 %v3357_v45, %v1174_v4  ;;  %v1324_v4 = vperm.slane %v3964_v44, 4 }
 0x480   :  { %v1176_v35 = vmul.f32 0.5, %v1175_v7 }
 0x482   :  { %v1177_v58 = vsub.f32 1.5, %v1176_v35 }
 0x484   :  { %v1178_v22 = vmul.f32 %v3357_v45, %v1177_v58 }
 0x486   :  { %v1182_v26 = vsel %vm1181_vm11, %v3357_v45, %v1178_v22 }
 0x487   :  { %v1183_v8 = vmul.f32 %v1182_v26, %v3991_v33  ;;  %v1184_v18 = vmul.f32 %v1182_v26, %v3993_v49  ;;  %v1185_v40 = vmul.f32 %v1182_v26, %v3995_v59  ;;  %v1186_v33 = vmul.f32 %v1182_v26, %v3997_v31 }
 0x488   :  { %v1187_v29 = vmul.f32 %v1182_v26, %v3999_v37  ;;  %v1188_v50 = vmul.f32 %v1182_v26, %v4007_v3  ;;  %v1189_v52 = vmul.f32 %v1182_v26, %v4013_v53  ;;  %v1190_v38 = vmul.f32 %v1182_v26, %v4018_v9 }
 0x489   :  { %v1192_v2 = vmul.f32 %v1191_v36, %v1183_v8  ;;  %v1193_v63 = vmul.f32 %v1191_v36, %v1184_v18  ;;  %v1194_v12 = vmul.f32 %v1191_v36, %v1185_v40  ;;  %v1195_v49 = vmul.f32 %v1191_v36, %v1186_v33 }
 0x48a   :  { %v1196_v59 = vmul.f32 %v1191_v36, %v1187_v29  ;;  %v1197_v31 = vmul.f32 %v1191_v36, %v1188_v50  ;;  %v1198_v37 = vmul.f32 %v1191_v36, %v1189_v52  ;;  %v1199_v3 = vmul.f32 %v1191_v36, %v1190_v38 }
 0x48b   :  { %v1201_v13 = vadd.f32 %v1200_v42, %v1192_v2  ;;  %v1202_v10 = vadd.f32 %v1200_v42, %v1193_v63  ;;  %v1203_v41 = vadd.f32 %v1200_v42, %v1194_v12  ;;  %v1204_v57 = vadd.f32 %v1200_v42, %v1195_v49 }
 0x48c   :  { %v1205_v19 = vadd.f32 %v1200_v42, %v1196_v59  ;;  %v1206_v51 = vadd.f32 %v1200_v42, %v1197_v31  ;;  %v1207_v55 = vadd.f32 %v1200_v42, %v1198_v37  ;;  %v1208_v1 = vadd.f32 %v1200_v42, %v1199_v3 }
 0x48d   :  { %3077 = vmatmul.msk.f32.vlgmr.msra.gmra.mxu1 %vm226_vm1, %v1201_v13  ;;  %3085 = vmatmul.msk.f32.vlgmr.msra.gmra.mxu2 %vm226_vm1, %v1201_v13 }
 0x495   :  { %3078 = vmatmul.msk.f32.gmra.mxu1 %vm226_vm1, %v1202_v10  ;;  %3086 = vmatmul.msk.f32.gmra.mxu2 %vm226_vm1, %v1202_v10 }
 0x49d   :  { %3079 = vmatmul.msk.f32.gmra.mxu1 %vm226_vm1, %v1203_v41  ;;  %3087 = vmatmul.msk.f32.gmra.mxu2 %vm226_vm1, %v1203_v41 }
 0x4a5   :  { %3080 = vmatmul.msk.f32.gmra.mxu1 %vm226_vm1, %v1204_v57  ;;  %3088 = vmatmul.msk.f32.gmra.mxu2 %vm226_vm1, %v1204_v57 }
 0x4ad   :  { %3081 = vmatmul.msk.f32.gmra.mxu1 %vm226_vm1, %v1205_v19  ;;  %3089 = vmatmul.msk.f32.gmra.mxu2 %vm226_vm1, %v1205_v19 }
 0x4b5   :  { %3082 = vmatmul.msk.f32.gmra.mxu1 %vm226_vm1, %v1206_v51  ;;  %3090 = vmatmul.msk.f32.gmra.mxu2 %vm226_vm1, %v1206_v51 }
 0x4bd   :  { %3083 = vmatmul.msk.f32.gmra.mxu1 %vm226_vm1, %v1207_v55  ;;  %3091 = vmatmul.msk.f32.gmra.mxu2 %vm226_vm1, %v1207_v55 }
 0x4c5   :  { %3084 = vmatmul.msk.f32.gmra.mxu1 %vm226_vm1, %v1208_v1  ;;  %3092 = vmatmul.msk.f32.gmra.mxu2 %vm226_vm1, %v1208_v1 }
 0x510   :  { %v1300_v11 = vpop.f32.mrf.mxu2 }
 0x511   :  { %v1381_v53 = vsel %vm416_vm3, %v1300_v11, inf  ;;  %v1325_v41 = vadd.f32 %v1324_v4, %v1300_v11 }
 0x512   :  { %1382 = vmin.xlane.f32.xlu0 %v1381_v53 }
 0x513   :  { %v1333_v49 = vsel %vm416_vm3, %v1325_v41, -inf }
 0x518   :  { %v1303_v61 = vpop.f32.mrf.mxu2 }
 0x519   :  { %v1384_v27 = vsel %vm416_vm3, %v1303_v61, inf  ;;  %v4064_v7 = vadd.f32 %v1324_v4, %v1303_v61 }
 0x51a   :  { %1385 = vmin.xlane.f32.xlu2 %v1384_v27 }
 0x51b   :  { %v1336_v58 = vsel %vm416_vm3, %v4064_v7, -inf }
 0x520   :  { %v1306_v34 = vpop.f32.mrf.mxu2 }
 0x521   :  { %v1387_v9 = vsel %vm416_vm3, %v1306_v34, inf  ;;  %v4085_v63 = vadd.f32 %v1324_v4, %v1306_v34 }
 0x522   :  { %1388 = vmin.xlane.f32.xlu2 %v1387_v9 }
 0x523   :  { %v1339_v10 = vsel %vm416_vm3, %v4085_v63, -inf }
 0x528   :  { %v1309_v6 = vpop.f32.mrf.mxu2 }
 0x529   :  { %v1390_v45 = vsel %vm416_vm3, %v1309_v6, inf  ;;  %v4097_v57 = vadd.f32 %v1324_v4, %v1309_v6 }
 0x52a   :  { %1391 = vmin.xlane.f32.xlu2 %v1390_v45 }
 0x52b   :  { %v1342_v29 = vsel %vm416_vm3, %v4097_v57, -inf }
 0x530   :  { %v4066_v35 = vpop.f32.mrf.mxu2 }
 0x531   :  { %v4071_v16 = vadd.f32 %v1324_v4, %v4066_v35  ;;  %v1393_v42 = vsel %vm416_vm3, %v4066_v35, inf }
 0x532   :  { %1337 = vmax.xlane.f32.xlu2 %v1336_v58 }
 0x533   :  { %v1345_v36 = vsel %vm416_vm3, %v4071_v16, -inf }
 0x538   :  { %v4073_v22 = vpop.f32.mrf.mxu2 }
 0x539   :  { %v1396_v40 = vsel %vm416_vm3, %v4073_v22, inf  ;;  %v4092_v12 = vadd.f32 %v1324_v4, %v4073_v22 }
 0x53a   :  { %1346 = vmax.xlane.f32.xlu2 %v1345_v36 }
 0x53b   :  { %v1348_v33 = vsel %vm416_vm3, %v4092_v12, -inf }
 0x540   :  { %v1318_v26 = vpop.f32.mrf.mxu2 }
 0x541   :  { %v1399_v44 = vsel %vm416_vm3, %v1318_v26, inf  ;;  %v4101_v59 = vadd.f32 %v1324_v4, %v1318_v26 }
 0x542   :  { %1400 = vmin.xlane.f32.xlu0 %v1399_v44 }
 0x543   :  { %v1351_v19 = vsel %vm416_vm3, %v4101_v59, -inf }
 0x548   :  { %v1321_v8 = vpop.f32.mrf.mxu2 }
 0x549   :  { %v1402_v2 = vsel %vm416_vm3, %v1321_v8, inf  ;;  %v4081_v13 = vadd.f32 %v1324_v4, %v1321_v8 }
 0x54a   :  { %1394 = vmin.xlane.f32.xlu0 %v1393_v42  ;;  %1403 = vmin.xlane.f32.xlu1 %v1402_v2 }
 0x54b   :  { %v1354_v18 = vsel %vm416_vm3, %v4081_v13, -inf }
 0x54c   :  { %1355 = vmax.xlane.f32.xlu2 %v1354_v18 }
 0x552   :  { %1340 = vmax.xlane.f32.xlu0 %v1339_v10  ;;  %1397 = vmin.xlane.f32.xlu1 %v1396_v40 }
 0x55a   :  { %1349 = vmax.xlane.f32.xlu0 %v1348_v33  ;;  %1334 = vmax.xlane.f32.xlu1 %v1333_v49 }
 0x562   :  { %1343 = vmax.xlane.f32.xlu1 %v1342_v29 }
 0x56a   :  { %1352 = vmax.xlane.f32.xlu1 %v1351_v19 }
 0x585   :  { %v1383_v50 = vpop.xlane.xlu0 %1382 }
 0x586   :  { %v1405_v31 = vsub.f32 %v1383_v50, %v1300_v11 }
 0x588   :  { %v1413_v51 = vmul.f32 1.442695, %v1405_v31 }
 0x58a   :  { %3358 = vpow2.f32 %v1413_v51 }
 0x58d   :  { %v1386_v52 = vpop.xlane.xlu2 %1385 }
 0x58e   :  { %v1406_v37 = vsub.f32 %v1386_v52, %v1303_v61 }
 0x590   :  { %v4105_v55 = vpop.eup %3358  ;;  %v1415_v38 = vmul.f32 1.442695, %v1406_v37 }
 0x591   :  { %3110 = vmatmul.msk.f32.vlgmr.msra.gmra.mxu0 %vm416_vm3, %v4105_v55 }
 0x592   :  { %3360 = vpow2.f32 %v1415_v38 }
 0x595   :  { %v1389_v3 = vpop.xlane.xlu2 %1388 }
 0x596   :  { %v1407_v1 = vsub.f32 %v1389_v3, %v1306_v34 }
 0x598   :  { %v3361_v53 = vpop.eup %3360  ;;  %v1417_v27 = vmul.f32 1.442695, %v1407_v1 }
 0x599   :  { %3111 = vmatmul.msk.f32.gmra.mxu0 %vm416_vm3, %v3361_v53 }
 0x59a   :  { %3362 = vpow2.f32 %v1417_v27 }
 0x59d   :  { %v1392_v9 = vpop.xlane.xlu2 %1391 }
 0x59e   :  { %v1408_v11 = vsub.f32 %v1392_v9, %v1309_v6 }
 0x5a0   :  { %v3363_v45 = vpop.eup %3362  ;;  %v1419_v4 = vmul.f32 1.442695, %v1408_v11 }
 0x5a1   :  { %3112 = vmatmul.msk.f32.gmra.mxu0 %vm416_vm3, %v3363_v45 }
 0x5a2   :  { %3364 = vpow2.f32 %v1419_v4 }
 0x5a5   :  { %v1338_v50 = vpop.xlane.xlu2 %1337 }
 0x5a6   :  { %v1358_v52 = vsub.f32 %v4064_v7, %v1338_v50 }
 0x5a8   :  { %v3365_v61 = vpop.eup %3364 }
 0x5a9   :  { %3113 = vmatmul.msk.f32.gmra.mxu0 %vm416_vm3, %v3365_v61 }
 0x5ad   :  { %v1347_v27 = vpop.xlane.xlu2 %1346 }
 0x5b5   :  { %v1401_v58 = vpop.xlane.xlu0 %1400 }
 0x5b6   :  { %v1411_v2 = vsub.f32 %v1401_v58, %v1318_v26 }
 0x5b8   :  { %v1425_v40 = vmul.f32 1.442695, %v1411_v2 }
 0x5bd   :  { %v1395_v36 = vpop.xlane.xlu0 %1394  ;;  %v1404_v44 = vpop.xlane.xlu1 %1403 }
 0x5be   :  { %v1409_v34 = vsub.f32 %v1395_v36, %v4066_v35  ;;  %v1412_v42 = vsub.f32 %v1404_v44, %v1321_v8 }
 0x5c0   :  { %v1421_v18 = vmul.f32 1.442695, %v1409_v34  ;;  %v1427_v10 = vmul.f32 1.442695, %v1412_v42 }
 0x5c2   :  { %3366 = vpow2.f32 %v1421_v18 }
 0x5c3   :  { %3368 = vpow2.f32 %v1427_v10 }
 0x5c4   :  { %3370 = vpow2.f32 %v1425_v40 }
 0x5c5   :  { %v1398_v6 = vpop.xlane.xlu1 %1397  ;;  %v1341_v38 = vpop.xlane.xlu0 %1340 }
 0x5c6   :  { %v1410_v33 = vsub.f32 %v1398_v6, %v4073_v22  ;;  %v1367_v22 = vmul.f32 1.442695, %v1358_v52  ;;  %v1359_v7 = vsub.f32 %v4085_v63, %v1341_v38  ;;  %v1361_v63 = vsub.f32 %v4071_v16, %v1347_v27 }
 0x5c8   :  { %v3367_v49 = vpop.eup %3366  ;;  %v1423_v29 = vmul.f32 1.442695, %v1410_v33  ;;  %v1369_v1 = vmul.f32 1.442695, %v1359_v7 }
 0x5c9   :  { %v3369_v19 = vpop.eup %3368  ;;  %3114 = vmatmul.msk.f32.gmra.mxu0 %vm416_vm3, %v3367_v49 }
 0x5ca   :  { %3093 = vmatpush.xpose.msk.msra.mxu3 %vm416_vm3, %v3369_v19  ;;  %3372 = vpow2.f32 %v1423_v29  ;;  %v3371_v35 = vpop.eup %3370  ;;  %v1356_v29 = vpop.xlane.xlu2 %1355 }
 0x5cd   :  { %v1335_v8 = vpop.xlane.xlu1 %1334  ;;  %v1350_v58 = vpop.xlane.xlu0 %1349 }
 0x5ce   :  { %3094 = vmatpush.xpose.msk.msra.mxu3 %vm416_vm3, %v3371_v35  ;;  %v1357_v26 = vsub.f32 %v1325_v41, %v1335_v8  ;;  %v1362_v44 = vsub.f32 %v4092_v12, %v1350_v58 }
 0x5d0   :  { %v1365_v31 = vmul.f32 1.442695, %v1357_v26  ;;  %v3373_v51 = vpop.eup %3372 }
 0x5d1   :  { %3115 = vmatmul.msk.f32.gmra.mxu0 %vm416_vm3, %v3373_v51 }
 0x5d2   :  { %3095 = vmatpush.xpose.msk.msra.mxu3 %vm416_vm3, %v3373_v51  ;;  %3374 = vpow2.f32 %v1365_v31 }
 0x5d3   :  { %3376 = vpow2.f32 %v1367_v22 }
 0x5d4   :  { %3378 = vpow2.f32 %v1369_v1 }
 0x5d6   :  { %3096 = vmatpush.xpose.msk.msra.mxu3 %vm416_vm3, %v3367_v49 }
 0x5d8   :  { %v3375_v37 = vpop.eup %3374 }
 0x5d9   :  { %3116 = vmatmul.msk.f32.gmra.mxu0 %vm416_vm3, %v3371_v35  ;;  %v1656_v41 = vmul.f32 %v3375_v37, %v3754_v0  ;;  %v3377_v3 = vpop.eup %3376  ;;  %v1364_v35 = vsub.f32 %v4081_v13, %v1356_v29 }
 0x5da   :  { %3097 = vmatpush.xpose.msk.msra.mxu3 %vm416_vm3, %v3365_v61  ;;  %v1657_v9 = vmul.f32 %v3377_v3, %v3759_v5  ;;  %v3379_v11 = vpop.eup %3378 }
 0x5db   :  { %1793 = vperm.xlu1 %3236, %v1656_v41   ;;  %1713 = vperm.xlu0 %3235, %v1656_v41   ;;  %v1658_v4 = vmul.f32 %v3379_v11, %v3769_v21  ;;  %v1379_v8 = vmul.f32 1.442695, %v1364_v35 }
 0x5dc   :  { %1666 = vperm.xlu2 %3231, %v1656_v41  }
 0x5de   :  { %3098 = vmatpush.xpose.msk.msra.mxu3 %vm416_vm3, %v3363_v45  ;;  %v1344_v45 = vpop.xlane.xlu1 %1343 }
 0x5df   :  { %v1360_v16 = vsub.f32 %v4097_v57, %v1344_v45  ;;  %v1375_v57 = vmul.f32 1.442695, %v1362_v44 }
 0x5e1   :  { %3117 = vmatmul.msk.f32.gmra.mxu0 %vm416_vm3, %v3369_v19 }
 0x5e2   :  { %3099 = vmatpush.xpose.msk.msra.mxu3 %vm416_vm3, %v3361_v53  ;;  %v1373_v53 = vmul.f32 1.442695, %v1361_v63 }
 0x5e3   :  { %3238 = vset.pattern.permute.xlu1 %v3520_v24  ;;  %3237 = vset.pattern.permute.xlu0 %v3519_v15 }
 0x5e4   :  { %3239 = vset.pattern.permute.xlu2 %v3521_v17  ;;  %1717 = vperm.xlu1 %3238, %v1657_v9   ;;  %3380 = vpow2.f32 %v1373_v53 }
 0x5e5   :  { %1873 = vperm.xlu0 %3237, %v1656_v41   ;;  %1797 = vperm.xlu2 %3239, %v1657_v9  }
 0x5e6   :  { %3100 = vmatpush.xpose.msk.msra.mxu3 %vm416_vm3, %v4105_v55  ;;  %v1371_v55 = vmul.f32 1.442695, %v1360_v16  ;;  %v1353_v42 = vpop.xlane.xlu1 %1352 }
 0x5e7   :  { %v1363_v12 = vsub.f32 %v4101_v59, %v1353_v42  ;;  %v1259_v59 = vpop.f32.mrf.mxu1 }
 0x5e8   :  { %3382 = vpow2.f32 %v1371_v55 }
 0x5e9   :  { %3101 = vmatmul.msk.f32.vlgmr.msra.gmra.mxu3 %vm416_vm3, %v3375_v37  ;;  %3384 = vpow2.f32 %v1375_v57  ;;  %v1377_v10 = vmul.f32 1.442695, %v1363_v12 }
 0x5ea   :  { %v3381_v61 = vpop.eup %3380 }
 0x5eb   :  { %v1660_v36 = vmul.f32 %v3381_v61, %v3799_v39  ;;  %3386 = vpow2.f32 %v1377_v10 }
 0x5ec   :  { %3240 = vset.pattern.permute.xlu1 %v3519_v15  ;;  %3388 = vpow2.f32 %v1379_v8 }
 0x5ed   :  { %3241 = vset.pattern.permute.xlu0 %v3517_v23  ;;  %3242 = vset.pattern.permute.xlu2 %v3520_v24 }
 0x5ee   :  { %1877 = vperm.xlu1 %3240, %v1657_v9   ;;  %1671 = vperm.xlu0 %3241, %v1657_v9   ;;  %v3383_v34 = vpop.eup %3382 }
 0x5ef   :  { %1721 = vperm.xlu2 %3242, %v1658_v4   ;;  %v1659_v2 = vmul.f32 %v3383_v34, %v3786_v32  ;;  %v3385_v18 = vpop.eup %3384  ;;  %v1262_v50 = vpop.f32.mrf.mxu1 }
 0x5f0   :  { %v1661_v40 = vmul.f32 %v3385_v18, %v3797_v30 }
 0x5f1   :  { %3102 = vmatmul.msk.f32.gmra.mxu3 %vm416_vm3, %v3377_v3  ;;  %v3387_v49 = vpop.eup %3386 }
 0x5f2   :  { %v1662_v19 = vmul.f32 %v3387_v49, %v3815_v48  ;;  %v3389_v26 = vpop.eup %3388 }
 0x5f3   :  { %v1663_v31 = vmul.f32 %v3389_v26, %v3809_v46 }
 0x5f6   :  { %3245 = vset.pattern.permute.xlu1 %v3517_v23  ;;  %3250 = vset.pattern.permute.xlu0 %v3519_v15 }
 0x5f7   :  { %3243 = vset.pattern.permute.xlu2 %v3521_v17  ;;  %1676 = vperm.xlu1 %3245, %v1658_v4   ;;  %v1265_v51 = vpop.f32.mrf.mxu1 }
 0x5f8   :  { %1889 = vperm.xlu0 %3250, %v1660_v36   ;;  %1801 = vperm.xlu2 %3243, %v1658_v4  }
 0x5f9   :  { %3103 = vmatmul.msk.f32.gmra.mxu3 %vm416_vm3, %v3379_v11 }
 0x5ff   :  { %3246 = vset.pattern.permute.xlu1 %v3520_v24  ;;  %v1268_v22 = vpop.f32.mrf.mxu1 }
 0x600   :  { %3251 = vset.pattern.permute.xlu0 %v3517_v23  ;;  %3244 = vset.pattern.permute.xlu2 %v3519_v15 }
 0x601   :  { %1686 = vperm.xlu0 %3251, %v1660_v36   ;;  %1725 = vperm.xlu1 %3246, %v1659_v2  }
 0x602   :  { %1881 = vperm.xlu2 %3244, %v1658_v4   ;;  %3104 = vmatmul.msk.f32.gmra.mxu3 %vm416_vm3, %v3383_v34 }
 0x607   :  { %v1271_v38 = vpop.f32.mrf.mxu1 }
 0x609   :  { %3252 = vset.pattern.permute.xlu0 %v3520_v24  ;;  %3247 = vset.pattern.permute.xlu1 %v3521_v17 }
 0x60a   :  { %1885 = vperm.xlu2 %3244, %v1659_v2   ;;  %1733 = vperm.xlu0 %3252, %v1661_v40  }
 0x60b   :  { %1805 = vperm.xlu1 %3247, %v1659_v2   ;;  %3105 = vmatmul.msk.f32.gmra.mxu3 %vm416_vm3, %v3381_v61 }
 0x60e   :  { %v1579_v6 = vpop.f32.mrf.mxu0 }
 0x60f   :  { %v4158_v33 = vmul.f32 %v1579_v6, %v1259_v59  ;;  %v1274_v7 = vpop.f32.mrf.mxu1 }
 0x612   :  { %3248 = vset.pattern.permute.xlu2 %v3517_v23  ;;  %3258 = vset.pattern.permute.xlu0 %v3519_v15 }
 0x613   :  { %1809 = vperm.xlu1 %3247, %v1660_v36   ;;  %3106 = vmatmul.msk.f32.gmra.mxu3 %vm416_vm3, %v3385_v18 }
 0x614   :  { %1681 = vperm.xlu2 %3248, %v1659_v2   ;;  %1897 = vperm.xlu0 %3258, %v1662_v19  }
 0x616   :  { %v1582_v13 = vpop.f32.mrf.mxu0 }
 0x617   :  { %v1277_v1 = vpop.f32.mrf.mxu1 }
 0x61b   :  { %3254 = vset.pattern.permute.xlu1 %v3519_v15  ;;  %3107 = vmatmul.msk.f32.gmra.mxu3 %vm416_vm3, %v3387_v49 }
 0x61c   :  { %3249 = vset.pattern.permute.xlu2 %v3520_v24  ;;  %1893 = vperm.xlu1 %3254, %v1661_v40  }
 0x61d   :  { %3259 = vset.pattern.permute.xlu0 %v3517_v23  ;;  %1729 = vperm.xlu2 %3249, %v1660_v36   ;;  %v1604_v36 = vmul.f32 %v1582_v13, %v1262_v50 }
 0x61e   :  { %1696 = vperm.xlu0 %3259, %v1662_v19   ;;  %v1585_v52 = vpop.f32.mrf.mxu0 }
 0x61f   :  { %v1280_v9 = vpop.f32.mrf.mxu1  ;;  %v1605_v58 = vmul.f32 %v1585_v52, %v1265_v51  ;;  %v1611_v34 = vpack.c.bf16 %v1604_v36, %v4158_v33 }
 0x623   :  { %3108 = vmatmul.msk.f32.gmra.mxu3 %vm416_vm3, %v3389_v26 }
 0x624   :  { %3256 = vset.pattern.permute.xlu1 %v3520_v24 }
 0x625   :  { %3253 = vset.pattern.permute.xlu2 %v3521_v17  ;;  %1737 = vperm.xlu1 %3256, %v1662_v19  }
 0x626   :  { %1813 = vperm.xlu2 %3253, %v1661_v40   ;;  %3262 = vset.pattern.permute.xlu0 %v3520_v24  ;;  %v1588_v37 = vpop.f32.mrf.mxu0 }
 0x627   :  { %v1606_v55 = vmul.f32 %v1588_v37, %v1268_v22 }
 0x629   :  { %v1612_v44 = vpack.c.bf16 %v1606_v55, %v1605_v58 }
 0x62d   :  { %1741 = vperm.xlu1 %3256, %v1663_v31  }
 0x62e   :  { %3255 = vset.pattern.permute.xlu2 %v3517_v23 }
 0x62f   :  { %1691 = vperm.xlu2 %3255, %v1661_v40  }
 0x635   :  { %3260 = vset.pattern.permute.xlu1 %v3519_v15 }
 0x636   :  { %1901 = vperm.xlu1 %3260, %v1663_v31  }
 0x637   :  { %3257 = vset.pattern.permute.xlu2 %v3521_v17 }
 0x638   :  { %1817 = vperm.xlu2 %3257, %v1662_v19  }
 0x63e   :  { %3261 = vset.pattern.permute.xlu1 %v3517_v23 }
 0x63f   :  { %1701 = vperm.xlu1 %3261, %v1663_v31  }
 0x640   :  { %1821 = vperm.xlu2 %3257, %v1663_v31  }
 0x646   :  { %v1591_v41 = vpop.f32.mrf.mxu0 }
 0x647   :  { %3263 = vset.pattern.permute.xlu1 %v3521_v17  ;;  %v1607_v16 = vmul.f32 %v1591_v41, %v1271_v38 }
 0x648   :  { %3264 = vset.pattern.permute.xlu2 %v3519_v15 }
 0x64e   :  { %v1594_v3 = vpop.f32.mrf.mxu0 }
 0x64f   :  { %v1608_v45 = vmul.f32 %v1594_v3, %v1274_v7 }
 0x651   :  { %v1613_v61 = vpack.c.bf16 %v1608_v45, %v1607_v16 }
 0x656   :  { %v1597_v27 = vpop.f32.mrf.mxu0 }
 0x657   :  { %v1609_v53 = vmul.f32 %v1597_v27, %v1277_v1 }
 0x65e   :  { %v1600_v63 = vpop.f32.mrf.mxu0 }
 0x65f   :  { %v1610_v11 = vmul.f32 %v1600_v63, %v1280_v9 }
 0x661   :  { %v1614_v4 = vpack.c.bf16 %v1610_v11, %v1609_v53 }
 0x663   :  { %1631 = vmatpush.bf16.msrb.mxu1 %v1614_v4 }
 0x667   :  { %1632 = vmatpush.bf16.msrb.mxu1 %v1613_v61 }
 0x66b   :  { %1633 = vmatpush.bf16.msrb.mxu1 %v1612_v44 }
 0x66c   :  { %v1494_v57 = vpop.f32.mrf.mxu3 }
 0x66d   :  { %v1518_v42 = vmax.f32 %v1494_v57, 1e-20 }
 0x66f   :  { %1634 = vmatpush.bf16.msrb.mxu1 %v1611_v34  ;;  %3390 = vrcp.f32 %v1518_v42 }
 0x673   :  { %3154 = vmatpush.msk.msra.mxu1 %vm654_vm7, %v3712_v56 }
 0x674   :  { %v1497_v2 = vpop.f32.mrf.mxu3 }
 0x675   :  { %v1519_v12 = vmax.f32 %v1497_v2, 1e-20  ;;  %v3391_v18 = vpop.eup %3390 }
 0x676   :  { %v1534_v10 = vpack.c.bf16 %v3391_v18, %v3391_v18 }
 0x677   :  { %3392 = vrcp.f32 %v1519_v12 }
 0x678   :  { %v1542_v6 = vunpack.c.l.bf16 %v1534_v10 }
 0x67a   :  { %v1550_v35 = vmul.f32 %v1542_v6, %v3836_v14 }
 0x67c   :  { %v1500_v40 = vpop.f32.mrf.mxu3 }
 0x67d   :  { %v3393_v59 = vpop.eup %3392  ;;  %v1520_v29 = vmax.f32 %v1500_v40, 1e-20 }
 0x67e   :  { %v1535_v49 = vpack.c.bf16 %v3393_v59, %v3393_v59 }
 0x67f   :  { %3394 = vrcp.f32 %v1520_v29 }
 0x680   :  { %v1543_v19 = vunpack.c.l.bf16 %v1535_v49  ;;  %v4195_v49 = vpop.permute.xlu2 %1666 }
 0x682   :  { %v1551_v33 = vmul.f32 %v1543_v19, %v3838_v28  ;;  %v1794_v19 = vpop.permute.xlu1 %1793 }
 0x684   :  { %v1558_v8 = vpack.c.bf16 %v1551_v33, %v1550_v35 }
 0x685   :  { %v1503_v26 = vpop.f32.mrf.mxu3  ;;  %v3395_v50 = vpop.eup %3394 }
 0x686   :  { %v1521_v56 = vmax.f32 %v1503_v26, 1e-20  ;;  %3118 = vmatmul.msk.bf16.vlgmr.msrb.gmra.mxu1 %vm66_vm2, %v1558_v8  ;;  %v1536_v13 = vpack.c.bf16 %v3395_v50, %v3395_v50 }
 0x688   :  { %3396 = vrcp.f32 %v1521_v56  ;;  %v1544_v52 = vunpack.c.l.bf16 %v1536_v13  ;;  %v1798_v29 = vpop.permute.xlu2 %1797  ;;  %v1714_v56 = vpop.permute.xlu0 %1713 }
 0x68a   :  { %v1552_v41 = vmul.f32 %v1544_v52, %v3848_v43  ;;  %v1718_v33 = vpop.permute.xlu1 %1717 }
 0x68e   :  { %v3397_v31 = vpop.eup %3396  ;;  %v1506_v51 = vpop.f32.mrf.mxu3 }
 0x68f   :  { %v1537_v22 = vpack.c.bf16 %v3397_v31, %v3397_v31  ;;  %v1522_v37 = vmax.f32 %v1506_v51, 1e-20 }
 0x690   :  { %v1722_v35 = vpop.permute.xlu2 %1721  ;;  %v1874_v31 = vpop.permute.xlu0 %1873 }
 0x691   :  { %v1545_v38 = vunpack.c.l.bf16 %v1537_v22  ;;  %3398 = vrcp.f32 %v1522_v37 }
 0x692   :  { %v1878_v26 = vpop.permute.xlu1 %1877 }
 0x693   :  { %v1553_v7 = vmul.f32 %v1545_v38, %v3850_v47 }
 0x695   :  { %v1559_v3 = vpack.c.bf16 %v1553_v7, %v1552_v41 }
 0x696   :  { %v1509_v1 = vpop.f32.mrf.mxu3 }
 0x697   :  { %v1523_v27 = vmax.f32 %v1509_v1, 1e-20  ;;  %3119 = vmatmul.msk.bf16.gmra.mxu1 %vm66_vm2, %v1559_v3  ;;  %v3399_v9 = vpop.eup %3398 }
 0x698   :  { %v1538_v63 = vpack.c.bf16 %v3399_v9, %v3399_v9  ;;  %v1802_v8 = vpop.permute.xlu2 %1801 }
 0x699   :  { %3400 = vrcp.f32 %v1523_v27 }
 0x69a   :  { %v1546_v4 = vunpack.c.l.bf16 %v1538_v63  ;;  %v4197_v13 = vpop.permute.xlu1 %1676 }
 0x69c   :  { %v1554_v61 = vmul.f32 %v1546_v4, %v3858_v60  ;;  %v4220_v4 = vpop.permute.xlu0 %1671 }
 0x69e   :  { %v1512_v53 = vpop.f32.mrf.mxu3 }
 0x69f   :  { %v3401_v11 = vpop.eup %3400  ;;  %v1524_v45 = vmax.f32 %v1512_v53, 1e-20 }
 0x6a0   :  { %v1539_v16 = vpack.c.bf16 %v3401_v11, %v3401_v11  ;;  %v1882_v50 = vpop.permute.xlu2 %1881 }
 0x6a1   :  { %3402 = vrcp.f32 %v1524_v45 }
 0x6a2   :  { %v1547_v55 = vunpack.c.l.bf16 %v1539_v16  ;;  %v1726_v41 = vpop.permute.xlu1 %1725 }
 0x6a4   :  { %v1555_v58 = vmul.f32 %v1547_v55, %v3860_v62 }
 0x6a6   :  { %v1560_v36 = vpack.c.bf16 %v1555_v58, %v1554_v61  ;;  %v1515_v44 = vpop.f32.mrf.mxu3 }
 0x6a7   :  { %v1525_v57 = vmax.f32 %v1515_v44, 1e-20  ;;  %v3403_v34 = vpop.eup %3402 }
 0x6a8   :  { %3120 = vmatmul.msk.bf16.gmra.mxu1 %vm66_vm2, %v1560_v36  ;;  %v1540_v42 = vpack.c.bf16 %v3403_v34, %v3403_v34  ;;  %v1886_v51 = vpop.permute.xlu2 %1885 }
 0x6a9   :  { %3404 = vrcp.f32 %v1525_v57  ;;  %v1890_v57 = vpop.permute.xlu0 %1889 }
 0x6aa   :  { %v1548_v12 = vunpack.c.l.bf16 %v1540_v42  ;;  %v1806_v9 = vpop.permute.xlu1 %1805 }
 0x6ac   :  { %v1556_v40 = vmul.f32 %v1548_v12, %v3868_v20 }
 0x6af   :  { %v3405_v2 = vpop.eup %3404 }
 0x6b0   :  { %v1541_v18 = vpack.c.bf16 %v3405_v2, %v3405_v2  ;;  %v4211_v27 = vpop.permute.xlu2 %1681 }
 0x6b2   :  { %v1549_v10 = vunpack.c.l.bf16 %v1541_v18  ;;  %v1810_v61 = vpop.permute.xlu1 %1809 }
 0x6b4   :  { %v1557_v59 = vmul.f32 %v1549_v10, %v3870_v25 }
 0x6b6   :  { %v1561_v6 = vpack.c.bf16 %v1557_v59, %v1556_v40  ;;  %v4241_v40 = vpop.permute.xlu0 %1686 }
 0x6b8   :  { %3121 = vmatmul.msk.bf16.gmra.mxu1 %vm66_vm2, %v1561_v6  ;;  %v1730_v16 = vpop.permute.xlu2 %1729 }
 0x6ba   :  { %v1894_v10 = vpop.permute.xlu1 %1893 }
 0x6c0   :  { %v1814_v34 = vpop.permute.xlu2 %1813 }
 0x6c8   :  { %v4243_v59 = vpop.permute.xlu2 %1691 }
 0x703   :  { %v4199_v52 = vpop.f32.mrf.mxu1 }
 0x704   :  { %v1904_v22 = vmul.f32 %v1874_v31, %v4199_v52  ;;  %v1824_v37 = vmul.f32 %v1794_v19, %v4199_v52  ;;  %v1744_v38 = vmul.f32 %v1714_v56, %v4199_v52 }
 0x706   :  { %1920 = vrot.lane.b32.xlu0 %v1904_v22, %s3524_s28  ;;  %1840 = vrot.lane.b32.xlu1 %v1824_v37, %s3522_s1 }
 0x707   :  { %1760 = vrot.lane.b32.xlu2 %v1744_v38, %s3523_s27 }
 0x70b   :  { %v4207_v7 = vpop.f32.mrf.mxu1 }
 0x70c   :  { %v1825_v3 = vmul.f32 %v1798_v29, %v4207_v7  ;;  %v1745_v1 = vmul.f32 %v1718_v33, %v4207_v7  ;;  %v1905_v53 = vmul.f32 %v1878_v26, %v4207_v7  ;;  %v1734_v33 = vpop.permute.xlu0 %1733 }
 0x70e   :  { %1762 = vrot.lane.b32.xlu1 %v1745_v1, %s3523_s27 }
 0x70f   :  { %1842 = vrot.lane.b32.xlu2 %v1825_v3, %s3522_s1 }
 0x714   :  { %v4215_v63 = vpop.f32.mrf.mxu1  ;;  %v1898_v37 = vpop.permute.xlu0 %1897 }
 0x715   :  { %v1826_v11 = vmul.f32 %v1802_v8, %v4215_v63  ;;  %v1746_v45 = vmul.f32 %v1722_v35, %v4215_v63  ;;  %v1906_v58 = vmul.f32 %v1882_v50, %v4215_v63  ;;  %v1738_v35 = vpop.permute.xlu1 %1737  ;;  %v1818_v8 = vpop.permute.xlu2 %1817 }
 0x716   :  { %1922 = vrot.lane.b32.xlu1 %v1905_v53, %s3524_s28 }
 0x717   :  { %1844 = vrot.lane.b32.xlu2 %v1826_v11, %s3522_s1  ;;  %1764 = vrot.lane.b32.xlu0 %v1746_v45, %s3523_s27 }
 0x71c   :  { %v4225_v55 = vpop.f32.mrf.mxu1 }
 0x71d   :  { %v1747_v36 = vmul.f32 %v1726_v41, %v4225_v55  ;;  %v1907_v44 = vmul.f32 %v1886_v51, %v4225_v55  ;;  %v1827_v2 = vmul.f32 %v1806_v9, %v4225_v55  ;;  %v1742_v51 = vpop.permute.xlu1 %1741  ;;  %v1822_v1 = vpop.permute.xlu2 %1821 }
 0x71f   :  { %1924 = vrot.lane.b32.xlu2 %v1906_v58, %s3524_s28  ;;  %1926 = vrot.lane.b32.xlu0 %v1907_v44, %s3524_s28  ;;  %v1697_v58 = vpop.permute.xlu0 %1696  ;;  %v1704_v44 = vmul.f32 %v4195_v49, %v4199_v52 }
 0x720   :  { %1766 = vrot.lane.b32.xlu1 %v1747_v36, %s3523_s27 }
 0x725   :  { %v4233_v42 = vpop.f32.mrf.mxu1  ;;  %v1902_v9 = vpop.permute.xlu1 %1901 }
 0x726   :  { %v1828_v12 = vmul.f32 %v1810_v61, %v4233_v42  ;;  %v1748_v18 = vmul.f32 %v1730_v16, %v4233_v42  ;;  %v1908_v29 = vmul.f32 %v1890_v57, %v4233_v42 }
 0x728   :  { %1846 = vrot.lane.b32.xlu1 %v1827_v2, %s3522_s1  ;;  %1848 = vrot.lane.b32.xlu2 %v1828_v12, %s3522_s1 }
 0x729   :  { %1768 = vrot.lane.b32.xlu0 %v1748_v18, %s3523_s27  ;;  %v1705_v18 = vmul.f32 %v4220_v4, %v4207_v7 }
 0x72d   :  { %v4245_v6 = vpop.f32.mrf.mxu1  ;;  %v4271_v16 = vpop.permute.xlu1 %1701 }
 0x72e   :  { %v1829_v19 = vmul.f32 %v1814_v34, %v4245_v6  ;;  %v1749_v56 = vmul.f32 %v1734_v33, %v4245_v6  ;;  %v1909_v38 = vmul.f32 %v1894_v10, %v4245_v6 }
 0x730   :  { %1928 = vrot.lane.b32.xlu1 %v1908_v29, %s3524_s28  ;;  %v4280_v29 = vld [vmem:[%s4696_s2] sm:$0xff] }
 0x731   :  { %1850 = vrot.lane.b32.xlu0 %v1829_v19, %s3522_s1  ;;  %v4283_v19 = vperm.slane %v4280_v29, 5 }
 0x735   :  { %v4251_v26 = vpop.f32.mrf.mxu1 }
 0x736   :  { %v1750_v50 = vmul.f32 %v1738_v35, %v4251_v26  ;;  %v1830_v31 = vmul.f32 %v1818_v8, %v4251_v26  ;;  %v1910_v3 = vmul.f32 %v1898_v37, %v4251_v26 }
 0x738   :  { %1770 = vrot.lane.b32.xlu1 %v1749_v56, %s3523_s27  ;;  %1772 = vrot.lane.b32.xlu2 %v1750_v50, %s3523_s27  ;;  %v1706_v56 = vmul.f32 %v4197_v13, %v4215_v63 }
 0x739   :  { %1852 = vrot.lane.b32.xlu0 %v1830_v31, %s3522_s1 }
 0x73d   :  { %v4259_v22 = vpop.f32.mrf.mxu1 }
 0x73e   :  { %v1751_v41 = vmul.f32 %v1742_v51, %v4259_v22  ;;  %v1831_v53 = vmul.f32 %v1822_v1, %v4259_v22  ;;  %v1911_v11 = vmul.f32 %v1902_v9, %v4259_v22 }
 0x740   :  { %1930 = vrot.lane.b32.xlu1 %v1909_v38, %s3524_s28  ;;  %1774 = vrot.lane.b32.xlu2 %v1751_v41, %s3523_s27 }
 0x741   :  { %1932 = vrot.lane.b32.xlu0 %v1910_v3, %s3524_s28 }
 0x748   :  { %1934 = vrot.lane.b32.xlu1 %v1911_v11, %s3524_s28  ;;  %1854 = vrot.lane.b32.xlu2 %v1831_v53, %s3522_s1 }
 0x761   :  { %v1761_v45 = vpop.permute.xlu2 %1760 }
 0x762   :  { %v1784_v57 = vadd.f32 %v1761_v45, %v1704_v44  ;;  %v1707_v44 = vmul.f32 %v4211_v27, %v4225_v55 }
 0x769   :  { %v1843_v36 = vpop.permute.xlu2 %1842 }
 0x771   :  { %v1845_v10 = vpop.permute.xlu2 %1844 }
 0x778   :  { %v1841_v61 = vpop.permute.xlu1 %1840  ;;  %v1921_v12 = vpop.permute.xlu0 %1920 }
 0x779   :  { %v1864_v34 = vadd.f32 %v1841_v61, %v1784_v57  ;;  %v1925_v38 = vpop.permute.xlu2 %1924 }
 0x77b   :  { %v1944_v35 = vadd.f32 %v1921_v12, %v1864_v34 }
 0x77d   :  { %v4286_v49 = vadd.f32 %v4283_v19, %v1944_v35 }
 0x77f   :  { %v1961_v31 = vmax.f32 %v4286_v49, 0.0 }
 0x780   :  { %v1763_v2 = vpop.permute.xlu1 %1762 }
 0x781   :  { %v1785_v33 = vadd.f32 %v1763_v2, %v1705_v18  ;;  %v1969_v1 = vsel %vm226_vm1, %v1961_v31, 0.0 }
 0x782   :  { %v1849_v34 = vpop.permute.xlu2 %1848 }
 0x783   :  { %v1865_v52 = vadd.f32 %v1843_v36, %v1785_v33 }
 0x788   :  { %v1923_v8 = vpop.permute.xlu1 %1922 }
 0x789   :  { %v1945_v7 = vadd.f32 %v1923_v8, %v1865_v52  ;;  %v1765_v4 = vpop.permute.xlu0 %1764 }
 0x78a   :  { %v1786_v50 = vadd.f32 %v1765_v4, %v1706_v56 }
 0x78b   :  { %v4292_v51 = vadd.f32 %v4283_v19, %v1945_v7 }
 0x78c   :  { %v1866_v37 = vadd.f32 %v1845_v10, %v1786_v50  ;;  %v1708_v10 = vmul.f32 %v4241_v40, %v4233_v42  ;;  %v1709_v40 = vmul.f32 %v4243_v59, %v4245_v6 }
 0x78d   :  { %v1962_v41 = vmax.f32 %v4292_v51, 0.0 }
 0x78e   :  { %v1946_v3 = vadd.f32 %v1925_v38, %v1866_v37 }
 0x78f   :  { %v1970_v13 = vsel %vm226_vm1, %v1962_v41, 0.0 }
 0x790   :  { %v1971_v63 = vadd.f32 %v1970_v13, %v1969_v1  ;;  %v4302_v9 = vadd.f32 %v4283_v19, %v1946_v3 }
 0x791   :  { %v1927_v53 = vpop.permute.xlu0 %1926 }
 0x792   :  { %v1963_v11 = vmax.f32 %v4302_v9, 0.0  ;;  %v1767_v45 = vpop.permute.xlu1 %1766  ;;  %v1773_v7 = vpop.permute.xlu2 %1772 }
 0x793   :  { %v1787_v57 = vadd.f32 %v1767_v45, %v1707_v44 }
 0x794   :  { %v1972_v61 = vsel %vm226_vm1, %v1963_v11, 0.0 }
 0x795   :  { %v1973_v36 = vadd.f32 %v1972_v61, %v1971_v63  ;;  %v1710_v61 = vmul.f32 %v1697_v58, %v4251_v26 }
 0x797   :  { %v1790_v44 = vadd.f32 %v1773_v7, %v1710_v61 }
 0x79a   :  { %v1847_v2 = vpop.permute.xlu1 %1846 }
 0x79b   :  { %v1867_v12 = vadd.f32 %v1847_v2, %v1787_v57  ;;  %v1769_v18 = vpop.permute.xlu0 %1768 }
 0x79c   :  { %v1788_v33 = vadd.f32 %v1769_v18, %v1708_v10  ;;  %v1711_v10 = vmul.f32 %v4271_v16, %v4259_v22 }
 0x79d   :  { %v1947_v35 = vadd.f32 %v1927_v53, %v1867_v12  ;;  %v1775_v53 = vpop.permute.xlu2 %1774 }
 0x79e   :  { %v1868_v56 = vadd.f32 %v1849_v34, %v1788_v33  ;;  %v1791_v6 = vadd.f32 %v1775_v53, %v1711_v10 }
 0x79f   :  { %v1956_v52 = vadd.f32 %v4283_v19, %v1947_v35 }
 0x7a1   :  { %v1964_v8 = vmax.f32 %v1956_v52, 0.0 }
 0x7a2   :  { %v1929_v4 = vpop.permute.xlu1 %1928 }
 0x7a3   :  { %v1974_v50 = vsel %vm226_vm1, %v1964_v8, 0.0  ;;  %v1948_v37 = vadd.f32 %v1929_v4, %v1868_v56  ;;  %v1851_v27 = vpop.permute.xlu0 %1850 }
 0x7a4   :  { %v1975_v55 = vadd.f32 %v1974_v50, %v1973_v36 }
 0x7a5   :  { %v1957_v38 = vadd.f32 %v4283_v19, %v1948_v37  ;;  %v1855_v33 = vpop.permute.xlu2 %1854 }
 0x7a6   :  { %v1871_v4 = vadd.f32 %v1855_v33, %v1791_v6 }
 0x7a7   :  { %v1965_v3 = vmax.f32 %v1957_v38, 0.0 }
 0x7a9   :  { %v1976_v1 = vsel %vm226_vm1, %v1965_v3, 0.0 }
 0x7aa   :  { %v1977_v13 = vadd.f32 %v1976_v1, %v1975_v55  ;;  %v1771_v42 = vpop.permute.xlu1 %1770 }
 0x7ab   :  { %v1853_v63 = vpop.permute.xlu0 %1852  ;;  %v1789_v45 = vadd.f32 %v1771_v42, %v1709_v40 }
 0x7ac   :  { %v1870_v34 = vadd.f32 %v1853_v63, %v1790_v44 }
 0x7ad   :  { %v1869_v57 = vadd.f32 %v1851_v27, %v1789_v45 }
 0x7b2   :  { %v1931_v2 = vpop.permute.xlu1 %1930 }
 0x7b3   :  { %v1949_v36 = vadd.f32 %v1931_v2, %v1869_v57  ;;  %v1933_v12 = vpop.permute.xlu0 %1932 }
 0x7b4   :  { %v1950_v18 = vadd.f32 %v1933_v12, %v1870_v34 }
 0x7b5   :  { %v1958_v35 = vadd.f32 %v4283_v19, %v1949_v36 }
 0x7b6   :  { %v1959_v59 = vadd.f32 %v4283_v19, %v1950_v18 }
 0x7b7   :  { %v1966_v52 = vmax.f32 %v1958_v35, 0.0 }
 0x7b8   :  { %v1967_v56 = vmax.f32 %v1959_v59, 0.0 }
 0x7b9   :  { %v1978_v26 = vsel %vm226_vm1, %v1966_v52, 0.0 }
 0x7ba   :  { %v1979_v58 = vadd.f32 %v1978_v26, %v1977_v13  ;;  %v1935_v7 = vpop.permute.xlu1 %1934  ;;  %v1980_v50 = vsel %vm226_vm1, %v1967_v56, 0.0 }
 0x7bb   :  { %v1951_v37 = vadd.f32 %v1935_v7, %v1871_v4 }
 0x7bc   :  { %v1981_v27 = vadd.f32 %v1980_v50, %v1979_v58 }
 0x7bd   :  { %v1960_v55 = vadd.f32 %v4283_v19, %v1951_v37 }
 0x7bf   :  { %v1968_v22 = vmax.f32 %v1960_v55, 0.0 }
 0x7c1   :  { %v1982_v16 = vsel %vm226_vm1, %v1968_v22, 0.0 }
 0x7c2   :  { %v1983_v38 = vadd.f32 %v1982_v16, %v1981_v27  ;;  %v2074_v16 = vld [vmem:[#allocation2 + $0x138] sm:$0xff] }
 0x7c3   :  { %2152 = vmatpush.msrb.mxu3 %v2074_v16 }
 0x7c4   :  { %v1984_v1 = vrot.slane %v1983_v38, 4 }
 0x7c6   :  { %v1985_v42 = vadd.f32 %v1984_v1, %v1983_v38  ;;  %v2073_v38 = vld [vmem:[#allocation2 + $0x130] sm:$0xff] }
 0x7c7   :  { %2111 = vmatpush.msrb.mxu2 %v2073_v38 }
 0x7c8   :  { %v1986_v40 = vrot.slane %v1985_v42, 2 }
 0x7ca   :  { %v1987_v63 = vadd.f32 %v1986_v40, %v1985_v42  ;;  %v2071_v42 = vld [vmem:[#allocation2 + $0x120] sm:$0xff]  ;;  %v2072_v40 = vld [vmem:[#allocation2 + $0x128] sm:$0xff] }
 0x7cb   :  { %2112 = vmatpush.msrb.mxu2 %v2071_v42  ;;  %2153 = vmatpush.msrb.mxu3 %v2072_v40 }
 0x7cc   :  { %v1988_v53 = vrot.slane %v1987_v63, 1 }
 0x7ce   :  { %v1989_v45 = vadd.f32 %v1988_v53, %v1987_v63  ;;  %v2069_v63 = vld [vmem:[#allocation2 + $0x110] sm:$0xff]  ;;  %v2070_v53 = vld [vmem:[#allocation2 + $0x118] sm:$0xff] }
 0x7cf   :  { %2113 = vmatpush.msrb.mxu2 %v2069_v63  ;;  %2154 = vmatpush.msrb.mxu3 %v2070_v53 }
 0x7d0   :  { %v1990_v61 = vmul.f32 %v1989_v45, %v3988_v54 }
 0x7d2   :  { %v4330_v13 = vsub.f32 %v1961_v31, %v1990_v61  ;;  %v4334_v44 = vsub.f32 %v1962_v41, %v1990_v61  ;;  %v4338_v19 = vsub.f32 %v1963_v11, %v1990_v61  ;;  %v4340_v57 = vsub.f32 %v1964_v8, %v1990_v61 }
 0x7d3   :  { %v4342_v34 = vsub.f32 %v1965_v3, %v1990_v61  ;;  %v4344_v2 = vsub.f32 %v1966_v52, %v1990_v61  ;;  %v4346_v36 = vsub.f32 %v1967_v56, %v1990_v61  ;;  %v1998_v12 = vsub.f32 %v1968_v22, %v1990_v61  ;;  %v2067_v61 = vld [vmem:[#allocation2 + $0x100] sm:$0xff] }
 0x7d4   :  { %v1999_v49 = vmul.f32 %v4330_v13, %v4330_v13  ;;  %v2000_v31 = vmul.f32 %v4334_v44, %v4334_v44  ;;  %v2001_v51 = vmul.f32 %v4338_v19, %v4338_v19  ;;  %v2002_v41 = vmul.f32 %v4340_v57, %v4340_v57  ;;  %2114 = vmatpush.msrb.mxu2 %v2067_v61 }
 0x7d5   :  { %v2003_v3 = vmul.f32 %v4342_v34, %v4342_v34  ;;  %v2004_v35 = vmul.f32 %v4344_v2, %v4344_v2  ;;  %v2005_v6 = vmul.f32 %v4346_v36, %v4346_v36  ;;  %v2006_v4 = vmul.f32 %v1998_v12, %v1998_v12 }
 0x7d6   :  { %v2007_v9 = vsel %vm226_vm1, %v1999_v49, 0.0  ;;  %v2008_v11 = vsel %vm226_vm1, %v2000_v31, 0.0  ;;  %v2010_v18 = vsel %vm226_vm1, %v2001_v51, 0.0  ;;  %v2012_v33 = vsel %vm226_vm1, %v2002_v41, 0.0  ;;  %v2068_v49 = vld [vmem:[#allocation2 + $0x108] sm:$0xff] }
 0x7d7   :  { %v2009_v8 = vadd.f32 %v2008_v11, %v2007_v9  ;;  %v2014_v52 = vsel %vm226_vm1, %v2003_v3, 0.0  ;;  %v2016_v26 = vsel %vm226_vm1, %v2004_v35, 0.0  ;;  %v2018_v7 = vsel %vm226_vm1, %v2005_v6, 0.0  ;;  %2155 = vmatpush.msrb.mxu3 %v2068_v49 }
 0x7d8   :  { %v2020_v37 = vsel %vm226_vm1, %v2006_v4, 0.0 }
 0x7d9   :  { %v2011_v10 = vadd.f32 %v2010_v18, %v2009_v8 }
 0x7db   :  { %v2013_v59 = vadd.f32 %v2012_v33, %v2011_v10  ;;  %v3458_v33 = vld [vmem:[%s4696_s2 + $0x8] sm:$0xff] }
 0x7dd   :  { %v2015_v56 = vadd.f32 %v2014_v52, %v2013_v59  ;;  %v2048_v59 = vperm.slane %v3458_v33, 2  ;;  %v2057_v52 = vperm.slane %v3458_v33, 3 }
 0x7df   :  { %v2017_v58 = vadd.f32 %v2016_v26, %v2015_v56 }
 0x7e1   :  { %v2019_v50 = vadd.f32 %v2018_v7, %v2017_v58 }
 0x7e3   :  { %v2021_v27 = vadd.f32 %v2020_v37, %v2019_v50 }
 0x7e5   :  { %v2022_v55 = vrot.slane %v2021_v27, 4 }
 0x7e7   :  { %v2023_v22 = vadd.f32 %v2022_v55, %v2021_v27 }
 0x7e9   :  { %v2024_v1 = vrot.slane %v2023_v22, 2 }
 0x7eb   :  { %v2025_v45 = vadd.f32 %v2024_v1, %v2023_v22 }
 0x7ed   :  { %v2026_v31 = vrot.slane %v2025_v45, 1 }
 0x7ef   :  { %v2027_v51 = vadd.f32 %v2026_v31, %v2025_v45 }
 0x7f1   :  { %v2028_v41 = vmul.f32 %v2027_v51, %v3988_v54 }
 0x7f3   :  { %v2029_v9 = vadd.f32 1e-05, %v2028_v41  ;;  %v2181_v41 = vperm.slane %v4280_v29, 6 }
 0x7f5   :  { %3406 = vrsqrt.f32 %v2029_v9  ;;  %vm2036_vm13 = vweird.f32 %v2029_v9 }
 0x7fb   :  { %v3407_v11 = vpop.eup %3406 }
 0x7fc   :  { %v2031_v8 = vmul.f32 %v3407_v11, %v2029_v9  ;;  %vm2037_vm12 = vweird.f32 %v3407_v11 }
 0x7fd   :  { %vm2038_vm14 = vmor %vm2036_vm13, %vm2037_vm12 }
 0x7fe   :  { %v2032_v3 = vmul.f32 %v3407_v11, %v2031_v8 }
 0x800   :  { %v2033_v18 = vmul.f32 0.5, %v2032_v3 }
 0x802   :  { %v2034_v10 = vsub.f32 1.5, %v2033_v18 }
 0x804   :  { %v2035_v35 = vmul.f32 %v3407_v11, %v2034_v10 }
 0x806   :  { %v2039_v6 = vsel %vm2038_vm14, %v3407_v11, %v2035_v35 }
 0x807   :  { %v2047_v56 = vmul.f32 %v2039_v6, %v1998_v12  ;;  %v2040_v54 = vmul.f32 %v2039_v6, %v4330_v13  ;;  %v2041_v4 = vmul.f32 %v2039_v6, %v4334_v44  ;;  %v2042_v26 = vmul.f32 %v2039_v6, %v4338_v19 }
 0x808   :  { %v2043_v58 = vmul.f32 %v2039_v6, %v4340_v57  ;;  %v2044_v7 = vmul.f32 %v2039_v6, %v4342_v34  ;;  %v2045_v50 = vmul.f32 %v2039_v6, %v4344_v2  ;;  %v2046_v37 = vmul.f32 %v2039_v6, %v4346_v36 }
 0x809   :  { %v2049_v27 = vmul.f32 %v2048_v59, %v2040_v54  ;;  %v2050_v12 = vmul.f32 %v2048_v59, %v2041_v4  ;;  %v2051_v44 = vmul.f32 %v2048_v59, %v2042_v26  ;;  %v2056_v42 = vmul.f32 %v2048_v59, %v2047_v56 }
 0x80a   :  { %v2052_v57 = vmul.f32 %v2048_v59, %v2043_v58  ;;  %v2053_v2 = vmul.f32 %v2048_v59, %v2044_v7  ;;  %v2054_v22 = vmul.f32 %v2048_v59, %v2045_v50  ;;  %v2055_v38 = vmul.f32 %v2048_v59, %v2046_v37 }
 0x80b   :  { %v2058_v55 = vadd.f32 %v2057_v52, %v2049_v27  ;;  %v2059_v13 = vadd.f32 %v2057_v52, %v2050_v12  ;;  %v2060_v19 = vadd.f32 %v2057_v52, %v2051_v44  ;;  %v2065_v40 = vadd.f32 %v2057_v52, %v2056_v42 }
 0x80c   :  { %v2061_v34 = vadd.f32 %v2057_v52, %v2052_v57  ;;  %v2062_v36 = vadd.f32 %v2057_v52, %v2053_v2  ;;  %v2063_v16 = vadd.f32 %v2057_v52, %v2054_v22  ;;  %v2064_v1 = vadd.f32 %v2057_v52, %v2055_v38 }
 0x80d   :  { %3122 = vmatmul.msk.f32.vlgmr.msrb.gmra.mxu2 %vm226_vm1, %v2058_v55  ;;  %3130 = vmatmul.msk.f32.vlgmr.msrb.gmra.mxu3 %vm226_vm1, %v2058_v55 }
 0x815   :  { %3123 = vmatmul.msk.f32.gmra.mxu2 %vm226_vm1, %v2059_v13  ;;  %3131 = vmatmul.msk.f32.gmra.mxu3 %vm226_vm1, %v2059_v13 }
 0x81d   :  { %3124 = vmatmul.msk.f32.gmra.mxu2 %vm226_vm1, %v2060_v19  ;;  %3132 = vmatmul.msk.f32.gmra.mxu3 %vm226_vm1, %v2060_v19 }
 0x825   :  { %3125 = vmatmul.msk.f32.gmra.mxu2 %vm226_vm1, %v2061_v34  ;;  %3133 = vmatmul.msk.f32.gmra.mxu3 %vm226_vm1, %v2061_v34 }
 0x82d   :  { %3126 = vmatmul.msk.f32.gmra.mxu2 %vm226_vm1, %v2062_v36  ;;  %3134 = vmatmul.msk.f32.gmra.mxu3 %vm226_vm1, %v2062_v36 }
 0x835   :  { %3127 = vmatmul.msk.f32.gmra.mxu2 %vm226_vm1, %v2063_v16  ;;  %3135 = vmatmul.msk.f32.gmra.mxu3 %vm226_vm1, %v2063_v16 }
 0x83d   :  { %3128 = vmatmul.msk.f32.gmra.mxu2 %vm226_vm1, %v2064_v1  ;;  %3136 = vmatmul.msk.f32.gmra.mxu3 %vm226_vm1, %v2064_v1 }
 0x845   :  { %3129 = vmatmul.msk.f32.gmra.mxu2 %vm226_vm1, %v2065_v40  ;;  %3137 = vmatmul.msk.f32.gmra.mxu3 %vm226_vm1, %v2065_v40 }
 0x890   :  { %v2157_v63 = vpop.f32.mrf.mxu3 }
 0x891   :  { %v2238_v53 = vsel %vm416_vm3, %v2157_v63, inf  ;;  %v2182_v11 = vadd.f32 %v2181_v41, %v2157_v63 }
 0x892   :  { %2239 = vmin.xlane.f32.xlu2 %v2238_v53 }
 0x893   :  { %v2190_v3 = vsel %vm416_vm3, %v2182_v11, -inf }
 0x898   :  { %v2160_v45 = vpop.f32.mrf.mxu3 }
 0x899   :  { %v2241_v61 = vsel %vm416_vm3, %v2160_v45, inf  ;;  %v4432_v7 = vadd.f32 %v2181_v41, %v2160_v45 }
 0x89a   :  { %2242 = vmin.xlane.f32.xlu0 %v2241_v61 }
 0x89b   :  { %v2193_v27 = vsel %vm416_vm3, %v4432_v7, -inf }
 0x8a0   :  { %v2163_v49 = vpop.f32.mrf.mxu3 }
 0x8a1   :  { %v2244_v31 = vsel %vm416_vm3, %v2163_v49, inf  ;;  %v4426_v4 = vadd.f32 %v2181_v41, %v2163_v49 }
 0x8a2   :  { %2245 = vmin.xlane.f32.xlu1 %v2244_v31 }
 0x8a3   :  { %v2196_v26 = vsel %vm416_vm3, %v4426_v4, -inf }
 0x8a8   :  { %v2166_v51 = vpop.f32.mrf.mxu3 }
 0x8a9   :  { %v2247_v9 = vsel %vm416_vm3, %v2166_v51, inf  ;;  %v4405_v18 = vadd.f32 %v2181_v41, %v2166_v51 }
 0x8aa   :  { %2248 = vmin.xlane.f32.xlu1 %v2247_v9 }
 0x8ab   :  { %v2199_v35 = vsel %vm416_vm3, %v4405_v18, -inf }
 0x8b0   :  { %v4402_v8 = vpop.f32.mrf.mxu3 }
 0x8b1   :  { %v2250_v56 = vsel %vm416_vm3, %v4402_v8, inf  ;;  %v4442_v55 = vadd.f32 %v2181_v41, %v4402_v8 }
 0x8b2   :  { %2191 = vmax.xlane.f32.xlu1 %v2190_v3 }
 0x8b3   :  { %v2202_v12 = vsel %vm416_vm3, %v4442_v55, -inf }
 0x8b8   :  { %v4407_v10 = vpop.f32.mrf.mxu3 }
 0x8b9   :  { %v2253_v58 = vsel %vm416_vm3, %v4407_v10, inf  ;;  %v4435_v50 = vadd.f32 %v2181_v41, %v4407_v10 }
 0x8ba   :  { %2200 = vmax.xlane.f32.xlu1 %v2199_v35 }
 0x8bb   :  { %v2205_v37 = vsel %vm416_vm3, %v4435_v50, -inf }
 0x8c0   :  { %v4411_v33 = vpop.f32.mrf.mxu3 }
 0x8c1   :  { %v4414_v29 = vadd.f32 %v2181_v41, %v4411_v33  ;;  %v2256_v59 = vsel %vm416_vm3, %v4411_v33, inf }
 0x8c2   :  { %2257 = vmin.xlane.f32.xlu0 %v2256_v59 }
 0x8c3   :  { %v2208_v6 = vsel %vm416_vm3, %v4414_v29, -inf }
 0x8c4   :  { %2209 = vmax.xlane.f32.xlu1 %v2208_v6 }
 0x8c8   :  { %v4420_v52 = vpop.f32.mrf.mxu3 }
 0x8c9   :  { %v2259_v54 = vsel %vm416_vm3, %v4420_v52, inf  ;;  %v4447_v13 = vadd.f32 %v2181_v41, %v4420_v52 }
 0x8ca   :  { %2251 = vmin.xlane.f32.xlu0 %v2250_v56  ;;  %2260 = vmin.xlane.f32.xlu2 %v2259_v54 }
 0x8cb   :  { %v2211_v44 = vsel %vm416_vm3, %v4447_v13, -inf }
 0x8d2   :  { %2197 = vmax.xlane.f32.xlu0 %v2196_v26  ;;  %2254 = vmin.xlane.f32.xlu2 %v2253_v58 }
 0x8da   :  { %2206 = vmax.xlane.f32.xlu0 %v2205_v37  ;;  %2194 = vmax.xlane.f32.xlu2 %v2193_v27 }
 0x8e2   :  { %2203 = vmax.xlane.f32.xlu2 %v2202_v12 }
 0x8ea   :  { %2212 = vmax.xlane.f32.xlu2 %v2211_v44 }
 0x905   :  { %v2240_v19 = vpop.xlane.xlu2 %2239 }
 0x906   :  { %v2262_v57 = vsub.f32 %v2240_v19, %v2157_v63 }
 0x908   :  { %v2270_v34 = vmul.f32 1.442695, %v2262_v57 }
 0x90a   :  { %3408 = vpow2.f32 %v2270_v34 }
 0x90d   :  { %v2243_v2 = vpop.xlane.xlu0 %2242 }
 0x90e   :  { %v2263_v36 = vsub.f32 %v2243_v2, %v2160_v45 }
 0x910   :  { %v4451_v22 = vpop.eup %3408  ;;  %v2272_v16 = vmul.f32 1.442695, %v2263_v36 }
 0x911   :  { %3155 = vmatmul.msk.f32.vlgmr.msra.gmra.mxu1 %vm416_vm3, %v4451_v22 }
 0x912   :  { %3410 = vpow2.f32 %v2272_v16 }
 0x915   :  { %v2246_v38 = vpop.xlane.xlu1 %2245 }
 0x916   :  { %v2264_v1 = vsub.f32 %v2246_v38, %v2163_v49 }
 0x918   :  { %v4455_v42 = vpop.eup %3410  ;;  %v2274_v40 = vmul.f32 1.442695, %v2264_v1 }
 0x919   :  { %3156 = vmatmul.msk.f32.gmra.mxu1 %vm416_vm3, %v4455_v42 }
 0x91a   :  { %3412 = vpow2.f32 %v2274_v40 }
 0x91d   :  { %v2249_v63 = vpop.xlane.xlu1 %2248 }
 0x91e   :  { %v2265_v53 = vsub.f32 %v2249_v63, %v2166_v51 }
 0x920   :  { %v4459_v61 = vpop.eup %3412  ;;  %v2276_v45 = vmul.f32 1.442695, %v2265_v53 }
 0x921   :  { %3157 = vmatmul.msk.f32.gmra.mxu1 %vm416_vm3, %v4459_v61 }
 0x922   :  { %3414 = vpow2.f32 %v2276_v45 }
 0x925   :  { %v2192_v31 = vpop.xlane.xlu1 %2191 }
 0x926   :  { %v2214_v41 = vsub.f32 %v2182_v11, %v2192_v31 }
 0x928   :  { %v3415_v9 = vpop.eup %3414  ;;  %v2222_v49 = vmul.f32 1.442695, %v2214_v41 }
 0x929   :  { %3158 = vmatmul.msk.f32.gmra.mxu1 %vm416_vm3, %v3415_v9 }
 0x92a   :  { %3416 = vpow2.f32 %v2222_v49 }
 0x930   :  { %v4464_v3 = vpop.eup %3416 }
 0x931   :  { %v2513_v35 = vmul.f32 %v4464_v3, %v3754_v0 }
 0x933   :  { %2570 = vperm.xlu0 %3262, %v2513_v35   ;;  %2650 = vperm.xlu1 %3263, %v2513_v35  }
 0x934   :  { %2730 = vperm.xlu2 %3264, %v2513_v35  }
 0x935   :  { %v2258_v51 = vpop.xlane.xlu0 %2257 }
 0x936   :  { %v2268_v54 = vsub.f32 %v2258_v51, %v4411_v33 }
 0x938   :  { %v2282_v58 = vmul.f32 1.442695, %v2268_v54 }
 0x93b   :  { %3265 = vset.pattern.permute.xlu1 %v3517_v23  ;;  %3271 = vset.pattern.permute.xlu0 %v3521_v17 }
 0x93c   :  { %2523 = vperm.xlu1 %3265, %v2513_v35   ;;  %3267 = vset.pattern.permute.xlu2 %v3521_v17 }
 0x93d   :  { %v2252_v11 = vpop.xlane.xlu0 %2251  ;;  %v2261_v59 = vpop.xlane.xlu2 %2260 }
 0x93e   :  { %v2266_v6 = vsub.f32 %v2252_v11, %v4402_v8  ;;  %v2269_v56 = vsub.f32 %v2261_v59, %v4420_v52 }
 0x940   :  { %v2278_v0 = vmul.f32 1.442695, %v2266_v6  ;;  %v2284_v26 = vmul.f32 1.442695, %v2269_v56 }
 0x942   :  { %3418 = vpow2.f32 %v2278_v0 }
 0x943   :  { %3420 = vpow2.f32 %v2284_v26 }
 0x944   :  { %3266 = vset.pattern.permute.xlu1 %v3520_v24  ;;  %3422 = vpow2.f32 %v2282_v58 }
 0x945   :  { %v2198_v37 = vpop.xlane.xlu0 %2197  ;;  %v2255_v27 = vpop.xlane.xlu2 %2254 }
 0x946   :  { %v2216_v12 = vsub.f32 %v4426_v4, %v2198_v37  ;;  %v2267_v44 = vsub.f32 %v2255_v27, %v4407_v10 }
 0x948   :  { %v3419_v19 = vpop.eup %3418  ;;  %v2226_v8 = vmul.f32 1.442695, %v2216_v12  ;;  %v2280_v57 = vmul.f32 1.442695, %v2267_v44 }
 0x949   :  { %v3421_v52 = vpop.eup %3420  ;;  %3159 = vmatmul.msk.f32.gmra.mxu1 %vm416_vm3, %v3419_v19 }
 0x94a   :  { %3424 = vpow2.f32 %v2226_v8  ;;  %3138 = vmatpush.xpose.msk.msrb.mxu0 %vm416_vm3, %v3421_v52  ;;  %v3423_v33 = vpop.eup %3422 }
 0x94b   :  { %3426 = vpow2.f32 %v2280_v57 }
 0x94d   :  { %v2195_v34 = vpop.xlane.xlu2 %2194  ;;  %v2207_v1 = vpop.xlane.xlu0 %2206 }
 0x94e   :  { %3139 = vmatpush.xpose.msk.msrb.mxu0 %vm416_vm3, %v3423_v33  ;;  %v2215_v2 = vsub.f32 %v4432_v7, %v2195_v34  ;;  %v2201_v7 = vpop.xlane.xlu1 %2200  ;;  %v2219_v45 = vsub.f32 %v4435_v50, %v2207_v1 }
 0x950   :  { %v4481_v4 = vpop.eup %3424  ;;  %v2224_v10 = vmul.f32 1.442695, %v2215_v2  ;;  %v2232_v31 = vmul.f32 1.442695, %v2219_v45 }
 0x951   :  { %v3427_v36 = vpop.eup %3426  ;;  %v2515_v16 = vmul.f32 %v4481_v4, %v3769_v21 }
 0x952   :  { %3140 = vmatpush.xpose.msk.msrb.mxu0 %vm416_vm3, %v3427_v36  ;;  %3160 = vmatmul.msk.f32.gmra.mxu1 %vm416_vm3, %v3427_v36  ;;  %3428 = vpow2.f32 %v2224_v10 }
 0x953   :  { %2658 = vperm.xlu0 %3271, %v2515_v16  }
 0x955   :  { %v2204_v38 = vpop.xlane.xlu2 %2203 }
 0x956   :  { %3141 = vmatpush.xpose.msk.msrb.mxu0 %vm416_vm3, %v3419_v19  ;;  %v2218_v40 = vsub.f32 %v4442_v55, %v2204_v38  ;;  %v2210_v55 = vpop.xlane.xlu1 %2209 }
 0x958   :  { %v2230_v63 = vmul.f32 1.442695, %v2218_v40  ;;  %v3429_v53 = vpop.eup %3428 }
 0x959   :  { %v2514_v21 = vmul.f32 %v3429_v53, %v3759_v5  ;;  %v2217_v5 = vsub.f32 %v4405_v18, %v2201_v7 }
 0x95a   :  { %3430 = vpow2.f32 %v2230_v63  ;;  %3142 = vmatpush.xpose.msk.msrb.mxu0 %vm416_vm3, %v3415_v9  ;;  %3161 = vmatmul.msk.f32.gmra.mxu1 %vm416_vm3, %v3423_v33  ;;  %v2220_v9 = vsub.f32 %v4414_v29, %v2210_v55 }
 0x95b   :  { %3277 = vset.pattern.permute.xlu0 %v3520_v24  ;;  %2574 = vperm.xlu1 %3266, %v2514_v21   ;;  %3432 = vpow2.f32 %v2232_v31  ;;  %v2228_v29 = vmul.f32 1.442695, %v2217_v5 }
 0x95c   :  { %2654 = vperm.xlu2 %3267, %v2514_v21  }
 0x95d   :  { %v2213_v49 = vpop.xlane.xlu2 %2212 }
 0x95e   :  { %3143 = vmatpush.xpose.msk.msrb.mxu0 %vm416_vm3, %v4459_v61  ;;  %v2234_v61 = vmul.f32 1.442695, %v2220_v9 }
 0x960   :  { %v3431_v41 = vpop.eup %3430  ;;  %3434 = vpow2.f32 %v2234_v61 }
 0x961   :  { %v4497_v50 = vmul.f32 %v3431_v41, %v3799_v39  ;;  %v3433_v39 = vpop.eup %3432  ;;  %3436 = vpow2.f32 %v2228_v29 }
 0x962   :  { %3144 = vmatpush.xpose.msk.msrb.mxu0 %vm416_vm3, %v4455_v42  ;;  %3162 = vmatmul.msk.f32.gmra.mxu1 %vm416_vm3, %v3421_v52  ;;  %v4512_v18 = vmul.f32 %v3433_v39, %v3797_v30  ;;  %v2221_v42 = vsub.f32 %v4447_v13, %v2213_v49 }
 0x963   :  { %2586 = vperm.xlu0 %3277, %v4497_v50   ;;  %3268 = vset.pattern.permute.xlu1 %v3519_v15 }
 0x964   :  { %3269 = vset.pattern.permute.xlu2 %v3517_v23  ;;  %2734 = vperm.xlu1 %3268, %v2514_v21  }
 0x965   :  { %2528 = vperm.xlu2 %3269, %v2514_v21  }
 0x966   :  { %3145 = vmatpush.xpose.msk.msrb.mxu0 %vm416_vm3, %v4451_v22  ;;  %v2236_v22 = vmul.f32 1.442695, %v2221_v42  ;;  %v3435_v35 = vpop.eup %3434 }
 0x967   :  { %v3437_v51 = vpop.eup %3436  ;;  %v4520_v30 = vmul.f32 %v3435_v35, %v3815_v48 }
 0x968   :  { %3438 = vpow2.f32 %v2236_v22  ;;  %v2516_v13 = vmul.f32 %v3437_v51, %v3786_v32  ;;  %v2116_v32 = vpop.f32.mrf.mxu2 }
 0x969   :  { %3146 = vmatmul.msk.f32.vlgmr.msrb.gmra.mxu0 %vm416_vm3, %v4464_v3 }
 0x96b   :  { %3280 = vset.pattern.permute.xlu0 %v3519_v15 }
 0x96c   :  { %2750 = vperm.xlu0 %3280, %v4512_v18   ;;  %2738 = vperm.xlu1 %3268, %v2515_v16  }
 0x96d   :  { %3270 = vset.pattern.permute.xlu2 %v3520_v24 }
 0x96e   :  { %2578 = vperm.xlu2 %3270, %v2515_v16   ;;  %v3439_v3 = vpop.eup %3438 }
 0x96f   :  { %v4530_v11 = vmul.f32 %v3439_v3, %v3809_v46 }
 0x970   :  { %v2119_v59 = vpop.f32.mrf.mxu2 }
 0x971   :  { %3147 = vmatmul.msk.f32.gmra.mxu0 %vm416_vm3, %v3429_v53 }
 0x974   :  { %3282 = vset.pattern.permute.xlu0 %v3521_v17  ;;  %3274 = vset.pattern.permute.xlu1 %v3521_v17 }
 0x975   :  { %2674 = vperm.xlu0 %3282, %v4520_v30   ;;  %2662 = vperm.xlu1 %3274, %v2516_v13  }
 0x976   :  { %3272 = vset.pattern.permute.xlu2 %v3517_v23 }
 0x977   :  { %2533 = vperm.xlu2 %3272, %v2515_v16  }
 0x978   :  { %v2122_v56 = vpop.f32.mrf.mxu2 }
 0x979   :  { %3148 = vmatmul.msk.f32.gmra.mxu0 %vm416_vm3, %v4481_v4 }
 0x97d   :  { %3284 = vset.pattern.permute.xlu0 %v3520_v24  ;;  %3276 = vset.pattern.permute.xlu1 %v3517_v23 }
 0x97e   :  { %2598 = vperm.xlu0 %3284, %v4530_v11   ;;  %2538 = vperm.xlu1 %3276, %v2516_v13  }
 0x97f   :  { %3273 = vset.pattern.permute.xlu2 %v3520_v24 }
 0x980   :  { %2582 = vperm.xlu2 %3273, %v2516_v13  }
 0x981   :  { %3149 = vmatmul.msk.f32.gmra.mxu0 %vm416_vm3, %v3437_v51 }
 0x986   :  { %3288 = vset.pattern.permute.xlu0 %v3517_v23  ;;  %3278 = vset.pattern.permute.xlu1 %v3521_v17 }
 0x987   :  { %2666 = vperm.xlu1 %3278, %v4497_v50  }
 0x988   :  { %3275 = vset.pattern.permute.xlu2 %v3519_v15 }
 0x989   :  { %3150 = vmatmul.msk.f32.gmra.mxu0 %vm416_vm3, %v3431_v41  ;;  %2742 = vperm.xlu2 %3275, %v2516_v13  }
 0x98e   :  { %v2436_v46 = vpop.f32.mrf.mxu1 }
 0x98f   :  { %v2460_v48 = vmul.f32 %v2436_v46, %v2116_v32  ;;  %2670 = vperm.xlu1 %3278, %v4512_v18  }
 0x991   :  { %3151 = vmatmul.msk.f32.gmra.mxu0 %vm416_vm3, %v3433_v39  ;;  %2746 = vperm.xlu2 %3275, %v4497_v50  }
 0x996   :  { %v2439_v6 = vpop.f32.mrf.mxu1 }
 0x997   :  { %3281 = vset.pattern.permute.xlu1 %v3520_v24 }
 0x998   :  { %2594 = vperm.xlu1 %3281, %v4520_v30  }
 0x999   :  { %3152 = vmatmul.msk.f32.gmra.mxu0 %vm416_vm3, %v3435_v35  ;;  %3279 = vset.pattern.permute.xlu2 %v3520_v24  ;;  %v2125_v24 = vpop.f32.mrf.mxu2 }
 0x99a   :  { %2590 = vperm.xlu2 %3279, %v4512_v18  }
 0x99e   :  { %v2442_v54 = vpop.f32.mrf.mxu1 }
 0x99f   :  { %v2462_v16 = vmul.f32 %v2442_v54, %v2122_v56 }
 0x9a1   :  { %3153 = vmatmul.msk.f32.gmra.mxu0 %vm416_vm3, %v3439_v3  ;;  %v2128_v26 = vpop.f32.mrf.mxu2 }
 0x9a2   :  { %3283 = vset.pattern.permute.xlu2 %v3519_v15 }
 0x9a3   :  { %2754 = vperm.xlu2 %3283, %v4520_v30  }
 0x9a6   :  { %v2445_v0 = vpop.f32.mrf.mxu1 }
 0x9a7   :  { %v2463_v2 = vmul.f32 %v2445_v0, %v2125_v24 }
 0x9a9   :  { %v2131_v37 = vpop.f32.mrf.mxu2  ;;  %v2469_v38 = vpack.c.bf16 %v2463_v2, %v2462_v16 }
 0x9ab   :  { %3285 = vset.pattern.permute.xlu2 %v3521_v17 }
 0x9ac   :  { %2678 = vperm.xlu2 %3285, %v4530_v11  }
 0x9b1   :  { %v2134_v12 = vpop.f32.mrf.mxu2 }
 0x9b4   :  { %3286 = vset.pattern.permute.xlu2 %v3519_v15 }
 0x9b5   :  { %2758 = vperm.xlu2 %3286, %v4530_v11  }
 0x9b9   :  { %v2137_v19 = vpop.f32.mrf.mxu2 }
 0x9bd   :  { %3287 = vset.pattern.permute.xlu2 %v3517_v23  ;;  %v2461_v23 = vmul.f32 %v2439_v6, %v2119_v59 }
 0x9bf   :  { %v2468_v1 = vpack.c.bf16 %v2461_v23, %v2460_v48 }
 0x9c6   :  { %v2448_v58 = vpop.f32.mrf.mxu1 }
 0x9c7   :  { %v2464_v34 = vmul.f32 %v2448_v58, %v2128_v26 }
 0x9cf   :  { %v2451_v27 = vpop.f32.mrf.mxu1 }
 0x9d0   :  { %v2465_v52 = vmul.f32 %v2451_v27, %v2131_v37 }
 0x9d2   :  { %v2470_v4 = vpack.c.bf16 %v2465_v52, %v2464_v34 }
 0x9d7   :  { %v2454_v44 = vpop.f32.mrf.mxu1 }
 0x9d8   :  { %v2466_v8 = vmul.f32 %v2454_v44, %v2134_v12 }
 0x9df   :  { %v2457_v17 = vpop.f32.mrf.mxu1 }
 0x9e0   :  { %v2467_v57 = vmul.f32 %v2457_v17, %v2137_v19 }
 0x9e2   :  { %v2471_v33 = vpack.c.bf16 %v2467_v57, %v2466_v8 }
 0x9e4   :  { %2488 = vmatpush.bf16.msra.mxu2 %v2471_v33 }
 0x9e6   :  { %v2351_v10 = vpop.f32.mrf.mxu0 }
 0x9e7   :  { %v2375_v36 = vmax.f32 %v2351_v10, 1e-20 }
 0x9e8   :  { %2489 = vmatpush.bf16.msra.mxu2 %v2470_v4 }
 0x9e9   :  { %3440 = vrcp.f32 %v2375_v36 }
 0x9ec   :  { %2490 = vmatpush.bf16.msra.mxu2 %v2469_v38 }
 0x9ee   :  { %v2354_v40 = vpop.f32.mrf.mxu0 }
 0x9ef   :  { %v2376_v7 = vmax.f32 %v2354_v40, 1e-20  ;;  %v3441_v63 = vpop.eup %3440 }
 0x9f0   :  { %2491 = vmatpush.bf16.msra.mxu2 %v2468_v1  ;;  %v2391_v53 = vpack.c.bf16 %v3441_v63, %v3441_v63 }
 0x9f1   :  { %3442 = vrcp.f32 %v2376_v7 }
 0x9f2   :  { %v2399_v55 = vunpack.c.l.bf16 %v2391_v53  ;;  %v2571_v53 = vpop.permute.xlu0 %2570 }
 0x9f4   :  { %v2407_v5 = vmul.f32 %v2399_v55, %v3836_v14 }
 0x9f6   :  { %v2357_v45 = vpop.f32.mrf.mxu0 }
 0x9f7   :  { %v3443_v21 = vpop.eup %3442  ;;  %v2377_v31 = vmax.f32 %v2357_v45, 1e-20 }
 0x9f8   :  { %v2392_v41 = vpack.c.bf16 %v3443_v21, %v3443_v21 }
 0x9f9   :  { %3444 = vrcp.f32 %v2377_v31 }
 0x9fa   :  { %v2400_v9 = vunpack.c.l.bf16 %v2392_v41 }
 0x9fc   :  { %v2408_v61 = vmul.f32 %v2400_v9, %v3838_v28 }
 0x9fe   :  { %v2415_v39 = vpack.c.bf16 %v2408_v61, %v2407_v5  ;;  %v2360_v29 = vpop.f32.mrf.mxu0 }
 0x9ff   :  { %v2378_v49 = vmax.f32 %v2360_v29, 1e-20  ;;  %v3445_v42 = vpop.eup %3444 }
 0xa00   :  { %3163 = vmatmul.msk.bf16.vlgmr.msra.gmra.mxu2 %vm66_vm2, %v2415_v39  ;;  %v2393_v22 = vpack.c.bf16 %v3445_v42, %v3445_v42 }
 0xa01   :  { %3446 = vrcp.f32 %v2378_v49 }
 0xa02   :  { %v2401_v3 = vunpack.c.l.bf16 %v2393_v22  ;;  %v2659_v22 = vpop.permute.xlu0 %2658 }
 0xa04   :  { %v2409_v48 = vmul.f32 %v2401_v3, %v3848_v43 }
 0xa06   :  { %v2363_v35 = vpop.f32.mrf.mxu0 }
 0xa07   :  { %v3447_v51 = vpop.eup %3446  ;;  %v2379_v13 = vmax.f32 %v2363_v35, 1e-20 }
 0xa08   :  { %v2394_v32 = vpack.c.bf16 %v3447_v51, %v3447_v51 }
 0xa09   :  { %3448 = vrcp.f32 %v2379_v13 }
 0xa0a   :  { %v2402_v46 = vunpack.c.l.bf16 %v2394_v32 }
 0xa0c   :  { %v2410_v14 = vmul.f32 %v2402_v46, %v3850_v47 }
 0xa0e   :  { %v2416_v28 = vpack.c.bf16 %v2410_v14, %v2409_v48  ;;  %v2366_v59 = vpop.f32.mrf.mxu0 }
 0xa0f   :  { %v2380_v6 = vmax.f32 %v2366_v59, 1e-20  ;;  %v3449_v56 = vpop.eup %3448 }
 0xa10   :  { %3164 = vmatmul.msk.bf16.gmra.mxu2 %vm66_vm2, %v2416_v28  ;;  %v2395_v54 = vpack.c.bf16 %v3449_v56, %v3449_v56 }
 0xa11   :  { %3450 = vrcp.f32 %v2380_v6 }
 0xa12   :  { %v2403_v58 = vunpack.c.l.bf16 %v2395_v54 }
 0xa14   :  { %v2411_v12 = vmul.f32 %v2403_v58, %v3858_v60  ;;  %v2731_v60 = vpop.permute.xlu2 %2730 }
 0xa16   :  { %v2369_v24 = vpop.f32.mrf.mxu0 }
 0xa17   :  { %v3451_v0 = vpop.eup %3450  ;;  %v2381_v26 = vmax.f32 %v2369_v24, 1e-20 }
 0xa18   :  { %v2396_v37 = vpack.c.bf16 %v3451_v0, %v3451_v0 }
 0xa19   :  { %3452 = vrcp.f32 %v2381_v26 }
 0xa1a   :  { %v2404_v27 = vunpack.c.l.bf16 %v2396_v37 }
 0xa1c   :  { %v2412_v43 = vmul.f32 %v2404_v27, %v3860_v62  ;;  %v2651_v62 = vpop.permute.xlu1 %2650  ;;  %v2655_v36 = vpop.permute.xlu2 %2654 }
 0xa1e   :  { %v2417_v47 = vpack.c.bf16 %v2412_v43, %v2411_v12  ;;  %v2372_v44 = vpop.f32.mrf.mxu0 }
 0xa1f   :  { %v2382_v19 = vmax.f32 %v2372_v44, 1e-20  ;;  %v3453_v17 = vpop.eup %3452 }
 0xa20   :  { %3165 = vmatmul.msk.bf16.gmra.mxu2 %vm66_vm2, %v2417_v47  ;;  %v2397_v8 = vpack.c.bf16 %v3453_v17, %v3453_v17 }
 0xa21   :  { %3454 = vrcp.f32 %v2382_v19 }
 0xa22   :  { %v2405_v52 = vunpack.c.l.bf16 %v2397_v8 }
 0xa24   :  { %v2413_v2 = vmul.f32 %v2405_v52, %v3868_v20  ;;  %v4570_v16 = vpop.permute.xlu1 %2523  ;;  %v4572_v23 = vpop.permute.xlu2 %2528 }
 0xa27   :  { %v3455_v57 = vpop.eup %3454 }
 0xa28   :  { %v2398_v33 = vpack.c.bf16 %v3455_v57, %v3455_v57 }
 0xa2a   :  { %v2406_v34 = vunpack.c.l.bf16 %v2398_v33 }
 0xa2c   :  { %v2414_v4 = vmul.f32 %v2406_v34, %v3870_v25  ;;  %v2575_v38 = vpop.permute.xlu1 %2574  ;;  %v2579_v1 = vpop.permute.xlu2 %2578 }
 0xa2e   :  { %v2418_v10 = vpack.c.bf16 %v2414_v4, %v2413_v2  ;;  %v2822_v2 = vld [vmem:[#allocation2 + $0x170] sm:$0xff]  ;;  %v2821_v4 = vld [vmem:[#allocation2 + $0x160] sm:$0xff] }
 0xa2f   :  { %2860 = vmatpush.msra.mxu3 %v2822_v2 }
 0xa30   :  { %3166 = vmatmul.msk.bf16.gmra.mxu2 %vm66_vm2, %v2418_v10  ;;  %v2820_v10 = vld [vmem:[#allocation2 + $0x150] sm:$0xff] }
 0xa31   :  { %2861 = vmatpush.msra.mxu3 %v2821_v4 }
 0xa33   :  { %2862 = vmatpush.msra.mxu3 %v2820_v10 }
 0xa34   :  { %v2735_v40 = vpop.permute.xlu1 %2734  ;;  %v4574_v7 = vpop.permute.xlu2 %2533 }
 0xa3c   :  { %v2739_v63 = vpop.permute.xlu1 %2738  ;;  %v2583_v31 = vpop.permute.xlu2 %2582 }
 0xa44   :  { %v2663_v55 = vpop.permute.xlu1 %2662  ;;  %v2743_v61 = vpop.permute.xlu2 %2742 }
 0xa4c   :  { %v4595_v42 = vpop.permute.xlu1 %2538  ;;  %v2747_v51 = vpop.permute.xlu2 %2746 }
 0xa54   :  { %v2667_v32 = vpop.permute.xlu1 %2666  ;;  %v2591_v28 = vpop.permute.xlu2 %2590 }
 0xa5c   :  { %v2671_v59 = vpop.permute.xlu1 %2670  ;;  %v2755_v24 = vpop.permute.xlu2 %2754 }
 0xa64   :  { %v2595_v0 = vpop.permute.xlu1 %2594  ;;  %v2679_v27 = vpop.permute.xlu2 %2678 }
 0xa6c   :  { %v2759_v19 = vpop.permute.xlu2 %2758 }
 0xa83   :  { %v4576_v20 = vpop.f32.mrf.mxu2 }
 0xa84   :  { %v2601_v25 = vmul.f32 %v2571_v53, %v4576_v20  ;;  %v2681_v45 = vmul.f32 %v2651_v62, %v4576_v20  ;;  %v2761_v21 = vmul.f32 %v2731_v60, %v4576_v20  ;;  %v2819_v60 = vld [vmem:[#allocation2 + $0x140] sm:$0xff] }
 0xa85   :  { %2863 = vmatpush.msra.mxu3 %v2819_v60 }
 0xa86   :  { %2777 = vrot.lane.b32.xlu1 %v2761_v21, %s3524_s28  ;;  %2697 = vrot.lane.b32.xlu2 %v2681_v45, %s3522_s1 }
 0xa87   :  { %2617 = vrot.lane.b32.xlu0 %v2601_v25, %s3523_s27 }
 0xa8b   :  { %v4584_v41 = vpop.f32.mrf.mxu2 }
 0xa8c   :  { %v2602_v9 = vmul.f32 %v2575_v38, %v4584_v41  ;;  %v2682_v5 = vmul.f32 %v2655_v36, %v4584_v41  ;;  %v2762_v29 = vmul.f32 %v2735_v40, %v4584_v41  ;;  %v2561_v36 = vmul.f32 %v4570_v16, %v4576_v20  ;;  %v3459_v40 = vld [vmem:[%s4696_s2] sm:$0xff] }
 0xa8e   :  { %2699 = vrot.lane.b32.xlu1 %v2682_v5, %s3522_s1  ;;  %2619 = vrot.lane.b32.xlu2 %v2602_v9, %s3523_s27 }
 0xa8f   :  { %2548 = vperm.xlu0 %3288, %v4512_v18  }
 0xa93   :  { %v4591_v39 = vpop.f32.mrf.mxu2 }
 0xa94   :  { %v2763_v49 = vmul.f32 %v2739_v63, %v4591_v39  ;;  %v2603_v18 = vmul.f32 %v2579_v1, %v4591_v39  ;;  %v2683_v48 = vmul.f32 %v2659_v22, %v4591_v39  ;;  %v4652_v63 = vperm.slane %v3459_v40, 7 }
 0xa96   :  { %2779 = vrot.lane.b32.xlu1 %v2762_v29, %s3524_s28  ;;  %2543 = vperm.xlu2 %3287, %v4497_v50   ;;  %v2587_v50 = vpop.permute.xlu0 %2586 }
 0xa97   :  { %2781 = vrot.lane.b32.xlu0 %v2763_v49, %s3524_s28 }
 0xa9b   :  { %v4600_v35 = vpop.f32.mrf.mxu2 }
 0xa9c   :  { %v2604_v13 = vmul.f32 %v2583_v31, %v4600_v35  ;;  %v2684_v3 = vmul.f32 %v2663_v55, %v4600_v35  ;;  %v2764_v56 = vmul.f32 %v2743_v61, %v4600_v35  ;;  %v2562_v55 = vmul.f32 %v4572_v23, %v4584_v41 }
 0xa9d   :  { %v2564_v41 = vmul.f32 %v4595_v42, %v4600_v35 }
 0xa9e   :  { %2621 = vrot.lane.b32.xlu1 %v2603_v18, %s3523_s27  ;;  %2623 = vrot.lane.b32.xlu2 %v2604_v13, %s3523_s27  ;;  %v2751_v47 = vpop.permute.xlu0 %2750  ;;  %v2563_v18 = vmul.f32 %v4574_v7, %v4591_v39 }
 0xa9f   :  { %2703 = vrot.lane.b32.xlu0 %v2684_v3, %s3522_s1 }
 0xaa3   :  { %v4608_v46 = vpop.f32.mrf.mxu2 }
 0xaa4   :  { %v2605_v14 = vmul.f32 %v2587_v50, %v4608_v46  ;;  %v2765_v54 = vmul.f32 %v2747_v51, %v4608_v46  ;;  %v2685_v58 = vmul.f32 %v2667_v32, %v4608_v46 }
 0xaa6   :  { %2701 = vrot.lane.b32.xlu1 %v2683_v48, %s3522_s1  ;;  %2553 = vperm.xlu2 %3287, %v4520_v30   ;;  %v2675_v52 = vpop.permute.xlu0 %2674 }
 0xaa7   :  { %2625 = vrot.lane.b32.xlu0 %v2605_v14, %s3523_s27 }
 0xaab   :  { %v4615_v6 = vpop.f32.mrf.mxu2 }
 0xaac   :  { %v2686_v30 = vmul.f32 %v2671_v59, %v4615_v6  ;;  %v2606_v12 = vmul.f32 %v2591_v28, %v4615_v6  ;;  %v2766_v17 = vmul.f32 %v2751_v47, %v4615_v6  ;;  %v2901_v47 = vld [vmem:[#allocation2 + $0x1b0] sm:$0xff] }
 0xaad   :  { %2939 = vmatpush.msra.mxu0 %v2901_v47 }
 0xaae   :  { %2783 = vrot.lane.b32.xlu1 %v2764_v56, %s3524_s28  ;;  %2785 = vrot.lane.b32.xlu2 %v2765_v54, %s3524_s28  ;;  %v2599_v33 = vpop.permute.xlu0 %2598 }
 0xab3   :  { %v4621_v26 = vpop.f32.mrf.mxu2 }
 0xab4   :  { %v2607_v37 = vmul.f32 %v2595_v0, %v4621_v26  ;;  %v2767_v43 = vmul.f32 %v2755_v24, %v4621_v26 }
 0xab6   :  { %2705 = vrot.lane.b32.xlu1 %v2685_v58, %s3522_s1  ;;  %2707 = vrot.lane.b32.xlu2 %v2686_v30, %s3522_s1 }
 0xab7   :  { %2629 = vrot.lane.b32.xlu0 %v2607_v37, %s3523_s27 }
 0xabb   :  { %v4634_v44 = vpop.f32.mrf.mxu2 }
 0xabc   :  { %v2688_v8 = vmul.f32 %v2679_v27, %v4634_v44  ;;  %v2768_v57 = vmul.f32 %v2759_v19, %v4634_v44  ;;  %v2608_v34 = vmul.f32 %v2599_v33, %v4634_v44 }
 0xabe   :  { %2627 = vrot.lane.b32.xlu1 %v2606_v12, %s3523_s27  ;;  %2789 = vrot.lane.b32.xlu2 %v2767_v43, %s3524_s28 }
 0xabf   :  { %2558 = vperm.xlu0 %3288, %v4530_v11   ;;  %v2687_v11 = vmul.f32 %v2675_v52, %v4621_v26 }
 0xac6   :  { %2787 = vrot.lane.b32.xlu1 %v2766_v17, %s3524_s28  ;;  %2711 = vrot.lane.b32.xlu2 %v2688_v8, %s3522_s1 }
 0xac7   :  { %2791 = vrot.lane.b32.xlu0 %v2768_v57, %s3524_s28 }
 0xac8   :  { %3289 = vset.pattern.permute.xlu0 %v3519_v15 }
 0xace   :  { %2709 = vrot.lane.b32.xlu1 %v2687_v11, %s3522_s1 }
 0xad6   :  { %2631 = vrot.lane.b32.xlu1 %v2608_v34, %s3523_s27 }
 0xae0   :  { %v2698_v62 = vpop.permute.xlu2 %2697 }
 0xae8   :  { %v2620_v31 = vpop.permute.xlu2 %2619 }
 0xae9   :  { %v2642_v16 = vadd.f32 %v2620_v31, %v2562_v55  ;;  %v2898_v31 = vld [vmem:[#allocation2 + $0x180] sm:$0xff] }
 0xaf0   :  { %v2544_v49 = vpop.permute.xlu2 %2543 }
 0xaf1   :  { %v2565_v7 = vmul.f32 %v2544_v49, %v4608_v46 }
 0xaf8   :  { %v2778_v15 = vpop.permute.xlu1 %2777  ;;  %v2624_v13 = vpop.permute.xlu2 %2623 }
 0xaf9   :  { %v2618_v38 = vpop.permute.xlu0 %2617  ;;  %v2644_v14 = vadd.f32 %v2624_v13, %v2564_v41 }
 0xafa   :  { %v2641_v1 = vadd.f32 %v2618_v38, %v2561_v36 }
 0xafc   :  { %v2721_v53 = vadd.f32 %v2698_v62, %v2641_v1 }
 0xafe   :  { %v2801_v25 = vadd.f32 %v2778_v15, %v2721_v53 }
 0xb00   :  { %v2810_v45 = vadd.f32 %v4652_v63, %v2801_v25  ;;  %v2700_v21 = vpop.permute.xlu1 %2699  ;;  %v2554_v56 = vpop.permute.xlu2 %2553 }
 0xb01   :  { %v2549_v20 = vpop.permute.xlu0 %2548  ;;  %v2722_v9 = vadd.f32 %v2700_v21, %v2642_v16  ;;  %v2567_v33 = vmul.f32 %v2554_v56, %v4621_v26  ;;  %v2899_v21 = vld [vmem:[#allocation2 + $0x190] sm:$0xff] }
 0xb02   :  { %3167 = vmatmul.msk.f32.vlgmr.msra.gmra.mxu3 %vm226_vm1, %v2810_v45  ;;  %v2566_v43 = vmul.f32 %v2549_v20, %v4615_v6  ;;  %v2900_v45 = vld [vmem:[#allocation2 + $0x1a0] sm:$0xff] }
 0xb03   :  { %2940 = vmatpush.msra.mxu0 %v2900_v45 }
 0xb05   :  { %2941 = vmatpush.msra.mxu0 %v2899_v21 }
 0xb07   :  { %2942 = vmatpush.msra.mxu0 %v2898_v31 }
 0xb08   :  { %v2780_v5 = vpop.permute.xlu1 %2779  ;;  %v2786_v35 = vpop.permute.xlu2 %2785 }
 0xb09   :  { %v2802_v61 = vadd.f32 %v2780_v5, %v2722_v9  ;;  %v2782_v22 = vpop.permute.xlu0 %2781 }
 0xb0b   :  { %v2811_v29 = vadd.f32 %v4652_v63, %v2802_v61 }
 0xb0d   :  { %3168 = vmatmul.msk.f32.gmra.mxu3 %vm226_vm1, %v2811_v29 }
 0xb10   :  { %v2622_v51 = vpop.permute.xlu1 %2621  ;;  %v2708_v46 = vpop.permute.xlu2 %2707 }
 0xb11   :  { %v2643_v3 = vadd.f32 %v2622_v51, %v2563_v18  ;;  %v2704_v23 = vpop.permute.xlu0 %2703 }
 0xb12   :  { %v2724_v59 = vadd.f32 %v2704_v23, %v2644_v14 }
 0xb18   :  { %v2702_v32 = vpop.permute.xlu1 %2701  ;;  %v2790_v2 = vpop.permute.xlu2 %2789 }
 0xb19   :  { %v2723_v50 = vadd.f32 %v2702_v32, %v2643_v3  ;;  %v2626_v0 = vpop.permute.xlu0 %2625 }
 0xb1a   :  { %v2645_v58 = vadd.f32 %v2626_v0, %v2565_v7 }
 0xb1b   :  { %v2803_v48 = vadd.f32 %v2782_v22, %v2723_v50 }
 0xb1d   :  { %v2812_v28 = vadd.f32 %v4652_v63, %v2803_v48 }
 0xb1f   :  { %3169 = vmatmul.msk.f32.gmra.mxu3 %vm226_vm1, %v2812_v28 }
 0xb20   :  { %v2784_v54 = vpop.permute.xlu1 %2783  ;;  %v2712_v1 = vpop.permute.xlu2 %2711 }
 0xb21   :  { %v2804_v24 = vadd.f32 %v2784_v54, %v2724_v59 }
 0xb23   :  { %v2813_v39 = vadd.f32 %v4652_v63, %v2804_v24 }
 0xb27   :  { %3170 = vmatmul.msk.f32.gmra.mxu3 %vm226_vm1, %v2813_v39 }
 0xb28   :  { %v2706_v30 = vpop.permute.xlu1 %2705 }
 0xb29   :  { %v2725_v42 = vadd.f32 %v2706_v30, %v2645_v58  ;;  %v2630_v8 = vpop.permute.xlu0 %2629 }
 0xb2a   :  { %v2647_v34 = vadd.f32 %v2630_v8, %v2567_v33 }
 0xb2b   :  { %v2805_v37 = vadd.f32 %v2786_v35, %v2725_v42 }
 0xb2d   :  { %v2814_v27 = vadd.f32 %v4652_v63, %v2805_v37 }
 0xb2f   :  { %3171 = vmatmul.msk.f32.gmra.mxu3 %vm226_vm1, %v2814_v27 }
 0xb30   :  { %v2628_v12 = vpop.permute.xlu1 %2627 }
 0xb31   :  { %v2646_v19 = vadd.f32 %v2628_v12, %v2566_v43  ;;  %v2559_v60 = vpop.permute.xlu0 %2558 }
 0xb32   :  { %v2568_v15 = vmul.f32 %v2559_v60, %v4634_v44  ;;  %v3460_v44 = vld [vmem:[%s4696_s2 + $0x8] sm:$0xff]  ;;  %s3526_s2 = smov [#allocation5]  }
 0xb33   :  { %v2726_v17 = vadd.f32 %v2708_v46, %v2646_v19  ;;  %v2823_v55 = vperm.slane %v3460_v44, 4  ;;  %v2902_v0 = vperm.slane %v3460_v44, 5  ;;  %s2980_s14 = sshll.u32 %s3526_s2, 4  ;;  %s2981_s14 = int_to_ptr.vmem [resolvable:$true] %s2980_s14 }
 0xb38   :  { %v2788_v57 = vpop.permute.xlu1 %2787 }
 0xb39   :  { %v2806_v52 = vadd.f32 %v2788_v57, %v2726_v17  ;;  %v2792_v53 = vpop.permute.xlu0 %2791 }
 0xb3b   :  { %v2815_v11 = vadd.f32 %v4652_v63, %v2806_v52 }
 0xb3d   :  { %3172 = vmatmul.msk.f32.gmra.mxu3 %vm226_vm1, %v2815_v11 }
 0xb40   :  { %v2710_v4 = vpop.permute.xlu1 %2709 }
 0xb41   :  { %v2727_v10 = vadd.f32 %v2710_v4, %v2647_v34 }
 0xb43   :  { %v2807_v6 = vadd.f32 %v2790_v2, %v2727_v10 }
 0xb45   :  { %v2816_v62 = vadd.f32 %v4652_v63, %v2807_v6 }
 0xb47   :  { %3173 = vmatmul.msk.f32.gmra.mxu3 %vm226_vm1, %v2816_v62 }
 0xb48   :  { %v2632_v36 = vpop.permute.xlu1 %2631 }
 0xb49   :  { %v2648_v38 = vadd.f32 %v2632_v36, %v2568_v15 }
 0xb4b   :  { %v2728_v40 = vadd.f32 %v2712_v1, %v2648_v38 }
 0xb4d   :  { %v2808_v26 = vadd.f32 %v2792_v53, %v2728_v40 }
 0xb4f   :  { %v2817_v25 = vadd.f32 %v4652_v63, %v2808_v26 }
 0xb51   :  { %3174 = vmatmul.msk.f32.gmra.mxu3 %vm226_vm1, %v2817_v25 }
 0xb85   :  { %v2865_v16 = vpop.f32.mrf.mxu3 }
 0xb86   :  { %v2866_v20 = vadd.f32 %v2865_v16, %v2823_v55 }
 0xb88   :  { %v2889_v9 = vmax.f32 %v2866_v20, 0.0 }
 0xb8a   :  { %3175 = vmatmul.msk.f32.vlgmr.msra.gmra.mxu0 %vm226_vm1, %v2889_v9 }
 0xb90   :  { %v2868_v5 = vpop.f32.mrf.mxu3 }
 0xb91   :  { %v2869_v63 = vadd.f32 %v2868_v5, %v2823_v55 }
 0xb93   :  { %v2890_v61 = vmax.f32 %v2869_v63, 0.0 }
 0xb95   :  { %3176 = vmatmul.msk.f32.gmra.mxu0 %vm226_vm1, %v2890_v61 }
 0xba2   :  { %v2871_v29 = vpop.f32.mrf.mxu3 }
 0xba3   :  { %v2872_v49 = vadd.f32 %v2871_v29, %v2823_v55 }
 0xba5   :  { %v2891_v22 = vmax.f32 %v2872_v49, 0.0 }
 0xba7   :  { %3177 = vmatmul.msk.f32.gmra.mxu0 %vm226_vm1, %v2891_v22 }
 0xbaa   :  { %v2874_v51 = vpop.f32.mrf.mxu3 }
 0xbab   :  { %v2875_v18 = vadd.f32 %v2874_v51, %v2823_v55 }
 0xbad   :  { %v2892_v13 = vmax.f32 %v2875_v18, 0.0 }
 0xbaf   :  { %3178 = vmatmul.msk.f32.gmra.mxu0 %vm226_vm1, %v2892_v13 }
 0xbb2   :  { %v2877_v3 = vpop.f32.mrf.mxu3 }
 0xbb3   :  { %v2878_v32 = vadd.f32 %v2877_v3, %v2823_v55 }
 0xbb5   :  { %v2893_v50 = vmax.f32 %v2878_v32, 0.0 }
 0xbb7   :  { %3179 = vmatmul.msk.f32.gmra.mxu0 %vm226_vm1, %v2893_v50 }
 0xbc0   :  { %v2880_v23 = vpop.f32.mrf.mxu3 }
 0xbc1   :  { %v2881_v41 = vadd.f32 %v2880_v23, %v2823_v55 }
 0xbc3   :  { %v2894_v48 = vmax.f32 %v2881_v41, 0.0 }
 0xbc5   :  { %3180 = vmatmul.msk.f32.gmra.mxu0 %vm226_vm1, %v2894_v48 }
 0xbca   :  { %v2883_v14 = vpop.f32.mrf.mxu3 }
 0xbcb   :  { %v2884_v28 = vadd.f32 %v2883_v14, %v2823_v55 }
 0xbcd   :  { %v2895_v59 = vmax.f32 %v2884_v28, 0.0 }
 0xbcf   :  { %3181 = vmatmul.msk.f32.gmra.mxu0 %vm226_vm1, %v2895_v59 }
 0xbd4   :  { %v2886_v56 = vpop.f32.mrf.mxu3 }
 0xbd5   :  { %v2887_v54 = vadd.f32 %v2886_v56, %v2823_v55 }
 0xbd7   :  { %v2896_v24 = vmax.f32 %v2887_v54, 0.0 }
 0xbd9   :  { %3182 = vmatmul.msk.f32.gmra.mxu0 %vm226_vm1, %v2896_v24 }
 0xc07   :  { %v2944_v7 = vpop.f32.mrf.mxu0 }
 0xc08   :  { %v2945_v39 = vadd.f32 %v2944_v7, %v2902_v0 }
 0xc0a   :  { %2968 = vst [vmem:[#allocation5] sm:$0xff] %v2945_v39 }
 0xc12   :  { %v2947_v58 = vpop.f32.mrf.mxu0 }
 0xc13   :  { %v2948_v30 = vadd.f32 %v2947_v58, %v2902_v0 }
 0xc15   :  { %2969 = vst [vmem:[#allocation5 + $0x8] sm:$0xff] %v2948_v30 }
 0xc24   :  { %v2950_v42 = vpop.f32.mrf.mxu0 }
 0xc25   :  { %v2951_v35 = vadd.f32 %v2950_v42, %v2902_v0 }
 0xc27   :  { %2970 = vst [vmem:[#allocation5 + $0x10] sm:$0xff] %v2951_v35 }
 0xc2c   :  { %v2953_v37 = vpop.f32.mrf.mxu0 }
 0xc2d   :  { %v2954_v27 = vadd.f32 %v2953_v37, %v2902_v0 }
 0xc2f   :  { %2971 = vst [vmem:[#allocation5 + $0x18] sm:$0xff] %v2954_v27 }
 0xc34   :  { %v2956_v12 = vpop.f32.mrf.mxu0 }
 0xc35   :  { %v2957_v43 = vadd.f32 %v2956_v12, %v2902_v0 }
 0xc37   :  { %2972 = vst [vmem:[#allocation5 + $0x20] sm:$0xff] %v2957_v43 }
 0xc42   :  { %v2959_v47 = vpop.f32.mrf.mxu0 }
 0xc43   :  { %v2960_v19 = vadd.f32 %v2959_v47, %v2902_v0 }
 0xc45   :  { %2973 = vst [vmem:[#allocation5 + $0x28] sm:$0xff] %v2960_v19 }
 0xc4c   :  { %v2962_v46 = vpop.f32.mrf.mxu0 }
 0xc4d   :  { %v2963_v17 = vadd.f32 %v2962_v46, %v2902_v0 }
 0xc4f   :  { %2974 = vst [vmem:[#allocation5 + $0x30] sm:$0xff] %v2963_v17 }
 0xc56   :  { %v2965_v8 = vpop.f32.mrf.mxu0 }
 0xc57   :  { %v2966_v57 = vadd.f32 %v2965_v8, %v2902_v0 }
 0xc59   :  { %2975 = vst [vmem:[#allocation5 + $0x38] sm:$0xff] %v2966_v57 }
 0xc5a   :  { %2988 = dma.vmem_to_hbm [thread:$0]  %s2981_s14, 1024, %s2983_s17, [#allocation4], %s3527_s18, %s3527_s18, %s3528_s19  }
 0xc5b   :  { %3511 = dma.done.wait [#allocation4], 1024  }
 0xc5c   :  { %3512 = vsyncadd [#allocation4], 4294966272 }
 0xc5d   :  { %2993 = vsyncpa [#allocation3], 1 }
 0xc5e   :  { %2994 = vsyncpa [#allocation4], 1 }

</bundles_post_ra>
